<compile_context>
chip_gen: v6e
topology: v6e:2x2x1
jax: 0.10.0
libtpu: 0.0.40
codegen_flags: <defaults>
</compile_context>

<pallas_src>
import functools

import jax
import jax.numpy as jnp
from jax.experimental import pallas as pl
from jax.experimental.pallas import tpu as pltpu


# -----------------------------------------------------------------------------
# Plain-JAX glue: ball-query neighbour selection (data-dependent sort).
# -----------------------------------------------------------------------------
def square_distance(src, dst):
    # src [B,N,C], dst [B,M,C] -> [B,N,M]
    dist = -2.0 * jnp.einsum("bnc,bmc->bnm", src, dst)
    dist = dist + jnp.sum(src ** 2, axis=-1)[:, :, None]
    dist = dist + jnp.sum(dst ** 2, axis=-1)[:, None, :]
    return dist


def query_ball_point(radius, nsample, xyz, new_xyz):
    B, N, _ = xyz.shape
    S = new_xyz.shape[1]
    sqrdists = square_distance(new_xyz, xyz)  # [B,S,N]
    group_idx = jnp.broadcast_to(jnp.arange(N, dtype=jnp.int32), (B, S, N))
    group_idx = jnp.where(sqrdists > radius ** 2, N, group_idx)
    group_idx = jnp.sort(group_idx, axis=-1)[:, :, :nsample]
    group_first = group_idx[:, :, :1]
    group_idx = jnp.where(group_idx == N, group_first, group_idx)
    return group_idx


def index_points(points, idx):
    # points [B,N,C], idx [B,S,ns] -> [B,S,ns,C]   (reference-path only)
    return jax.vmap(lambda p, i: p[i])(points, idx)


# -----------------------------------------------------------------------------
# Pallas kernel: fused (Linear -> folded-BN -> ReLU) x 2 + max over nsample.
# Inputs are channel-major and lane-dense; within a tile column = s*tm + p.
# -----------------------------------------------------------------------------
def _mlp_max_kernel(xyz_ref, feat_ref, w1x_ref, w1f_ref, b1_ref, w2_ref, b2_ref,
                    o_ref, *, tm, nsample):
    # Layer 1: split-K matmul (xyz branch f32, feature branch bf16), f32 acc.
    h = jnp.dot(w1x_ref[...], xyz_ref[...], preferred_element_type=jnp.float32)
    h = h + jnp.dot(w1f_ref[...], feat_ref[...],
                    preferred_element_type=jnp.float32)
    # Fused bias + ReLU + bf16 cast: single (c1, tm*S) bf16 materialization.
    h = jnp.maximum(h + b1_ref[...], 0.0).astype(jnp.bfloat16)
    # Layer 2 (bf16 operands, f32 accumulation), bias + ReLU in f32 (v5e-safe).
    h = jnp.dot(w2_ref[...], h, preferred_element_type=jnp.float32)
    h = jnp.maximum(h + b2_ref[...], 0.0)
    # Max over the neighbourhood: pairwise binary tree over lane-aligned
    # static slices of width tm (column ordering is s-major within the tile).
    parts = [h[:, s * tm:(s + 1) * tm] for s in range(nsample)]
    while len(parts) > 1:
        nxt = [jnp.maximum(parts[k], parts[k + 1])
               for k in range(0, len(parts) - 1, 2)]
        if len(parts) % 2:
            nxt.append(parts[-1])
        parts = nxt
    o_ref[...] = parts[0]                               # (c2, tm) lane-dense


@functools.partial(jax.jit, static_argnames=("tm", "vmem_limit_bytes"))
def local_aggregation_mlp_max(position, feature, idx, w1, b1, w2, b2, *,
                              tm=1024, vmem_limit_bytes=None):
    """position [B,N,3], feature [B,N,D], idx [B,N,S] -> pooled [B,N,Cout]."""
    B, N, _ = position.shape
    D = feature.shape[-1]
    S = idx.shape[-1]
    c1 = w1.shape[1]
    c2 = w2.shape[1]
    M = B * N
    assert tm % 128 == 0, "tm must be a multiple of 128 for lane-dense blocks"

    n_grid = pl.cdiv(M, tm)
    n_grid += n_grid % 2            # even tile count -> both v7x TCs get work
    M_pad = n_grid * tm
    W = n_grid * S * tm

    # Flat neighbour indices into [0, B*N), padded, then permuted so that the
    # gather OUTPUT is already in the kernel's channel-major column ordering
    # col = i*(S*tm) + s*tm + p_local.  This replaces the old full-size
    # reshape/transpose of `grouped` with a permutation of a small int32 array.
    flat_idx = (idx.astype(jnp.int32)
                + (jnp.arange(B, dtype=jnp.int32) * N)[:, None, None]
                ).reshape(M, S)
    flat_idx = jnp.pad(flat_idx, ((0, M_pad - M), (0, 0)))
    idx_perm = flat_idx.reshape(n_grid, tm, S).transpose(0, 2, 1).reshape(W)

    # Channel-major gather sources (B*N-sized, cheap to build).
    xyz_cm = position.reshape(M, 3).T                        # (3, M)  f32
    feat_cm = feature.reshape(M, D).T.astype(jnp.bfloat16)   # (D, M)  bf16

    # Channel-major gathers: grouped data lands in its final layout in one pass.
    feat_g = jnp.take(feat_cm, idx_perm, axis=1)             # (D, W)  bf16
    xyz_g = jnp.take(xyz_cm, idx_perm, axis=1)               # (3, W)  f32
    ctr = jnp.pad(xyz_cm, ((0, 0), (0, M_pad - M)))          # (3, M_pad)
    ctr_b = jnp.broadcast_to(ctr.reshape(3, n_grid, 1, tm),
                             (3, n_grid, S, tm)).reshape(3, W)
    xyzn_g = xyz_g - ctr_b                                    # relative xyz, f32

    # Split + fold weights (BN folded in inference mode; see init_params).
    w1 = jnp.asarray(w1)
    w1x = w1[:3, :].T.astype(jnp.float32)                    # (c1, 3)  f32
    w1f = w1[3:, :].T.astype(jnp.bfloat16)                   # (c1, D)  bf16
    b1c = jnp.asarray(b1).reshape(c1, 1).astype(jnp.float32)
    w2T = jnp.asarray(w2).T.astype(jnp.bfloat16)             # (c2, c1) bf16
    b2c = jnp.asarray(b2).reshape(c2, 1).astype(jnp.float32)

    cparams = dict(dimension_semantics=("parallel",))
    if vmem_limit_bytes is not None:
        cparams["vmem_limit_bytes"] = vmem_limit_bytes

    outT = pl.pallas_call(
        functools.partial(_mlp_max_kernel, tm=tm, nsample=S),
        out_shape=jax.ShapeDtypeStruct((c2, M_pad), jnp.float32),
        grid_spec=pltpu.PrefetchScalarGridSpec(
            num_scalar_prefetch=0,
            grid=(n_grid,),
            in_specs=[
                # streamed, lane-dense channel-major blocks
                pl.BlockSpec((3, tm * S), lambda i: (0, i)),
                pl.BlockSpec((D, tm * S), lambda i: (0, i)),
                # constant weights/biases: resident full-array VMEM operands
                pl.BlockSpec(memory_space=pltpu.MemorySpace.VMEM),
                pl.BlockSpec(memory_space=pltpu.MemorySpace.VMEM),
                pl.BlockSpec(memory_space=pltpu.MemorySpace.VMEM),
                pl.BlockSpec(memory_space=pltpu.MemorySpace.VMEM),
                pl.BlockSpec(memory_space=pltpu.MemorySpace.VMEM),
            ],
            out_specs=pl.BlockSpec((c2, tm), lambda i: (0, i)),
        ),
        compiler_params=pltpu.CompilerParams(**cparams),
    )(xyzn_g, feat_g, w1x, w1f, b1c, w2T, b2c)

    return outT[:, :M].T.reshape(B, N, c2)


def local_aggregation_forward(position, feature, params, *, radius, nsample,
                              tm=1024):
    """Mirrors LocalAggregation.forward: returns [position, pooled_feature]."""
    idx = query_ball_point(radius, nsample, position, position)   # [B,N,S]
    (w1, b1), (w2, b2) = params
    pooled = local_aggregation_mlp_max(position, feature, idx, w1, b1, w2, b2,
                                       tm=tm)
    return [position, pooled], idx


# -----------------------------------------------------------------------------
# Deterministic parameter init (Linear weight + inference-mode BN folded).
# -----------------------------------------------------------------------------
def init_params(key, channels):
    params = []
    for i in range(len(channels) - 1):
        cin, cout = channels[i], channels[i + 1]
        key, kw, kg, kb, km, kv = jax.random.split(key, 6)
        w = jax.random.normal(kw, (cin, cout), jnp.float32) / jnp.sqrt(cin)
        gamma = 1.0 + 0.1 * jax.random.normal(kg, (cout,), jnp.float32)
        beta = 0.1 * jax.random.normal(kb, (cout,), jnp.float32)
        r_mean = 0.1 * jax.random.normal(km, (cout,), jnp.float32)
        r_var = 1.0 + 0.1 * jax.random.uniform(kv, (cout,), jnp.float32)
        scale = gamma / jnp.sqrt(r_var + 1e-5)
        w_folded = w * scale[None, :]
        b_folded = beta - r_mean * scale
        params.append((w_folded, b_folded))
    return params


if __name__ == "__main__":
    key = jax.random.PRNGKey(0)
    B, N, D = 2, 256, 13
    nsample = 16
    radius = 0.3
    channels = [D + 3, 32, 32]   # channels[0] += 3 as in LocalAggregation.__init__
    tm = 256                     # B*N/tm = 2 tiles -> both v7x TCs get work

    k_pos, k_feat, k_par = jax.random.split(key, 3)
    position = jax.random.uniform(k_pos, (B, N, 3), jnp.float32)
    feature = jax.random.normal(k_feat, (B, N, D), jnp.float32)
    params = init_params(k_par, channels)

    (pos_out, pooled), idx = local_aggregation_forward(
        position, feature, params, radius=radius, nsample=nsample, tm=tm
    )
    pooled = jax.block_until_ready(pooled)

    # Pure-JAX reference mirroring the kernel's precision choices
    # (f32 xyz branch, bf16 feature/weight operands, f32 accumulation,
    #  bf16 layer-1 intermediate, f32 epilogue).
    (w1, b1), (w2, b2) = params
    f32 = jnp.float32
    grouped_xyz = index_points(position, idx) - position[:, :, None, :]   # f32
    grouped_feat = index_points(feature, idx)                              # f32
    featb = grouped_feat.astype(jnp.bfloat16).astype(f32)
    w1x = w1[:3].astype(f32)
    w1f = w1[3:].astype(jnp.bfloat16).astype(f32)
    w2b = w2.astype(jnp.bfloat16).astype(f32)
    h = (jnp.einsum("bnsc,ck->bnsk", grouped_xyz, w1x)
         + jnp.einsum("bnsc,ck->bnsk", featb, w1f) + b1)
    h = jnp.maximum(h, 0.0).astype(jnp.bfloat16).astype(f32)
    h = jnp.maximum(jnp.einsum("bnsc,ck->bnsk", h, w2b) + b2, 0.0)
    ref = jnp.max(h, axis=2)

    assert pooled.shape == (B, N, channels[-1])
    err = float(jnp.max(jnp.abs(pooled - ref)))
    assert jnp.allclose(pooled, ref, rtol=2e-2, atol=2e-2), err
    print("KERNEL_OK")
</pallas_src>

<mosaic_0001>
module attributes {stable_mosaic.version = 11 : i64} {
  func.func @_mlp_max_kernel(%arg0: i32, %arg1: memref<3x4096xf32, #tpu.memory_space<vmem>>, %arg2: memref<13x4096xbf16, #tpu.memory_space<vmem>>, %arg3: memref<32x3xf32, #tpu.memory_space<vmem>>, %arg4: memref<32x13xbf16, #tpu.memory_space<vmem>>, %arg5: memref<32x1xf32, #tpu.memory_space<vmem>>, %arg6: memref<32x32xbf16, #tpu.memory_space<vmem>>, %arg7: memref<32x1xf32, #tpu.memory_space<vmem>>, %arg8: memref<32x256xf32, #tpu.memory_space<vmem>>) attributes {dimension_semantics = [#tpu.dimension_semantics<parallel>], iteration_bounds = array<i64: 2>, scalar_prefetch = 0 : i64, scratch_operands = 0 : i64, tpu.core_type = #tpu.core_type<tc>, window_params = [{transform_indices = @transform_0, window_bounds = array<i64: 3, 4096>}, {transform_indices = @transform_1, window_bounds = array<i64: 13, 4096>}, {pipeline_mode = #tpu.pipeline_mode<synchronous>, transform_indices = @transform_2, window_bounds = array<i64: 32, 3>}, {pipeline_mode = #tpu.pipeline_mode<synchronous>, transform_indices = @transform_3, window_bounds = array<i64: 32, 13>}, {pipeline_mode = #tpu.pipeline_mode<synchronous>, transform_indices = @transform_4, window_bounds = array<i64: 32, 1>}, {pipeline_mode = #tpu.pipeline_mode<synchronous>, transform_indices = @transform_5, window_bounds = array<i64: 32, 32>}, {pipeline_mode = #tpu.pipeline_mode<synchronous>, transform_indices = @transform_6, window_bounds = array<i64: 32, 1>}, {transform_indices = @transform_7, window_bounds = array<i64: 32, 256>}]} {
    %c0 = arith.constant 0 : index
    %c0_0 = arith.constant 0 : index
    %0 = vector.load %arg3[%c0, %c0_0] : memref<32x3xf32, #tpu.memory_space<vmem>>, vector<32x3xf32>
    %c0_1 = arith.constant 0 : index
    %c0_2 = arith.constant 0 : index
    %1 = vector.load %arg1[%c0_1, %c0_2] : memref<3x4096xf32, #tpu.memory_space<vmem>>, vector<3x4096xf32>
    %cst = arith.constant dense<0.000000e+00> : vector<32x4096xf32>
    %2 = tpu.matmul %0, %1, %cst {dimension_numbers = #tpu.dot_dimension_numbers<[1], [0], [0], [1], [0, 0, 1, 1], [], []>} : vector<32x3xf32>, vector<3x4096xf32>, vector<32x4096xf32> -> vector<32x4096xf32>
    %c0_3 = arith.constant 0 : index
    %c0_4 = arith.constant 0 : index
    %3 = vector.load %arg4[%c0_3, %c0_4] : memref<32x13xbf16, #tpu.memory_space<vmem>>, vector<32x13xbf16>
    %c0_5 = arith.constant 0 : index
    %c0_6 = arith.constant 0 : index
    %4 = vector.load %arg2[%c0_5, %c0_6] : memref<13x4096xbf16, #tpu.memory_space<vmem>>, vector<13x4096xbf16>
    %cst_7 = arith.constant dense<0.000000e+00> : vector<32x4096xf32>
    %5 = tpu.matmul %3, %4, %cst_7 {dimension_numbers = #tpu.dot_dimension_numbers<[1], [0], [0], [1], [0, 0, 1, 1], [], []>} : vector<32x13xbf16>, vector<13x4096xbf16>, vector<32x4096xf32> -> vector<32x4096xf32>
    %6 = arith.addf %2, %5 : vector<32x4096xf32>
    %c0_8 = arith.constant 0 : index
    %c0_9 = arith.constant 0 : index
    %7 = vector.load %arg5[%c0_8, %c0_9] : memref<32x1xf32, #tpu.memory_space<vmem>>, vector<32x1xf32>
    %8 = vector.broadcast %7 : vector<32x1xf32> to vector<32x4096xf32>
    %9 = arith.addf %6, %8 : vector<32x4096xf32>
    %cst_10 = arith.constant 0.000000e+00 : f32
    %10 = vector.broadcast %cst_10 : f32 to vector<32x4096xf32>
    %11 = arith.maximumf %9, %10 : vector<32x4096xf32>
    %12 = arith.truncf %11 : vector<32x4096xf32> to vector<32x4096xbf16>
    %c0_11 = arith.constant 0 : index
    %c0_12 = arith.constant 0 : index
    %13 = vector.load %arg6[%c0_11, %c0_12] : memref<32x32xbf16, #tpu.memory_space<vmem>>, vector<32x32xbf16>
    %cst_13 = arith.constant dense<0.000000e+00> : vector<32x4096xf32>
    %14 = tpu.matmul %13, %12, %cst_13 {dimension_numbers = #tpu.dot_dimension_numbers<[1], [0], [0], [1], [0, 0, 1, 1], [], []>} : vector<32x32xbf16>, vector<32x4096xbf16>, vector<32x4096xf32> -> vector<32x4096xf32>
    %c0_14 = arith.constant 0 : index
    %c0_15 = arith.constant 0 : index
    %15 = vector.load %arg7[%c0_14, %c0_15] : memref<32x1xf32, #tpu.memory_space<vmem>>, vector<32x1xf32>
    %16 = vector.broadcast %15 : vector<32x1xf32> to vector<32x4096xf32>
    %17 = arith.addf %14, %16 : vector<32x4096xf32>
    %cst_16 = arith.constant 0.000000e+00 : f32
    %18 = vector.broadcast %cst_16 : f32 to vector<32x4096xf32>
    %19 = arith.maximumf %17, %18 : vector<32x4096xf32>
    %20 = vector.extract_strided_slice %19 {offsets = [0, 0], sizes = [32, 256], strides = [1, 1]} : vector<32x4096xf32> to vector<32x256xf32>
    %21 = vector.extract_strided_slice %19 {offsets = [0, 256], sizes = [32, 256], strides = [1, 1]} : vector<32x4096xf32> to vector<32x256xf32>
    %22 = vector.extract_strided_slice %19 {offsets = [0, 512], sizes = [32, 256], strides = [1, 1]} : vector<32x4096xf32> to vector<32x256xf32>
    %23 = vector.extract_strided_slice %19 {offsets = [0, 768], sizes = [32, 256], strides = [1, 1]} : vector<32x4096xf32> to vector<32x256xf32>
    %24 = vector.extract_strided_slice %19 {offsets = [0, 1024], sizes = [32, 256], strides = [1, 1]} : vector<32x4096xf32> to vector<32x256xf32>
    %25 = vector.extract_strided_slice %19 {offsets = [0, 1280], sizes = [32, 256], strides = [1, 1]} : vector<32x4096xf32> to vector<32x256xf32>
    %26 = vector.extract_strided_slice %19 {offsets = [0, 1536], sizes = [32, 256], strides = [1, 1]} : vector<32x4096xf32> to vector<32x256xf32>
    %27 = vector.extract_strided_slice %19 {offsets = [0, 1792], sizes = [32, 256], strides = [1, 1]} : vector<32x4096xf32> to vector<32x256xf32>
    %28 = vector.extract_strided_slice %19 {offsets = [0, 2048], sizes = [32, 256], strides = [1, 1]} : vector<32x4096xf32> to vector<32x256xf32>
    %29 = vector.extract_strided_slice %19 {offsets = [0, 2304], sizes = [32, 256], strides = [1, 1]} : vector<32x4096xf32> to vector<32x256xf32>
    %30 = vector.extract_strided_slice %19 {offsets = [0, 2560], sizes = [32, 256], strides = [1, 1]} : vector<32x4096xf32> to vector<32x256xf32>
    %31 = vector.extract_strided_slice %19 {offsets = [0, 2816], sizes = [32, 256], strides = [1, 1]} : vector<32x4096xf32> to vector<32x256xf32>
    %32 = vector.extract_strided_slice %19 {offsets = [0, 3072], sizes = [32, 256], strides = [1, 1]} : vector<32x4096xf32> to vector<32x256xf32>
    %33 = vector.extract_strided_slice %19 {offsets = [0, 3328], sizes = [32, 256], strides = [1, 1]} : vector<32x4096xf32> to vector<32x256xf32>
    %34 = vector.extract_strided_slice %19 {offsets = [0, 3584], sizes = [32, 256], strides = [1, 1]} : vector<32x4096xf32> to vector<32x256xf32>
    %35 = vector.extract_strided_slice %19 {offsets = [0, 3840], sizes = [32, 256], strides = [1, 1]} : vector<32x4096xf32> to vector<32x256xf32>
    %36 = arith.maximumf %20, %21 : vector<32x256xf32>
    %37 = arith.maximumf %22, %23 : vector<32x256xf32>
    %38 = arith.maximumf %24, %25 : vector<32x256xf32>
    %39 = arith.maximumf %26, %27 : vector<32x256xf32>
    %40 = arith.maximumf %28, %29 : vector<32x256xf32>
    %41 = arith.maximumf %30, %31 : vector<32x256xf32>
    %42 = arith.maximumf %32, %33 : vector<32x256xf32>
    %43 = arith.maximumf %34, %35 : vector<32x256xf32>
    %44 = arith.maximumf %36, %37 : vector<32x256xf32>
    %45 = arith.maximumf %38, %39 : vector<32x256xf32>
    %46 = arith.maximumf %40, %41 : vector<32x256xf32>
    %47 = arith.maximumf %42, %43 : vector<32x256xf32>
    %48 = arith.maximumf %44, %45 : vector<32x256xf32>
    %49 = arith.maximumf %46, %47 : vector<32x256xf32>
    %50 = arith.maximumf %48, %49 : vector<32x256xf32>
    %c0_17 = arith.constant 0 : index
    %c0_18 = arith.constant 0 : index
    %51 = vector.load %arg8[%c0_17, %c0_18] : memref<32x256xf32, #tpu.memory_space<vmem>>, vector<32x256xf32>
    tpu.vector_store %arg8[%c0_17, %c0_18], %50 {strides = array<i32>} : memref<32x256xf32, #tpu.memory_space<vmem>>, vector<32x256xf32>,
    return
  }
  func.func @transform_0(%arg0: i32) -> (i32, i32) {
    %c0_i32 = arith.constant 0 : i32
    %c0_i32_0 = arith.constant 0 : i32
    return %c0_i32, %arg0 : i32, i32
  }
  func.func @transform_1(%arg0: i32) -> (i32, i32) {
    %c0_i32 = arith.constant 0 : i32
    %c0_i32_0 = arith.constant 0 : i32
    return %c0_i32, %arg0 : i32, i32
  }
  func.func @transform_2(%arg0: i32) -> (i32, i32) {
    %c0_i32 = arith.constant 0 : i32
    %c0_i32_0 = arith.constant 0 : i32
    %c0_i32_1 = arith.constant 0 : i32
    return %c0_i32, %c0_i32_0 : i32, i32
  }
  func.func @transform_3(%arg0: i32) -> (i32, i32) {
    %c0_i32 = arith.constant 0 : i32
    %c0_i32_0 = arith.constant 0 : i32
    %c0_i32_1 = arith.constant 0 : i32
    return %c0_i32, %c0_i32_0 : i32, i32
  }
  func.func @transform_4(%arg0: i32) -> (i32, i32) {
    %c0_i32 = arith.constant 0 : i32
    %c0_i32_0 = arith.constant 0 : i32
    %c0_i32_1 = arith.constant 0 : i32
    return %c0_i32, %c0_i32_0 : i32, i32
  }
  func.func @transform_5(%arg0: i32) -> (i32, i32) {
    %c0_i32 = arith.constant 0 : i32
    %c0_i32_0 = arith.constant 0 : i32
    %c0_i32_1 = arith.constant 0 : i32
    return %c0_i32, %c0_i32_0 : i32, i32
  }
  func.func @transform_6(%arg0: i32) -> (i32, i32) {
    %c0_i32 = arith.constant 0 : i32
    %c0_i32_0 = arith.constant 0 : i32
    %c0_i32_1 = arith.constant 0 : i32
    return %c0_i32, %c0_i32_0 : i32, i32
  }
  func.func @transform_7(%arg0: i32) -> (i32, i32) {
    %c0_i32 = arith.constant 0 : i32
    %c0_i32_0 = arith.constant 0 : i32
    return %c0_i32, %arg0 : i32, i32
  }
}

</mosaic_0001>

<bundles_post_ra>
// kernel: local_aggregation_mlp_max.1
= control target key start
LH: loop header
LB: loop body
LE: loop exit
PB: predicated region body
PF: predicated region fallthrough
CT: control target
= control target key end

     0   :  { %s4998_s24 = smov 0   ;;  %s5000_s25 = smov 0   ;;  %s6663_s0 = inlined_call_operand.vmem [shape: f32[3,8192], index: 0, kind: input, shape index: {}]   ;;  %s6664_s1 = inlined_call_operand.vmem [shape: bf16[13,8192], index: 1, kind: input, shape index: {}]   ;;  %s6665_s2 = inlined_call_operand.vmem [shape: f32[32,3], index: 2, kind: input, shape index: {}]   ;;  %s6666_s3 = inlined_call_operand.vmem [shape: bf16[32,13], index: 3, kind: input, shape index: {}]   ;;  %s6667_s4 = inlined_call_operand.vmem [shape: f32[32,1], index: 4, kind: input, shape index: {}]   ;;  %s6668_s5 = inlined_call_operand.vmem [shape: bf16[32,32], index: 5, kind: input, shape index: {}]   ;;  %s6669_s6 = inlined_call_operand.vmem [shape: f32[32,1], index: 6, kind: input, shape index: {}]   ;;  %s6670_s7 = inlined_call_operand.vmem [shape: f32[32,512], index: 7, kind: output, shape index: {}]  }
   0x1   :  { %s5002_s26 = smov 0  }
   0x2 LB: > { %s5014_s27 = sadd.s32 4294967295, %s4953_s26   ;;  %s5017_s28 = sadd.s32 1, %s4953_s26   ;;  %s4953_s26 = sphi %s5002_s26, %s6863_s26   ;;  %s4949_s25 = sphi %s5000_s25, %s6862_s25   ;;  %s4945_s24 = sphi %s4998_s24, %s6861_s24  }
   0x3   : > { %s47_s29 = ssub.s32 %s4953_s26, %s5017_s28  ;;  %s50_s30 = sadd.s32 1, %s4949_s25 }
   0x4   : > { %p48_p0 = scmp.eq.s32.totalorder %s47_s29, 0  ;;  %p57_p1 = scmp.ne.s32.totalorder %s4949_s25, %s4945_s24 }
   0x5   : > { %p58_p2 = scmp.eq.s32.totalorder %s4953_s26, 0  ;;  %p192_p3 = scmp.eq.s32.totalorder %s5014_s27, 1 }
   0x6   : > { %s5027_s8 = scalar_select %p48_p0, %s4949_s25, %s50_s30  }
   0x7   : > { %p59_p4 = por %p58_p2, %p57_p1  ;;  %p5029_p5 = por %p192_p3, %p57_p1 }
   0x8   : > { %p4668_p6 = scmp.ge.s32.totalorder %s4953_s26, 2 }
   0xa   : > { %229 = sbr.rel (%p4668_p6) target bundleno = 35 (0x23), region = 36 }
   0xf   : > { %241 = sbr.rel (!%p59_p4) target bundleno = 35 (0x23), region = 44  ;;  %s243_s10 = sand.u32 (%p59_p4), 1, %s4949_s25  }
  0x10   : > { %s4878_s11 = sshll.u32 (%p59_p4), %s4953_s26, 7  ;;  %s4669_s12 = sshll.u32 (%p59_p4), %s243_s10, 8 }
  0x11   : > { %s5039_s15 = scalar_lea.vmem (%p59_p4), %s6664_s1, %s4878_s11  ;;  %s5044_s16 = scalar_lea.vmem (%p59_p4), [#allocation2], %s4669_s12 }
  0x12   : > { %v261_v0 = vld [vmem:[%s5039_s15] sm:$0xff] (%p59_p4)  ;;  %v263_v1 = vld [vmem:[%s5039_s15 + $0x8] sm:$0xff] (%p59_p4)  ;;  %v265_v2 = vld [vmem:[%s5039_s15 + $0x10] sm:$0xff] (%p59_p4) }
  0x13   : > { %262 = vst [vmem:[%s5044_s16] sm:$0xff] (%p59_p4), %v261_v0  ;;  %264 = vst [vmem:[%s5044_s16 + $0x8] sm:$0xff] (%p59_p4), %v263_v1  ;;  %v267_v3 = vld [vmem:[%s5039_s15 + $0x18] sm:$0xff] (%p59_p4)  ;;  %v269_v4 = vld [vmem:[%s5039_s15 + $0x20] sm:$0xff] (%p59_p4) }
  0x14   : > { %266 = vst [vmem:[%s5044_s16 + $0x10] sm:$0xff] %v265_v2  ;;  %v271_v5 = vld [vmem:[%s5039_s15 + $0x28] sm:$0xff]  ;;  %268 = vst [vmem:[%s5044_s16 + $0x18] sm:$0xff] %v267_v3  ;;  %v273_v6 = vld [vmem:[%s5039_s15 + $0x30] sm:$0xff] }
  0x15   : > { %270 = vst [vmem:[%s5044_s16 + $0x20] sm:$0xff] %v269_v4  ;;  %272 = vst [vmem:[%s5044_s16 + $0x28] sm:$0xff] %v271_v5  ;;  %v275_v7 = vld [vmem:[%s5039_s15 + $0x38] sm:$0xff]  ;;  %v277_v8 = vld [vmem:[%s5039_s15 + $0x40] sm:$0xff] }
  0x16   : > { %274 = vst [vmem:[%s5044_s16 + $0x30] sm:$0xff] %v273_v6  ;;  %276 = vst [vmem:[%s5044_s16 + $0x38] sm:$0xff] %v275_v7  ;;  %v279_v9 = vld [vmem:[%s5039_s15 + $0x48] sm:$0xff]  ;;  %v281_v10 = vld [vmem:[%s5039_s15 + $0x50] sm:$0xff] }
  0x17   : > { %278 = vst [vmem:[%s5044_s16 + $0x40] sm:$0xff] %v277_v8  ;;  %v283_v11 = vld [vmem:[%s5039_s15 + $0x58] sm:$0xff]  ;;  %280 = vst [vmem:[%s5044_s16 + $0x48] sm:$0xff] %v279_v9  ;;  %v285_v12 = vld [vmem:[%s5039_s15 + $0x60] sm:$0xff] }
  0x18   : > { %282 = vst [vmem:[%s5044_s16 + $0x50] sm:$0xff] %v281_v10  ;;  %284 = vst [vmem:[%s5044_s16 + $0x58] sm:$0xff] %v283_v11  ;;  %v287_v13 = vld [vmem:[%s5039_s15 + $0x68] sm:$0xff]  ;;  %v289_v14 = vld [vmem:[%s5039_s15 + $0x70] sm:$0xff] }
  0x19   : > { %286 = vst [vmem:[%s5044_s16 + $0x60] sm:$0xff] %v285_v12  ;;  %288 = vst [vmem:[%s5044_s16 + $0x68] sm:$0xff] %v287_v13  ;;  %v291_v15 = vld [vmem:[%s5039_s15 + $0x78] sm:$0xff]  ;;  %v293_v16 = vld [vmem:[%s5039_s15 + $0x100] sm:$0xff] }
  0x1a   : > { %290 = vst [vmem:[%s5044_s16 + $0x70] sm:$0xff] %v289_v14  ;;  %v295_v17 = vld [vmem:[%s5039_s15 + $0x108] sm:$0xff]  ;;  %292 = vst [vmem:[%s5044_s16 + $0x78] sm:$0xff] %v291_v15  ;;  %v297_v18 = vld [vmem:[%s5039_s15 + $0x110] sm:$0xff] }
  0x1b   : > { %294 = vst [vmem:[%s5044_s16 + $0x80] sm:$0xff] %v293_v16  ;;  %296 = vst [vmem:[%s5044_s16 + $0x88] sm:$0xff] %v295_v17  ;;  %v299_v19 = vld [vmem:[%s5039_s15 + $0x118] sm:$0xff]  ;;  %v301_v20 = vld [vmem:[%s5039_s15 + $0x120] sm:$0xff] }
  0x1c   : > { %298 = vst [vmem:[%s5044_s16 + $0x90] sm:$0xff] %v297_v18  ;;  %300 = vst [vmem:[%s5044_s16 + $0x98] sm:$0xff] %v299_v19  ;;  %v303_v21 = vld [vmem:[%s5039_s15 + $0x128] sm:$0xff]  ;;  %v305_v22 = vld [vmem:[%s5039_s15 + $0x130] sm:$0xff] }
  0x1d   : > { %302 = vst [vmem:[%s5044_s16 + $0xa0] sm:$0xff] %v301_v20  ;;  %v307_v23 = vld [vmem:[%s5039_s15 + $0x138] sm:$0xff]  ;;  %304 = vst [vmem:[%s5044_s16 + $0xa8] sm:$0xff] %v303_v21  ;;  %v309_v24 = vld [vmem:[%s5039_s15 + $0x140] sm:$0xff] }
  0x1e   : > { %306 = vst [vmem:[%s5044_s16 + $0xb0] sm:$0xff] %v305_v22  ;;  %308 = vst [vmem:[%s5044_s16 + $0xb8] sm:$0xff] %v307_v23  ;;  %v311_v25 = vld [vmem:[%s5039_s15 + $0x148] sm:$0xff]  ;;  %v313_v26 = vld [vmem:[%s5039_s15 + $0x150] sm:$0xff] }
  0x1f   : > { %310 = vst [vmem:[%s5044_s16 + $0xc0] sm:$0xff] %v309_v24  ;;  %312 = vst [vmem:[%s5044_s16 + $0xc8] sm:$0xff] %v311_v25  ;;  %v315_v27 = vld [vmem:[%s5039_s15 + $0x158] sm:$0xff]  ;;  %v317_v28 = vld [vmem:[%s5039_s15 + $0x160] sm:$0xff] }
  0x20   : > { %314 = vst [vmem:[%s5044_s16 + $0xd0] sm:$0xff] %v313_v26  ;;  %v319_v29 = vld [vmem:[%s5039_s15 + $0x168] sm:$0xff]  ;;  %316 = vst [vmem:[%s5044_s16 + $0xd8] sm:$0xff] %v315_v27  ;;  %v321_v30 = vld [vmem:[%s5039_s15 + $0x170] sm:$0xff] }
  0x21   : > { %318 = vst [vmem:[%s5044_s16 + $0xe0] sm:$0xff] %v317_v28  ;;  %320 = vst [vmem:[%s5044_s16 + $0xe8] sm:$0xff] %v319_v29  ;;  %v323_v31 = vld [vmem:[%s5039_s15 + $0x178] sm:$0xff] }
  0x22   : > { %322 = vst [vmem:[%s5044_s16 + $0xf0] sm:$0xff] %v321_v30  ;;  %324 = vst [vmem:[%s5044_s16 + $0xf8] sm:$0xff] %v323_v31 }
  0x23 PF: > { %p4672_p7 = scmp.ge.s32.totalorder %s4953_s26, 1  ;;  %p329_p8 = scmp.lt.s32.totalorder %s4953_s26, 3 }
  0x25   : > { %p330_p9 = pnand %p4672_p7, %p329_p8 }
  0x27   : > { %333 = sbr.rel (%p330_p9) target bundleno = 750 (0x2ee), region = 67 }
  0x2c   : > { %s336_s17 = sand.u32 1, %s4945_s24   ;;  %vm581_vm0 = vcmask 1045504   ;;  %vm582_vm1 = vcmask 1046528   ;;  %v4955_v32 = vmov 65535   ;;  %v6671_v34 = vmov 0   ;;  %v5147_v60 = vld [vmem:[%s6666_s3] sm:$0xff]  }
  0x2d   : > { %s4673_s18 = sshll.u32 %s336_s17, 8  ;;  %v583_v33 = vsel %vm581_vm0, 4294967295, %v4955_v32  ;;  %713 = vmatprep.mubr.bf16.mxu0 %v6671_v34  ;;  %766 = vmatprep.mubr.bf16.mxu1 %v6671_v34  ;;  %vm574_vm2 = vcmask 105472   ;;  %v5169_v6 = vld [vmem:[%s6666_s3 + $0x8] sm:$0xff]   ;;  %s4675_s13 = sshll.u32 %s5014_s27, 5  ;;  %vm1574_vm3 = vcmask 1042432  }
  0x2e   : > { %4907 = vset.pattern.permute.xlu0 %v6671_v34  ;;  %4908 = vset.pattern.permute.xlu1 %v6671_v34  ;;  %s5116_s19 = scalar_lea.vmem [#allocation2], %s4673_s18  ;;  %v5120_v37 = vsel %vm582_vm1, %v583_v33, 0  ;;  %p372_p10 = scmp.lt.s32.totalorder %s4675_s13, 63  ;;  %vm1561_vm4 = vcmask 23552   ;;  %vm3445_vm5 = vcmask 261120  }
  0x2f   : > { %v404_v35 = vld [vmem:[%s5116_s19] sm:$0xff]  ;;  %v405_v38 = vld [vmem:[%s5116_s19 + $0x8] sm:$0xff]  ;;  %v406_v42 = vld [vmem:[%s5116_s19 + $0x10] sm:$0xff]  ;;  %s6577_s12 = sshll.u32 %s336_s17, 6  ;;  %s4879_s17 = sshll.u32 (%p5029_p5), %s5014_s27, 4 }
  0x30   : > { %v420_v36 = vld [vmem:[%s5116_s19 + $0x80] sm:$0x77]  ;;  %v421_v40 = vld [vmem:[%s5116_s19 + $0x88] sm:$0x77]  ;;  %v422_v45 = vld [vmem:[%s5116_s19 + $0x90] sm:$0x77]  ;;  %s4565_s15 = scalar_lea.vmem (%p5029_p5), %s6670_s7, %s4879_s17 }
  0x31   : > { %v4680_v39 = vcombine.high %v404_v35, %v420_v36  ;;  %v4679_v41 = vcombine.low %v404_v35, %v420_v36  ;;  %v4682_v43 = vcombine.high %v405_v38, %v421_v40  ;;  %v4681_v44 = vcombine.low %v405_v38, %v421_v40  ;;  %v407_v46 = vld [vmem:[%s5116_s19 + $0x18] sm:$0xff]  ;;  %v5131_v52 = vld [vmem:[%s5116_s19 + $0x20] sm:$0xff]  ;;  %v5139_v58 = vld [vmem:[%s5116_s19 + $0x28] sm:$0xff]  ;;  %s6865_s13 = smov (!%p372_p10, %s4675_s13), 63  ;;  %s6597_s24 = scalar_lea.vmem [#allocation3], %s6577_s12 }
  0x32   : > { %v423_v47 = vld [vmem:[%s5116_s19 + $0x98] sm:$0x77]  ;;  %v4683_v50 = vcombine.low %v406_v42, %v422_v45  ;;  %v4684_v51 = vcombine.high %v406_v42, %v422_v45  ;;  %v5134_v53 = vld [vmem:[%s5116_s19 + $0xa0] sm:$0x77]  ;;  %v5142_v59 = vld [vmem:[%s5116_s19 + $0xa8] sm:$0x77] }
  0x33   : > { %v589_v48 = vand.u32 %v4680_v39, %v5120_v37  ;;  %v586_v49 = vand.u32 %v4679_v41, %v5120_v37  ;;  %v595_v54 = vand.u32 %v4682_v43, %v5120_v37  ;;  %v592_v55 = vand.u32 %v4681_v44, %v5120_v37  ;;  %v416_v5 = vld [vmem:[%s5116_s19 + $0x60] sm:$0xff]  ;;  %v417_v8 = vld [vmem:[%s5116_s19 + $0x68] sm:$0xff]  ;;  %v418_v10 = vld [vmem:[%s5116_s19 + $0x70] sm:$0xff]  ;;  %s4676_s23 = sshll.u32 %s6865_s13, 2 }
  0x34   : > { %v4685_v56 = vcombine.low %v407_v46, %v423_v47  ;;  %v4686_v57 = vcombine.high %v407_v46, %v423_v47  ;;  %v601_v61 = vand.u32 %v4684_v51, %v5120_v37  ;;  %v4688_v62 = vcombine.high %v5131_v52, %v5134_v53  ;;  %v432_v7 = vld [vmem:[%s5116_s19 + $0xe0] sm:$0x77]  ;;  %v433_v9 = vld [vmem:[%s5116_s19 + $0xe8] sm:$0x77]  ;;  %v434_v11 = vld [vmem:[%s5116_s19 + $0xf0] sm:$0x77]  ;;  %s5331_s11 = scalar_lea.vmem %s6663_s0, %s4676_s23 }
  0x35   : > { %695 = vmatprep.subr.bf16.mxu0 %v589_v48  ;;  %748 = vmatprep.subr.bf16.mxu1 %v595_v54  ;;  %v598_v0 = vand.u32 %v4683_v50, %v5120_v37  ;;  %v4690_v1 = vcombine.high %v5139_v58, %v5142_v59  ;;  %v4703_v12 = vcombine.low %v416_v5, %v432_v7  ;;  %v419_v14 = vld [vmem:[%s5116_s19 + $0x78] sm:$0xff]  ;;  %v410_v21 = vld [vmem:[%s5116_s19 + $0x30] sm:$0xff]  ;;  %v412_v44 = vld [vmem:[%s5116_s19 + $0x40] sm:$0xff] }
  0x36   : > { %696 = vmatpush1.bf16.msra.mxu0 %v586_v49  ;;  %v607_v63 = vand.u32 %v4686_v57, %v5120_v37  ;;  %749 = vmatpush1.bf16.msra.mxu1 %v592_v55  ;;  %v604_v2 = vand.u32 %v4685_v56, %v5120_v37  ;;  %v613_v3 = vand.u32 %v4688_v62, %v5120_v37  ;;  %v435_v15 = vld [vmem:[%s5116_s19 + $0xf8] sm:$0x77]  ;;  %v426_v22 = vld [vmem:[%s5116_s19 + $0xb0] sm:$0x77]  ;;  %v428_v45 = vld [vmem:[%s5116_s19 + $0xc0] sm:$0x77] }
  0x37   : > { %801 = vmatprep.subr.bf16.mxu0 %v601_v61  ;;  %v619_v4 = vand.u32 %v4690_v1, %v5120_v37  ;;  %v4704_v13 = vcombine.high %v416_v5, %v432_v7  ;;  %v4705_v16 = vcombine.low %v417_v8, %v433_v9  ;;  %v4706_v18 = vcombine.high %v417_v8, %v433_v9  ;;  %v411_v27 = vld [vmem:[%s5116_s19 + $0x38] sm:$0xff]  ;;  %v413_v46 = vld [vmem:[%s5116_s19 + $0x48] sm:$0xff]  ;;  %v414_v56 = vld [vmem:[%s5116_s19 + $0x50] sm:$0xff] }
  0x38   : > { %854 = vmatprep.subr.bf16.mxu1 %v607_v63  ;;  %v5182_v19 = vand.u32 %v4703_v12, %v5120_v37  ;;  %v4707_v20 = vcombine.low %v418_v10, %v434_v11  ;;  %v4708_v24 = vcombine.high %v418_v10, %v434_v11  ;;  %v4709_v25 = vcombine.low %v419_v14, %v435_v15  ;;  %v427_v28 = vld [vmem:[%s5116_s19 + $0xb8] sm:$0x77]  ;;  %v429_v47 = vld [vmem:[%s5116_s19 + $0xc8] sm:$0x77]  ;;  %v430_v57 = vld [vmem:[%s5116_s19 + $0xd0] sm:$0x77] }
  0x39   : > { %4711 = vmatmul.mubr.msk.bf16.vlgmr.msra.gmra.mxu0 %vm574_vm2, %v5147_v60  ;;  %4713 = vmatmul.mubr.msk.bf16.vlgmr.msra.gmra.mxu1 %vm574_vm2, %v5147_v60  ;;  %v5179_v17 = vand.u32 %v4704_v13, %v5120_v37  ;;  %v5189_v23 = vand.u32 %v4705_v16, %v5120_v37  ;;  %v4710_v26 = vcombine.high %v419_v14, %v435_v15  ;;  %v3063_v10 = vld [vmem:[%s6667_s4] sm:$0xff]  ;;  %v3066_v11 = vld [vmem:[%s6667_s4 + $0x18] sm:$0xff]  ;;  %v3064_v12 = vld [vmem:[%s6667_s4 + $0x8] sm:$0xff] }
  0x3a   : > { %723 = vmatprep.mubr.bf16.mxu0 %v6671_v34  ;;  %776 = vmatprep.mubr.bf16.mxu1 %v6671_v34  ;;  %v5197_v29 = vand.u32 %v4706_v18, %v5120_v37  ;;  %v5200_v30 = vand.u32 %v4707_v20, %v5120_v37  ;;  %v4687_v31 = vcombine.low %v5131_v52, %v5134_v53  ;;  %v3411_v13 = vld [vmem:[%s6669_s6] sm:$0xff]  ;;  %v3413_v14 = vld [vmem:[%s6669_s6 + $0x10] sm:$0xff]  ;;  %v3412_v15 = vld [vmem:[%s6669_s6 + $0x8] sm:$0xff] }
  0x3b   : > { %802 = vmatpush1.bf16.msra.mxu0 %v598_v0  ;;  %855 = vmatpush1.bf16.msra.mxu1 %v604_v2  ;;  %v5206_v32 = vand.u32 %v4708_v24, %v5120_v37  ;;  %v5209_v33 = vand.u32 %v4710_v26, %v5120_v37  ;;  %v5212_v35 = vand.u32 %v4709_v25, %v5120_v37  ;;  %v3414_v16 = vld [vmem:[%s6669_s6 + $0x18] sm:$0xff]  ;;  %v385_v18 = vld [vmem:[%s5331_s11 + $0x8] sm:$0x77]  ;;  %v4957_v25 = vmov 0.0   ;;  %v5374_v26 = vld [vmem:[%s6665_s2] sm:$0xff] }
  0x3c   : > { %907 = vmatprep.subr.bf16.mxu0 %v613_v3  ;;  %960 = vmatprep.subr.bf16.mxu1 %v619_v4  ;;  %v4689_v36 = vcombine.low %v5139_v58, %v5142_v59  ;;  %v4692_v38 = vcombine.high %v410_v21, %v426_v22  ;;  %v4694_v39 = vcombine.high %v411_v27, %v427_v28  ;;  %v415_v58 = vld [vmem:[%s5116_s19 + $0x58] sm:$0xff] }
  0x3d   : > { %v610_v40 = vand.u32 %v4687_v31, %v5120_v37  ;;  %v4691_v48 = vcombine.low %v410_v21, %v426_v22  ;;  %v4693_v49 = vcombine.low %v411_v27, %v427_v28  ;;  %v4696_v50 = vcombine.high %v412_v44, %v428_v45  ;;  %v431_v59 = vld [vmem:[%s5116_s19 + $0xd8] sm:$0x77]  ;;  %3069 = vperm.xlu1 %4908, %v3063_v10   ;;  %v386_v21 = vld [vmem:[%s5331_s11 + $0x10] sm:$0x77]  ;;  %v389_v27 = vld [vmem:[%s5331_s11 + $0x28] sm:$0x77] }
  0x3e   : > { %v616_v41 = vand.u32 %v4689_v36, %v5120_v37  ;;  %v625_v42 = vand.u32 %v4692_v38, %v5120_v37  ;;  %v631_v43 = vand.u32 %v4694_v39, %v5120_v37  ;;  %v4698_v51 = vcombine.high %v413_v46, %v429_v47  ;;  %v387_v22 = vld [vmem:[%s5331_s11 + $0x18] sm:$0x77]  ;;  %v392_v38 = vld [vmem:[%s5331_s11 + $0x40] sm:$0x77]  ;;  %v393_v39 = vld [vmem:[%s5331_s11 + $0x48] sm:$0x77] }
  0x3f   : > { %v622_v52 = vand.u32 %v4691_v48, %v5120_v37  ;;  %v628_v53 = vand.u32 %v4693_v49, %v5120_v37  ;;  %v637_v54 = vand.u32 %v4696_v50, %v5120_v37  ;;  %v4695_v61 = vcombine.low %v412_v44, %v428_v45  ;;  %v5411_v31 = vld [vmem:[%s6665_s2 + $0x18] sm:$0xff] }
  0x40   : > { %v643_v55 = vand.u32 %v4698_v51, %v5120_v37  ;;  %v4697_v62 = vcombine.low %v413_v46, %v429_v47  ;;  %v4700_v63 = vcombine.high %v414_v56, %v430_v57  ;;  %v4702_v0 = vcombine.high %v415_v58, %v431_v59  ;;  %v396_v46 = vld [vmem:[%s5331_s11 + $0x60] sm:$0x77]  ;;  %v397_v47 = vld [vmem:[%s5331_s11 + $0x68] sm:$0x77] }
  0x41   : > { %4712 = vmatmul.mubr.msk.bf16.gmra.mxu0 %vm574_vm2, %v5169_v6  ;;  %4714 = vmatmul.mubr.msk.bf16.gmra.mxu1 %vm574_vm2, %v5169_v6  ;;  %v634_v1 = vand.u32 %v4695_v61, %v5120_v37  ;;  %v4699_v5 = vcombine.low %v414_v56, %v430_v57  ;;  %v4701_v7 = vcombine.low %v415_v58, %v431_v59 }
  0x42   : > { %819 = vmatprep.mubr.bf16.mxu0 %v6671_v34  ;;  %872 = vmatprep.mubr.bf16.mxu1 %v6671_v34  ;;  %v640_v2 = vand.u32 %v4697_v62, %v5120_v37  ;;  %v649_v3 = vand.u32 %v4700_v63, %v5120_v37  ;;  %v655_v4 = vand.u32 %v4702_v0, %v5120_v37  ;;  %v398_v0 = vld [vmem:[%s5331_s11 + $0x70] sm:$0x77] }
  0x43   : > { %v646_v8 = vand.u32 %v4699_v5, %v5120_v37  ;;  %v652_v9 = vand.u32 %v4701_v7, %v5120_v37  ;;  %v3065_v37 = vld [vmem:[%s6667_s4 + $0x10] sm:$0xff]  ;;  %3074 = vperm.xlu1 %4908, %v3064_v12   ;;  %v1546_v20 = vcombine.high %v385_v18, %v385_v18  ;;  %v1548_v24 = vcombine.high %v387_v22, %v387_v22 }
  0x44   : > { %3079 = vperm.xlu0 %4907, %v3065_v37   ;;  %v1557_v48 = vcombine.high %v396_v46, %v396_v46  ;;  %v1558_v50 = vcombine.high %v397_v47, %v397_v47  ;;  %v1559_v5 = vcombine.high %v398_v0, %v398_v0 }
  0x47   : > { %3422 = vperm.xlu1 %4908, %v3412_v15  }
  0x48   : > { %3084 = vperm.xlu0 %4907, %v3066_v11  }
  0x49   : > { %4715 = vmatmul.mubr.msk.bf16.vlgmr.msra.gmra.mxu0 %vm574_vm2, %v5147_v60  ;;  %4717 = vmatmul.mubr.msk.bf16.vlgmr.msra.gmra.mxu1 %vm574_vm2, %v5147_v60 }
  0x4a   : > { %829 = vmatprep.mubr.bf16.mxu0 %v6671_v34  ;;  %882 = vmatprep.mubr.bf16.mxu1 %v6671_v34 }
  0x4b   : > { %908 = vmatpush1.bf16.msra.mxu0 %v610_v40  ;;  %961 = vmatpush1.bf16.msra.mxu1 %v616_v41  ;;  %v1553_v40 = vcombine.high %v392_v38, %v392_v38  ;;  %v1554_v41 = vcombine.high %v393_v39, %v393_v39 }
  0x4c   : > { %1013 = vmatprep.subr.bf16.mxu0 %v625_v42  ;;  %1066 = vmatprep.subr.bf16.mxu1 %v631_v43  ;;  %v394_v42 = vld [vmem:[%s5331_s11 + $0x50] sm:$0x77]  ;;  %v395_v43 = vld [vmem:[%s5331_s11 + $0x58] sm:$0x77] }
  0x4d   : > { %3417 = vperm.xlu0 %4907, %v3411_v13   ;;  %3432 = vperm.xlu1 %4908, %v3414_v16   ;;  %v1555_v44 = vcombine.high %v394_v42, %v394_v42  ;;  %v1556_v45 = vcombine.high %v395_v43, %v395_v43 }
  0x51   : > { %4716 = vmatmul.mubr.msk.bf16.gmra.mxu0 %vm574_vm2, %v5169_v6  ;;  %4718 = vmatmul.mubr.msk.bf16.gmra.mxu1 %vm574_vm2, %v5169_v6 }
  0x52   : > { %925 = vmatprep.mubr.bf16.mxu0 %v6671_v34  ;;  %978 = vmatprep.mubr.bf16.mxu1 %v6671_v34 }
  0x53   : > { %3427 = vperm.xlu0 %4907, %v3413_v14  }
  0x59   : > { %4719 = vmatmul.mubr.msk.bf16.vlgmr.msra.gmra.mxu0 %vm574_vm2, %v5147_v60  ;;  %4721 = vmatmul.mubr.msk.bf16.vlgmr.msra.gmra.mxu1 %vm574_vm2, %v5147_v60 }
  0x5a   : > { %935 = vmatprep.mubr.bf16.mxu0 %v6671_v34  ;;  %988 = vmatprep.mubr.bf16.mxu1 %v6671_v34 }
  0x5b   : > { %1014 = vmatpush1.bf16.msra.mxu0 %v622_v52  ;;  %1067 = vmatpush1.bf16.msra.mxu1 %v628_v53 }
  0x5c   : > { %1119 = vmatprep.subr.bf16.mxu0 %v637_v54  ;;  %1172 = vmatprep.subr.bf16.mxu1 %v643_v55 }
  0x61   : > { %4720 = vmatmul.mubr.msk.bf16.gmra.mxu0 %vm574_vm2, %v5169_v6  ;;  %4722 = vmatmul.mubr.msk.bf16.gmra.mxu1 %vm574_vm2, %v5169_v6 }
  0x62   : > { %1031 = vmatprep.mubr.bf16.mxu0 %v6671_v34  ;;  %1084 = vmatprep.mubr.bf16.mxu1 %v6671_v34 }
  0x69   : > { %4723 = vmatmul.mubr.msk.bf16.vlgmr.msra.gmra.mxu0 %vm574_vm2, %v5147_v60  ;;  %4725 = vmatmul.mubr.msk.bf16.vlgmr.msra.gmra.mxu1 %vm574_vm2, %v5147_v60 }
  0x6a   : > { %1041 = vmatprep.mubr.bf16.mxu0 %v6671_v34  ;;  %1094 = vmatprep.mubr.bf16.mxu1 %v6671_v34 }
  0x6b   : > { %1120 = vmatpush1.bf16.msra.mxu0 %v634_v1  ;;  %1173 = vmatpush1.bf16.msra.mxu1 %v640_v2  ;;  %v399_v2 = vld [vmem:[%s5331_s11 + $0x78] sm:$0x77] }
  0x6c   : > { %1225 = vmatprep.subr.bf16.mxu0 %v649_v3  ;;  %1278 = vmatprep.subr.bf16.mxu1 %v655_v4 }
  0x71   : > { %4724 = vmatmul.mubr.msk.bf16.gmra.mxu0 %vm574_vm2, %v5169_v6  ;;  %4726 = vmatmul.mubr.msk.bf16.gmra.mxu1 %vm574_vm2, %v5169_v6 }
  0x72   : > { %1137 = vmatprep.mubr.bf16.mxu0 %v6671_v34  ;;  %1190 = vmatprep.mubr.bf16.mxu1 %v6671_v34 }
  0x79   : > { %4727 = vmatmul.mubr.msk.bf16.vlgmr.msra.gmra.mxu0 %vm574_vm2, %v5147_v60  ;;  %4729 = vmatmul.mubr.msk.bf16.vlgmr.msra.gmra.mxu1 %vm574_vm2, %v5147_v60 }
  0x7a   : > { %1147 = vmatprep.mubr.bf16.mxu0 %v6671_v34  ;;  %1200 = vmatprep.mubr.bf16.mxu1 %v6671_v34 }
  0x7b   : > { %1226 = vmatpush1.bf16.msra.mxu0 %v646_v8  ;;  %1279 = vmatpush1.bf16.msra.mxu1 %v652_v9  ;;  %v1560_v8 = vcombine.high %v399_v2, %v399_v2 }
  0x7c   : > { %1331 = vmatprep.subr.bf16.mxu0 %v5179_v17  ;;  %1384 = vmatprep.subr.bf16.mxu1 %v5197_v29  ;;  %v384_v17 = vld [vmem:[%s5331_s11] sm:$0x77]  ;;  %v1550_v29 = vcombine.high %v389_v27, %v389_v27 }
  0x81   : > { %4728 = vmatmul.mubr.msk.bf16.gmra.mxu0 %vm574_vm2, %v5169_v6  ;;  %4730 = vmatmul.mubr.msk.bf16.gmra.mxu1 %vm574_vm2, %v5169_v6 }
  0x82   : > { %1243 = vmatprep.mubr.bf16.mxu0 %v6671_v34  ;;  %1296 = vmatprep.mubr.bf16.mxu1 %v6671_v34 }
  0x89   : > { %4731 = vmatmul.mubr.msk.bf16.vlgmr.msra.gmra.mxu0 %vm574_vm2, %v5147_v60  ;;  %4733 = vmatmul.mubr.msk.bf16.vlgmr.msra.gmra.mxu1 %vm574_vm2, %v5147_v60 }
  0x8a   : > { %1253 = vmatprep.mubr.bf16.mxu0 %v6671_v34  ;;  %1306 = vmatprep.mubr.bf16.mxu1 %v6671_v34 }
  0x8b   : > { %1332 = vmatpush1.bf16.msra.mxu0 %v5182_v19  ;;  %1385 = vmatpush1.bf16.msra.mxu1 %v5189_v23  ;;  %v1545_v19 = vcombine.high %v384_v17, %v384_v17  ;;  %v1547_v23 = vcombine.high %v386_v21, %v386_v21 }
  0x8c   : > { %1437 = vmatprep.subr.bf16.mxu0 %v5206_v32  ;;  %1490 = vmatprep.subr.bf16.mxu1 %v5209_v33  ;;  %v390_v32 = vld [vmem:[%s5331_s11 + $0x30] sm:$0x77]  ;;  %v391_v33 = vld [vmem:[%s5331_s11 + $0x38] sm:$0x77] }
  0x8d   : > { %v1552_v36 = vcombine.high %v391_v33, %v391_v33 }
  0x91   : > { %4732 = vmatmul.mubr.msk.bf16.gmra.mxu0 %vm574_vm2, %v5169_v6  ;;  %4734 = vmatmul.mubr.msk.bf16.gmra.mxu1 %vm574_vm2, %v5169_v6 }
  0x92   : > { %1349 = vmatprep.mubr.bf16.mxu0 %v6671_v34  ;;  %1402 = vmatprep.mubr.bf16.mxu1 %v6671_v34 }
  0x99   : > { %4735 = vmatmul.mubr.msk.bf16.vlgmr.msra.gmra.mxu0 %vm574_vm2, %v5147_v60  ;;  %4737 = vmatmul.mubr.msk.bf16.vlgmr.msra.gmra.mxu1 %vm574_vm2, %v5147_v60 }
  0x9a   : > { %1359 = vmatprep.mubr.bf16.mxu0 %v6671_v34  ;;  %1412 = vmatprep.mubr.bf16.mxu1 %v6671_v34 }
  0x9b   : > { %1438 = vmatpush1.bf16.msra.mxu0 %v5200_v30  ;;  %1491 = vmatpush1.bf16.msra.mxu1 %v5212_v35  ;;  %v5400_v30 = vld [vmem:[%s6665_s2 + $0x10] sm:$0xff]  ;;  %v1551_v35 = vcombine.high %v390_v32, %v390_v32 }
  0x9c   : > { %4743 = vmatprep.subr.msk.mxu0 %vm1574_vm3, %v1545_v19  ;;  %4749 = vmatprep.subr.msk.mxu1 %vm1574_vm3, %v1546_v20 }
  0xa1   : > { %4736 = vmatmul.mubr.msk.bf16.gmra.mxu0 %vm574_vm2, %v5169_v6  ;;  %4738 = vmatmul.mubr.msk.bf16.gmra.mxu1 %vm574_vm2, %v5169_v6 }
  0xa2   : > { %1455 = vmatprep.mubr.bf16.mxu0 %v6671_v34  ;;  %1508 = vmatprep.mubr.bf16.mxu1 %v6671_v34 }
  0xa9   : > { %4739 = vmatmul.mubr.msk.bf16.vlgmr.msra.gmra.mxu0 %vm574_vm2, %v5147_v60  ;;  %4741 = vmatmul.mubr.msk.bf16.vlgmr.msra.gmra.mxu1 %vm574_vm2, %v5147_v60  ;;  %v388_v60 = vld [vmem:[%s5331_s11 + $0x20] sm:$0x77] }
  0xaa   : > { %1465 = vmatprep.mubr.bf16.mxu0 %v6671_v34  ;;  %1518 = vmatprep.mubr.bf16.mxu1 %v6671_v34  ;;  %v1549_v28 = vcombine.high %v388_v60, %v388_v60 }
  0xab   : > { %4744 = vmatpush1.msk.msra.mxu0 %vm1574_vm3, %v384_v17  ;;  %4750 = vmatpush1.msk.msra.mxu1 %vm1574_vm3, %v385_v18 }
  0xac   : > { %4755 = vmatprep.subr.msk.mxu0 %vm1574_vm3, %v1547_v23  ;;  %4761 = vmatprep.subr.msk.mxu1 %vm1574_vm3, %v1548_v24 }
  0xb1   : > { %4740 = vmatmul.mubr.msk.bf16.gmra.mxu0 %vm574_vm2, %v5169_v6  ;;  %4742 = vmatmul.mubr.msk.bf16.gmra.mxu1 %vm574_vm2, %v5169_v6  ;;  %v5385_v6 = vld [vmem:[%s6665_s2 + $0x8] sm:$0xff] }
  0xb2   : > { %1703 = vmatprep.mubr.f32.mxu0 %v4957_v25  ;;  %1792 = vmatprep.mubr.f32.mxu1 %v4957_v25 }
  0xb9   : > { %4745 = vmatmul.mubr.msk.f32.vlgmr.msra.gmra.mxu0 %vm1561_vm4, %v5374_v26  ;;  %4751 = vmatmul.mubr.msk.f32.vlgmr.msra.gmra.mxu1 %vm1561_vm4, %v5374_v26 }
  0xba   : > { %1709 = vmatprep.mubr.f32.mxu0 %v4957_v25  ;;  %1798 = vmatprep.mubr.f32.mxu1 %v4957_v25 }
  0xbb   : > { %4756 = vmatpush1.msk.msra.mxu0 %vm1574_vm3, %v386_v21  ;;  %4762 = vmatpush1.msk.msra.mxu1 %vm1574_vm3, %v387_v22 }
  0xbc   : > { %4767 = vmatprep.subr.msk.mxu0 %vm1574_vm3, %v1549_v28  ;;  %4773 = vmatprep.subr.msk.mxu1 %vm1574_vm3, %v1550_v29 }
  0xbd   : > { %4746 = vmatmul.mubr.msk.f32.gmra.mxu0 %vm1561_vm4, %v5385_v6  ;;  %4752 = vmatmul.mubr.msk.f32.gmra.mxu1 %vm1561_vm4, %v5385_v6 }
  0xbe   : > { %1715 = vmatprep.mubr.f32.mxu0 %v4957_v25  ;;  %1804 = vmatprep.mubr.f32.mxu1 %v4957_v25 }
  0xc1   : > { %4747 = vmatmul.mubr.msk.f32.gmra.mxu0 %vm1561_vm4, %v5400_v30  ;;  %4753 = vmatmul.mubr.msk.f32.gmra.mxu1 %vm1561_vm4, %v5400_v30 }
  0xc2   : > { %1721 = vmatprep.mubr.f32.mxu0 %v4957_v25  ;;  %1810 = vmatprep.mubr.f32.mxu1 %v4957_v25 }
  0xc5   : > { %4748 = vmatmul.mubr.msk.f32.gmra.mxu0 %vm1561_vm4, %v5411_v31  ;;  %4754 = vmatmul.mubr.msk.f32.gmra.mxu1 %vm1561_vm4, %v5411_v31 }
  0xc6   : > { %1881 = vmatprep.mubr.f32.mxu0 %v4957_v25  ;;  %1970 = vmatprep.mubr.f32.mxu1 %v4957_v25 }
  0xc9   : > { %4757 = vmatmul.mubr.msk.f32.vlgmr.msra.gmra.mxu0 %vm1561_vm4, %v5374_v26  ;;  %4763 = vmatmul.mubr.msk.f32.vlgmr.msra.gmra.mxu1 %vm1561_vm4, %v5374_v26 }
  0xca   : > { %1887 = vmatprep.mubr.f32.mxu0 %v4957_v25  ;;  %1976 = vmatprep.mubr.f32.mxu1 %v4957_v25 }
  0xcb   : > { %4768 = vmatpush1.msk.msra.mxu0 %vm1574_vm3, %v388_v60  ;;  %4774 = vmatpush1.msk.msra.mxu1 %vm1574_vm3, %v389_v27 }
  0xcc   : > { %4779 = vmatprep.subr.msk.mxu0 %vm1574_vm3, %v1551_v35  ;;  %4785 = vmatprep.subr.msk.mxu1 %vm1574_vm3, %v1552_v36 }
  0xcd   : > { %4758 = vmatmul.mubr.msk.f32.gmra.mxu0 %vm1561_vm4, %v5385_v6  ;;  %4764 = vmatmul.mubr.msk.f32.gmra.mxu1 %vm1561_vm4, %v5385_v6 }
  0xce   : > { %1893 = vmatprep.mubr.f32.mxu0 %v4957_v25  ;;  %1982 = vmatprep.mubr.f32.mxu1 %v4957_v25 }
  0xd1   : > { %4759 = vmatmul.mubr.msk.f32.gmra.mxu0 %vm1561_vm4, %v5400_v30  ;;  %4765 = vmatmul.mubr.msk.f32.gmra.mxu1 %vm1561_vm4, %v5400_v30 }
  0xd2   : > { %1899 = vmatprep.mubr.f32.mxu0 %v4957_v25  ;;  %1988 = vmatprep.mubr.f32.mxu1 %v4957_v25 }
  0xd5   : > { %4760 = vmatmul.mubr.msk.f32.gmra.mxu0 %vm1561_vm4, %v5411_v31  ;;  %4766 = vmatmul.mubr.msk.f32.gmra.mxu1 %vm1561_vm4, %v5411_v31 }
  0xd6   : > { %2059 = vmatprep.mubr.f32.mxu0 %v4957_v25  ;;  %2148 = vmatprep.mubr.f32.mxu1 %v4957_v25 }
  0xd9   : > { %4769 = vmatmul.mubr.msk.f32.vlgmr.msra.gmra.mxu0 %vm1561_vm4, %v5374_v26  ;;  %4775 = vmatmul.mubr.msk.f32.vlgmr.msra.gmra.mxu1 %vm1561_vm4, %v5374_v26 }
  0xda   : > { %2065 = vmatprep.mubr.f32.mxu0 %v4957_v25  ;;  %2154 = vmatprep.mubr.f32.mxu1 %v4957_v25 }
  0xdb   : > { %4780 = vmatpush1.msk.msra.mxu0 %vm1574_vm3, %v390_v32  ;;  %4786 = vmatpush1.msk.msra.mxu1 %vm1574_vm3, %v391_v33 }
  0xdc   : > { %4791 = vmatprep.subr.msk.mxu0 %vm1574_vm3, %v1553_v40  ;;  %4797 = vmatprep.subr.msk.mxu1 %vm1574_vm3, %v1554_v41 }
  0xdd   : > { %4770 = vmatmul.mubr.msk.f32.gmra.mxu0 %vm1561_vm4, %v5385_v6  ;;  %4776 = vmatmul.mubr.msk.f32.gmra.mxu1 %vm1561_vm4, %v5385_v6 }
  0xde   : > { %2071 = vmatprep.mubr.f32.mxu0 %v4957_v25  ;;  %2160 = vmatprep.mubr.f32.mxu1 %v4957_v25 }
  0xe1   : > { %4771 = vmatmul.mubr.msk.f32.gmra.mxu0 %vm1561_vm4, %v5400_v30  ;;  %4777 = vmatmul.mubr.msk.f32.gmra.mxu1 %vm1561_vm4, %v5400_v30 }
  0xe2   : > { %2077 = vmatprep.mubr.f32.mxu0 %v4957_v25  ;;  %2166 = vmatprep.mubr.f32.mxu1 %v4957_v25 }
  0xe5   : > { %4772 = vmatmul.mubr.msk.f32.gmra.mxu0 %vm1561_vm4, %v5411_v31  ;;  %4778 = vmatmul.mubr.msk.f32.gmra.mxu1 %vm1561_vm4, %v5411_v31 }
  0xe6   : > { %2237 = vmatprep.mubr.f32.mxu0 %v4957_v25  ;;  %2326 = vmatprep.mubr.f32.mxu1 %v4957_v25 }
  0xe9   : > { %4781 = vmatmul.mubr.msk.f32.vlgmr.msra.gmra.mxu0 %vm1561_vm4, %v5374_v26  ;;  %4787 = vmatmul.mubr.msk.f32.vlgmr.msra.gmra.mxu1 %vm1561_vm4, %v5374_v26 }
  0xea   : > { %2243 = vmatprep.mubr.f32.mxu0 %v4957_v25  ;;  %2332 = vmatprep.mubr.f32.mxu1 %v4957_v25 }
  0xeb   : > { %4792 = vmatpush1.msk.msra.mxu0 %vm1574_vm3, %v392_v38  ;;  %4798 = vmatpush1.msk.msra.mxu1 %vm1574_vm3, %v393_v39 }
  0xec   : > { %4803 = vmatprep.subr.msk.mxu0 %vm1574_vm3, %v1555_v44  ;;  %4809 = vmatprep.subr.msk.mxu1 %vm1574_vm3, %v1556_v45 }
  0xed   : > { %4782 = vmatmul.mubr.msk.f32.gmra.mxu0 %vm1561_vm4, %v5385_v6  ;;  %4788 = vmatmul.mubr.msk.f32.gmra.mxu1 %vm1561_vm4, %v5385_v6 }
  0xee   : > { %2249 = vmatprep.mubr.f32.mxu0 %v4957_v25  ;;  %2338 = vmatprep.mubr.f32.mxu1 %v4957_v25 }
  0xf1   : > { %4783 = vmatmul.mubr.msk.f32.gmra.mxu0 %vm1561_vm4, %v5400_v30  ;;  %4789 = vmatmul.mubr.msk.f32.gmra.mxu1 %vm1561_vm4, %v5400_v30 }
  0xf2   : > { %2255 = vmatprep.mubr.f32.mxu0 %v4957_v25  ;;  %2344 = vmatprep.mubr.f32.mxu1 %v4957_v25 }
  0xf5   : > { %4784 = vmatmul.mubr.msk.f32.gmra.mxu0 %vm1561_vm4, %v5411_v31  ;;  %4790 = vmatmul.mubr.msk.f32.gmra.mxu1 %vm1561_vm4, %v5411_v31 }
  0xf6   : > { %2415 = vmatprep.mubr.f32.mxu0 %v4957_v25  ;;  %2504 = vmatprep.mubr.f32.mxu1 %v4957_v25 }
  0xf9   : > { %v5512_v49 = vpop.f32.mrf.mxu0  ;;  %4793 = vmatmul.mubr.msk.f32.vlgmr.msra.gmra.mxu0 %vm1561_vm4, %v5374_v26  ;;  %v5516_v51 = vpop.f32.mrf.mxu1  ;;  %4799 = vmatmul.mubr.msk.f32.vlgmr.msra.gmra.mxu1 %vm1561_vm4, %v5374_v26 }
  0xfa   : > { %2421 = vmatprep.mubr.f32.mxu0 %v4957_v25  ;;  %2510 = vmatprep.mubr.f32.mxu1 %v4957_v25 }
  0xfb   : > { %v5521_v52 = vpop.f32.mrf.mxu0  ;;  %4804 = vmatpush1.msk.msra.mxu0 %vm1574_vm3, %v394_v42  ;;  %v5525_v53 = vpop.f32.mrf.mxu1  ;;  %4810 = vmatpush1.msk.msra.mxu1 %vm1574_vm3, %v395_v43 }
  0xfc   : > { %4815 = vmatprep.subr.msk.mxu0 %vm1574_vm3, %v1557_v48  ;;  %4821 = vmatprep.subr.msk.mxu1 %vm1574_vm3, %v1558_v50 }
  0xfd   : > { %v5529_v54 = vpop.f32.mrf.mxu0  ;;  %4794 = vmatmul.mubr.msk.f32.gmra.mxu0 %vm1561_vm4, %v5385_v6  ;;  %v5534_v55 = vpop.f32.mrf.mxu1  ;;  %4800 = vmatmul.mubr.msk.f32.gmra.mxu1 %vm1561_vm4, %v5385_v6 }
  0xfe   : > { %2427 = vmatprep.mubr.f32.mxu0 %v4957_v25  ;;  %2516 = vmatprep.mubr.f32.mxu1 %v4957_v25 }
  0xff   : > { %v5539_v56 = vpop.f32.mrf.mxu0  ;;  %v5542_v57 = vpop.f32.mrf.mxu1 }
 0x101   : > { %v5544_v58 = vpop.f32.mrf.mxu0  ;;  %4795 = vmatmul.mubr.msk.f32.gmra.mxu0 %vm1561_vm4, %v5400_v30  ;;  %v5548_v59 = vpop.f32.mrf.mxu1  ;;  %4801 = vmatmul.mubr.msk.f32.gmra.mxu1 %vm1561_vm4, %v5400_v30 }
 0x102   : > { %2433 = vmatprep.mubr.f32.mxu0 %v4957_v25  ;;  %2522 = vmatprep.mubr.f32.mxu1 %v4957_v25 }
 0x103   : > { %v5553_v61 = vpop.f32.mrf.mxu0  ;;  %v5556_v62 = vpop.f32.mrf.mxu1 }
 0x105   : > { %v5558_v63 = vpop.f32.mrf.mxu0  ;;  %4796 = vmatmul.mubr.msk.f32.gmra.mxu0 %vm1561_vm4, %v5411_v31  ;;  %v5563_v1 = vpop.f32.mrf.mxu1  ;;  %4802 = vmatmul.mubr.msk.f32.gmra.mxu1 %vm1561_vm4, %v5411_v31 }
 0x106   : > { %2593 = vmatprep.mubr.f32.mxu0 %v4957_v25  ;;  %2682 = vmatprep.mubr.f32.mxu1 %v4957_v25 }
 0x107   : > { %v5569_v3 = vpop.f32.mrf.mxu0  ;;  %v5572_v4 = vpop.f32.mrf.mxu1 }
 0x109   : > { %v5574_v7 = vpop.f32.mrf.mxu0  ;;  %4805 = vmatmul.mubr.msk.f32.vlgmr.msra.gmra.mxu0 %vm1561_vm4, %v5374_v26  ;;  %v5578_v9 = vpop.f32.mrf.mxu1  ;;  %4811 = vmatmul.mubr.msk.f32.vlgmr.msra.gmra.mxu1 %vm1561_vm4, %v5374_v26 }
 0x10a   : > { %2599 = vmatprep.mubr.f32.mxu0 %v4957_v25  ;;  %2688 = vmatprep.mubr.f32.mxu1 %v4957_v25 }
 0x10b   : > { %v5583_v37 = vpop.f32.mrf.mxu0  ;;  %4816 = vmatpush1.msk.msra.mxu0 %vm1574_vm3, %v396_v46  ;;  %v5587_v10 = vpop.f32.mrf.mxu1  ;;  %4822 = vmatpush1.msk.msra.mxu1 %vm1574_vm3, %v397_v47 }
 0x10c   : > { %4827 = vmatprep.subr.msk.mxu0 %vm1574_vm3, %v1559_v5  ;;  %4833 = vmatprep.subr.msk.mxu1 %vm1574_vm3, %v1560_v8 }
 0x10d   : > { %v5591_v11 = vpop.f32.mrf.mxu0  ;;  %4806 = vmatmul.mubr.msk.f32.gmra.mxu0 %vm1561_vm4, %v5385_v6  ;;  %v5596_v12 = vpop.f32.mrf.mxu1  ;;  %4812 = vmatmul.mubr.msk.f32.gmra.mxu1 %vm1561_vm4, %v5385_v6 }
 0x10e   : > { %2605 = vmatprep.mubr.f32.mxu0 %v4957_v25  ;;  %2694 = vmatprep.mubr.f32.mxu1 %v4957_v25 }
 0x10f   : > { %v5601_v13 = vpop.f32.mrf.mxu0  ;;  %v5604_v14 = vpop.f32.mrf.mxu1 }
 0x111   : > { %v5606_v15 = vpop.f32.mrf.mxu0  ;;  %4807 = vmatmul.mubr.msk.f32.gmra.mxu0 %vm1561_vm4, %v5400_v30  ;;  %v5610_v16 = vpop.f32.mrf.mxu1  ;;  %4813 = vmatmul.mubr.msk.f32.gmra.mxu1 %vm1561_vm4, %v5400_v30 }
 0x112   : > { %2611 = vmatprep.mubr.f32.mxu0 %v4957_v25  ;;  %2700 = vmatprep.mubr.f32.mxu1 %v4957_v25 }
 0x113   : > { %v5615_v17 = vpop.f32.mrf.mxu0  ;;  %v5618_v18 = vpop.f32.mrf.mxu1 }
 0x115   : > { %v5620_v19 = vpop.f32.mrf.mxu0  ;;  %4808 = vmatmul.mubr.msk.f32.gmra.mxu0 %vm1561_vm4, %v5411_v31  ;;  %v5624_v20 = vpop.f32.mrf.mxu1  ;;  %4814 = vmatmul.mubr.msk.f32.gmra.mxu1 %vm1561_vm4, %v5411_v31 }
 0x116   : > { %2771 = vmatprep.mubr.f32.mxu0 %v4957_v25  ;;  %2860 = vmatprep.mubr.f32.mxu1 %v4957_v25 }
 0x117   : > { %v5629_v21 = vpop.f32.mrf.mxu0  ;;  %v5632_v22 = vpop.f32.mrf.mxu1 }
 0x119   : > { %v5634_v23 = vpop.f32.mrf.mxu0  ;;  %4817 = vmatmul.mubr.msk.f32.vlgmr.msra.gmra.mxu0 %vm1561_vm4, %v5374_v26  ;;  %v5638_v24 = vpop.f32.mrf.mxu1  ;;  %4823 = vmatmul.mubr.msk.f32.vlgmr.msra.gmra.mxu1 %vm1561_vm4, %v5374_v26 }
 0x11a   : > { %2777 = vmatprep.mubr.f32.mxu0 %v4957_v25  ;;  %2866 = vmatprep.mubr.f32.mxu1 %v4957_v25 }
 0x11b   : > { %v5643_v60 = vpop.f32.mrf.mxu0  ;;  %4828 = vmatpush1.msk.msra.mxu0 %vm1574_vm3, %v398_v0  ;;  %v5647_v27 = vpop.f32.mrf.mxu1  ;;  %4834 = vmatpush1.msk.msra.mxu1 %vm1574_vm3, %v399_v2 }
 0x11c   : > { %6674 = vst [vmem:[#allocation4_spill] sm:$0xff] %v5647_v27 }
 0x11d   : > { %v5650_v28 = vpop.f32.mrf.mxu0  ;;  %4818 = vmatmul.mubr.msk.f32.gmra.mxu0 %vm1561_vm4, %v5385_v6  ;;  %v5654_v29 = vpop.f32.mrf.mxu1  ;;  %4824 = vmatmul.mubr.msk.f32.gmra.mxu1 %vm1561_vm4, %v5385_v6 }
 0x11e   : > { %6675 = vst [vmem:[#allocation5_spill] sm:$0xff] %v5650_v28  ;;  %6676 = vst [vmem:[#allocation6_spill] sm:$0xff] %v5654_v29  ;;  %2783 = vmatprep.mubr.f32.mxu0 %v4957_v25  ;;  %2872 = vmatprep.mubr.f32.mxu1 %v4957_v25 }
 0x11f   : > { %v5659_v32 = vpop.f32.mrf.mxu0  ;;  %v5662_v33 = vpop.f32.mrf.mxu1 }
 0x120   : > { %6677 = vst [vmem:[#allocation7_spill] sm:$0xff] %v5662_v33 }
 0x121   : > { %v5664_v35 = vpop.f32.mrf.mxu0  ;;  %4819 = vmatmul.mubr.msk.f32.gmra.mxu0 %vm1561_vm4, %v5400_v30  ;;  %v5668_v36 = vpop.f32.mrf.mxu1  ;;  %4825 = vmatmul.mubr.msk.f32.gmra.mxu1 %vm1561_vm4, %v5400_v30 }
 0x122   : > { %6678 = vst [vmem:[#allocation8_spill] sm:$0xff] %v5664_v35  ;;  %6679 = vst [vmem:[#allocation9_spill] sm:$0xff] %v5668_v36  ;;  %2789 = vmatprep.mubr.f32.mxu0 %v4957_v25  ;;  %2878 = vmatprep.mubr.f32.mxu1 %v4957_v25 }
 0x123   : > { %v5673_v38 = vpop.f32.mrf.mxu0  ;;  %v5676_v39 = vpop.f32.mrf.mxu1 }
 0x124   : > { %6680 = vst [vmem:[#allocation10_spill] sm:$0xff] %v5676_v39 }
 0x125   : > { %v5678_v40 = vpop.f32.mrf.mxu0  ;;  %4820 = vmatmul.mubr.msk.f32.gmra.mxu0 %vm1561_vm4, %v5411_v31  ;;  %v5682_v41 = vpop.f32.mrf.mxu1  ;;  %4826 = vmatmul.mubr.msk.f32.gmra.mxu1 %vm1561_vm4, %v5411_v31 }
 0x126   : > { %6681 = vst [vmem:[#allocation11_spill] sm:$0xff] %v5678_v40  ;;  %6682 = vst [vmem:[#allocation12_spill] sm:$0xff] %v5682_v41  ;;  %2949 = vmatprep.mubr.f32.mxu0 %v4957_v25  ;;  %3038 = vmatprep.mubr.f32.mxu1 %v4957_v25 }
 0x127   : > { %v5687_v42 = vpop.f32.mrf.mxu0  ;;  %v5690_v43 = vpop.f32.mrf.mxu1 }
 0x128   : > { %6683 = vst [vmem:[#allocation13_spill] sm:$0xff] %v5687_v42  ;;  %6684 = vst [vmem:[#allocation14_spill] sm:$0xff] %v5690_v43 }
 0x129   : > { %v5692_v44 = vpop.f32.mrf.mxu0  ;;  %4829 = vmatmul.mubr.msk.f32.vlgmr.msra.gmra.mxu0 %vm1561_vm4, %v5374_v26  ;;  %v5696_v45 = vpop.f32.mrf.mxu1  ;;  %4835 = vmatmul.mubr.msk.f32.vlgmr.msra.gmra.mxu1 %vm1561_vm4, %v5374_v26 }
 0x12a   : > { %6685 = vst [vmem:[#allocation15_spill] sm:$0xff] %v5692_v44  ;;  %6686 = vst [vmem:[#allocation16_spill] sm:$0xff] %v5696_v45  ;;  %2955 = vmatprep.mubr.f32.mxu0 %v4957_v25  ;;  %3044 = vmatprep.mubr.f32.mxu1 %v4957_v25  ;;  %v5878_v44 = vpop.permute.xlu0 %3079 }
 0x12b   : > { %v5701_v46 = vpop.f32.mrf.mxu0  ;;  %v5704_v47 = vpop.f32.mrf.mxu1 }
 0x12c   : > { %6687 = vst [vmem:[#allocation17_spill] sm:$0xff] %v5701_v46  ;;  %6688 = vst [vmem:[#allocation18_spill] sm:$0xff] %v5704_v47 }
 0x12d   : > { %v5706_v48 = vpop.f32.mrf.mxu0  ;;  %4830 = vmatmul.mubr.msk.f32.gmra.mxu0 %vm1561_vm4, %v5385_v6  ;;  %v5710_v50 = vpop.f32.mrf.mxu1  ;;  %4836 = vmatmul.mubr.msk.f32.gmra.mxu1 %vm1561_vm4, %v5385_v6 }
 0x12e   : > { %6689 = vst [vmem:[#allocation19_spill] sm:$0xff] %v5706_v48  ;;  %6690 = vst [vmem:[#allocation20_spill] sm:$0xff] %v5710_v50  ;;  %2961 = vmatprep.mubr.f32.mxu0 %v4957_v25  ;;  %3050 = vmatprep.mubr.f32.mxu1 %v4957_v25 }
 0x12f   : > { %v5715_v26 = vpop.f32.mrf.mxu0  ;;  %v5718_v0 = vpop.f32.mrf.mxu1 }
 0x130   : > { %6691 = vst [vmem:[#allocation21_spill] sm:$0xff] %v5715_v26  ;;  %6692 = vst [vmem:[#allocation22_spill] sm:$0xff] %v5718_v0 }
 0x131   : > { %v5720_v2 = vpop.f32.mrf.mxu0  ;;  %4831 = vmatmul.mubr.msk.f32.gmra.mxu0 %vm1561_vm4, %v5400_v30  ;;  %v5724_v5 = vpop.f32.mrf.mxu1  ;;  %4837 = vmatmul.mubr.msk.f32.gmra.mxu1 %vm1561_vm4, %v5400_v30 }
 0x132   : > { %6693 = vst [vmem:[#allocation23_spill] sm:$0xff] %v5720_v2  ;;  %6694 = vst [vmem:[#allocation24_spill] sm:$0xff] %v5724_v5  ;;  %2967 = vmatprep.mubr.f32.mxu0 %v4957_v25  ;;  %3056 = vmatprep.mubr.f32.mxu1 %v4957_v25  ;;  %v6699_v5 = vmov 0  }
 0x133   : > { %v5729_v6 = vpop.f32.mrf.mxu0  ;;  %v5732_v8 = vpop.f32.mrf.mxu1 }
 0x134   : > { %6695 = vst [vmem:[#allocation25_spill] sm:$0xff] %v5729_v6  ;;  %6696 = vst [vmem:[#allocation26_spill] sm:$0xff] %v5732_v8 }
 0x135   : > { %v5734_v34 = vpop.f32.mrf.mxu0  ;;  %4832 = vmatmul.mubr.msk.f32.gmra.mxu0 %vm1561_vm4, %v5411_v31  ;;  %v5738_v50 = vpop.f32.mrf.mxu1  ;;  %4838 = vmatmul.mubr.msk.f32.gmra.mxu1 %vm1561_vm4, %v5411_v31 }
 0x136   : > { %6697 = vst [vmem:[#allocation27_spill] sm:$0xff] %v5734_v34  ;;  %6698 = vst [vmem:[#allocation28_spill] sm:$0xff] %v5738_v50  ;;  %3484 = vmatprep.mubr.bf16.mxu0 %v6699_v5  ;;  %3537 = vmatprep.mubr.bf16.mxu1 %v6699_v5 }
 0x137   : > { %v5743_v30 = vpop.f32.mrf.mxu0  ;;  %v5746_v48 = vpop.f32.mrf.mxu1 }
 0x138   : > { %6700 = vst [vmem:[#allocation29_spill] sm:$0xff] %v5743_v30  ;;  %6701 = vst [vmem:[#allocation30_spill] sm:$0xff] %v5746_v48 }
 0x139   : > { %v5748_v25 = vpop.f32.mrf.mxu0  ;;  %v5750_v2 = vpop.f32.mrf.mxu1 }
 0x13a   : > { %6702 = vst [vmem:[#allocation31_spill] sm:$0xff] %v5748_v25  ;;  %6703 = vst [vmem:[#allocation32_spill] sm:$0xff] %v5750_v2 }
 0x13b   : > { %v5752_v34 = vpop.f32.mrf.mxu0  ;;  %v5754_v0 = vpop.f32.mrf.mxu1 }
 0x13c   : > { %6704 = vst [vmem:[#allocation33_spill] sm:$0xff] %v5752_v34  ;;  %6705 = vst [vmem:[#allocation34_spill] sm:$0xff] %v5754_v0 }
 0x13d   : > { %v5756_v50 = vpop.f32.mrf.mxu0  ;;  %v5758_v47 = vpop.f32.mrf.mxu1 }
 0x13e   : > { %6706 = vst [vmem:[#allocation35_spill] sm:$0xff] %v5756_v50  ;;  %6707 = vst [vmem:[#allocation36_spill] sm:$0xff] %v5758_v47 }
 0x13f   : > { %v5760_v31 = vpop.f32.mrf.mxu0  ;;  %v5762_v8 = vpop.f32.mrf.mxu1 }
 0x140   : > { %6708 = vst [vmem:[#allocation37_spill] sm:$0xff] %v5760_v31  ;;  %6709 = vst [vmem:[#allocation38_spill] sm:$0xff] %v5762_v8 }
 0x141   : > { %v5764_v30 = vpop.f32.mrf.mxu0  ;;  %v5766_v26 = vpop.f32.mrf.mxu1 }
 0x142   : > { %6710 = vst [vmem:[#allocation39_spill] sm:$0xff] %v5764_v30  ;;  %6711 = vst [vmem:[#allocation40_spill] sm:$0xff] %v5766_v26 }
 0x143   : > { %v5768_v48 = vpop.f32.mrf.mxu0  ;;  %v5770_v25 = vpop.f32.mrf.mxu1 }
 0x144   : > { %6712 = vst [vmem:[#allocation41_spill] sm:$0xff] %v5768_v48  ;;  %6713 = vst [vmem:[#allocation42_spill] sm:$0xff] %v5770_v25 }
 0x145   : > { %v5772_v2 = vpop.f32.mrf.mxu0  ;;  %v5774_v34 = vpop.f32.mrf.mxu1 }
 0x146   : > { %6714 = vst [vmem:[#allocation43_spill] sm:$0xff] %v5772_v2  ;;  %6715 = vst [vmem:[#allocation44_spill] sm:$0xff] %v5774_v34 }
 0x147   : > { %v5776_v0 = vpop.f32.mrf.mxu0  ;;  %v5778_v50 = vpop.f32.mrf.mxu1 }
 0x148   : > { %6716 = vst [vmem:[#allocation45_spill] sm:$0xff] %v5776_v0  ;;  %6717 = vst [vmem:[#allocation46_spill] sm:$0xff] %v5778_v50 }
 0x149   : > { %v5780_v47 = vpop.f32.mrf.mxu0  ;;  %v5782_v31 = vpop.f32.mrf.mxu1 }
 0x14a   : > { %6718 = vst [vmem:[#allocation47_spill] sm:$0xff] %v5780_v47  ;;  %6719 = vst [vmem:[#allocation48_spill] sm:$0xff] %v5782_v31 }
 0x14b   : > { %v5784_v8 = vpop.f32.mrf.mxu0  ;;  %v5786_v30 = vpop.f32.mrf.mxu1 }
 0x14c   : > { %6720 = vst [vmem:[#allocation49_spill] sm:$0xff] %v5784_v8  ;;  %6721 = vst [vmem:[#allocation50_spill] sm:$0xff] %v5786_v30 }
 0x14d   : > { %v5788_v26 = vpop.f32.mrf.mxu0  ;;  %v5790_v48 = vpop.f32.mrf.mxu1 }
 0x14e   : > { %6722 = vst [vmem:[#allocation51_spill] sm:$0xff] %v5788_v26  ;;  %6723 = vst [vmem:[#allocation52_spill] sm:$0xff] %v5790_v48 }
 0x14f   : > { %v5792_v25 = vpop.f32.mrf.mxu0  ;;  %v5794_v2 = vpop.f32.mrf.mxu1 }
 0x150   : > { %6724 = vst [vmem:[#allocation53_spill] sm:$0xff] %v5792_v25  ;;  %6725 = vst [vmem:[#allocation54_spill] sm:$0xff] %v5794_v2 }
 0x151   : > { %v5796_v34 = vpop.f32.mrf.mxu0  ;;  %v5798_v0 = vpop.f32.mrf.mxu1 }
 0x152   : > { %6726 = vst [vmem:[#allocation55_spill] sm:$0xff] %v5796_v34  ;;  %6727 = vst [vmem:[#allocation56_spill] sm:$0xff] %v5798_v0 }
 0x153   : > { %v5800_v50 = vpop.f32.mrf.mxu0  ;;  %v5802_v47 = vpop.f32.mrf.mxu1 }
 0x154   : > { %6728 = vst [vmem:[#allocation57_spill] sm:$0xff] %v5800_v50  ;;  %6729 = vst [vmem:[#allocation58_spill] sm:$0xff] %v5802_v47 }
 0x155   : > { %v5804_v31 = vpop.f32.mrf.mxu0  ;;  %v5806_v8 = vpop.f32.mrf.mxu1 }
 0x156   : > { %6730 = vst [vmem:[#allocation59_spill] sm:$0xff] %v5804_v31  ;;  %6731 = vst [vmem:[#allocation60_spill] sm:$0xff] %v5806_v8 }
 0x157   : > { %v5808_v30 = vpop.f32.mrf.mxu0  ;;  %v5810_v26 = vpop.f32.mrf.mxu1 }
 0x158   : > { %6732 = vst [vmem:[#allocation61_spill] sm:$0xff] %v5808_v30  ;;  %6733 = vst [vmem:[#allocation62_spill] sm:$0xff] %v5810_v26 }
 0x159   : > { %v5812_v48 = vpop.f32.mrf.mxu0  ;;  %v5814_v25 = vpop.f32.mrf.mxu1 }
 0x15a   : > { %6734 = vst [vmem:[#allocation63_spill] sm:$0xff] %v5812_v48  ;;  %6735 = vst [vmem:[#allocation64_spill] sm:$0xff] %v5814_v25 }
 0x15b   : > { %v5816_v2 = vpop.f32.mrf.mxu0  ;;  %v5818_v34 = vpop.f32.mrf.mxu1 }
 0x15c   : > { %6736 = vst [vmem:[#allocation65_spill] sm:$0xff] %v5816_v2  ;;  %6737 = vst [vmem:[#allocation66_spill] sm:$0xff] %v5818_v34 }
 0x15d   : > { %v5820_v0 = vpop.f32.mrf.mxu0  ;;  %v5822_v50 = vpop.f32.mrf.mxu1 }
 0x15e   : > { %6738 = vst [vmem:[#allocation67_spill] sm:$0xff] %v5820_v0  ;;  %6739 = vst [vmem:[#allocation68_spill] sm:$0xff] %v5822_v50 }
 0x15f   : > { %v5824_v47 = vpop.f32.mrf.mxu0  ;;  %v5826_v31 = vpop.f32.mrf.mxu1 }
 0x160   : > { %6740 = vst [vmem:[#allocation69_spill] sm:$0xff] %v5824_v47  ;;  %6741 = vst [vmem:[#allocation70_spill] sm:$0xff] %v5826_v31 }
 0x161   : > { %v5828_v8 = vpop.f32.mrf.mxu0  ;;  %v5830_v30 = vpop.f32.mrf.mxu1 }
 0x162   : > { %6742 = vst [vmem:[#allocation71_spill] sm:$0xff] %v5828_v8  ;;  %6743 = vst [vmem:[#allocation72_spill] sm:$0xff] %v5830_v30 }
 0x163   : > { %v5832_v26 = vpop.f32.mrf.mxu0  ;;  %v5834_v48 = vpop.f32.mrf.mxu1 }
 0x164   : > { %6744 = vst [vmem:[#allocation73_spill] sm:$0xff] %v5832_v26  ;;  %6745 = vst [vmem:[#allocation74_spill] sm:$0xff] %v5834_v48 }
 0x165   : > { %v5836_v25 = vpop.f32.mrf.mxu0  ;;  %v5838_v2 = vpop.f32.mrf.mxu1 }
 0x166   : > { %6746 = vst [vmem:[#allocation75_spill] sm:$0xff] %v5836_v25  ;;  %6747 = vst [vmem:[#allocation76_spill] sm:$0xff] %v5838_v2 }
 0x167   : > { %v5840_v34 = vpop.f32.mrf.mxu0  ;;  %v5842_v0 = vpop.f32.mrf.mxu1 }
 0x168   : > { %6748 = vst [vmem:[#allocation77_spill] sm:$0xff] %v5840_v34  ;;  %6749 = vst [vmem:[#allocation78_spill] sm:$0xff] %v5842_v0 }
 0x169   : > { %v5844_v50 = vpop.f32.mrf.mxu0  ;;  %v5846_v47 = vpop.f32.mrf.mxu1 }
 0x16a   : > { %6750 = vst [vmem:[#allocation79_spill] sm:$0xff] %v5844_v50  ;;  %6751 = vst [vmem:[#allocation80_spill] sm:$0xff] %v5846_v47 }
 0x16b   : > { %v5848_v31 = vpop.f32.mrf.mxu0  ;;  %v5850_v8 = vpop.f32.mrf.mxu1 }
 0x16c   : > { %6752 = vst [vmem:[#allocation81_spill] sm:$0xff] %v5848_v31  ;;  %6753 = vst [vmem:[#allocation82_spill] sm:$0xff] %v5850_v8 }
 0x16d   : > { %v5852_v30 = vpop.f32.mrf.mxu0  ;;  %v5854_v26 = vpop.f32.mrf.mxu1 }
 0x16e   : > { %6754 = vst [vmem:[#allocation83_spill] sm:$0xff] %v5852_v30  ;;  %6755 = vst [vmem:[#allocation84_spill] sm:$0xff] %v5854_v26 }
 0x16f   : > { %v5856_v48 = vpop.f32.mrf.mxu0  ;;  %v5858_v25 = vpop.f32.mrf.mxu1 }
 0x170   : > { %6756 = vst [vmem:[#allocation85_spill] sm:$0xff] %v5856_v48  ;;  %6757 = vst [vmem:[#allocation86_spill] sm:$0xff] %v5858_v25 }
 0x171   : > { %v5860_v2 = vpop.f32.mrf.mxu0  ;;  %v5862_v34 = vpop.f32.mrf.mxu1 }
 0x172   : > { %6758 = vst [vmem:[#allocation87_spill] sm:$0xff] %v5860_v2  ;;  %6759 = vst [vmem:[#allocation88_spill] sm:$0xff] %v5862_v34  ;;  %v5876_v34 = vpop.permute.xlu1 %3069 }
 0x173   : > { %v5864_v0 = vpop.f32.mrf.mxu0  ;;  %v5866_v50 = vpop.f32.mrf.mxu1 }
 0x174   : > { %6760 = vst [vmem:[#allocation89_spill] sm:$0xff] %v5864_v0  ;;  %6761 = vst [vmem:[#allocation90_spill] sm:$0xff] %v5866_v50 }
 0x175   : > { %v5868_v47 = vpop.f32.mrf.mxu0  ;;  %v5870_v31 = vpop.f32.mrf.mxu1 }
 0x176   : > { %6762 = vst [vmem:[#allocation91_spill] sm:$0xff] %v5868_v47  ;;  %6763 = vst [vmem:[#allocation92_spill] sm:$0xff] %v5870_v31 }
 0x177   : > { %v5872_v8 = vpop.f32.mrf.mxu0  ;;  %v5874_v30 = vpop.f32.mrf.mxu1 }
 0x178   : > { %6764 = vst [vmem:[#allocation93_spill] sm:$0xff] %v5872_v8  ;;  %6765 = vst [vmem:[#allocation94_spill] sm:$0xff] %v5874_v30 }
 0x179   : > { %v1705_v26 = vpop.f32.mrf.mxu0  ;;  %v1794_v48 = vpop.f32.mrf.mxu1 }
 0x17a   : > { %v1706_v47 = vadd.f32 %v1705_v26, %v5512_v49  ;;  %v1795_v36 = vadd.f32 %v1794_v48, %v5516_v51  ;;  %v5889_v26 = vpop.permute.xlu1 %3074  ;;  %v5896_v51 = vpop.permute.xlu0 %3084 }
 0x17b   : > { %v1707_v45 = vpop.f32.mrf.mxu0  ;;  %v1796_v25 = vpop.f32.mrf.mxu1 }
 0x17c   : > { %v1708_v29 = vadd.f32 %v1707_v45, %v5521_v52  ;;  %v1797_v49 = vadd.f32 %v1796_v25, %v5525_v53 }
 0x17d   : > { %v1711_v6 = vpop.f32.mrf.mxu0  ;;  %v1800_v2 = vpop.f32.mrf.mxu1 }
 0x17e   : > { %v1712_v52 = vadd.f32 %v1711_v6, %v5529_v54 }
 0x17f   : > { %v1713_v46 = vpop.f32.mrf.mxu0  ;;  %v1802_v0 = vpop.f32.mrf.mxu1 }
 0x180   : > { %v1714_v8 = vadd.f32 %v1713_v46, %v5539_v56  ;;  %v1803_v30 = vadd.f32 %v1802_v0, %v5542_v57  ;;  %v3090_v0 = vadd.f32 %v5876_v34, %v1797_v49 }
 0x181   : > { %v1717_v50 = vpop.f32.mrf.mxu0  ;;  %v1806_v31 = vpop.f32.mrf.mxu1 }
 0x182   : > { %v1718_v28 = vadd.f32 %v1717_v50, %v5544_v58  ;;  %v1807_v56 = vadd.f32 %v1806_v31, %v5548_v59  ;;  %v1801_v58 = vadd.f32 %v1800_v2, %v5534_v55  ;;  %v3218_v39 = vmax.f32 %v3090_v0, 0.0 }
 0x183   : > { %v1719_v43 = vpop.f32.mrf.mxu0  ;;  %v1808_v41 = vpop.f32.mrf.mxu1 }
 0x184   : > { %v1720_v42 = vadd.f32 %v1719_v43, %v5553_v61  ;;  %v1809_v40 = vadd.f32 %v1808_v41, %v5556_v62  ;;  %v5894_v61 = vadd.f32 %v5876_v34, %v1706_v47  ;;  %v3120_v62 = vadd.f32 %v5889_v26, %v1714_v8 }
 0x185   : > { %v1723_v35 = vpop.f32.mrf.mxu0  ;;  %v1812_v46 = vpop.f32.mrf.mxu1  ;;  %v3122_v43 = vadd.f32 %v5889_v26, %v1803_v30  ;;  %v3151_v47 = vadd.f32 %v5878_v44, %v1718_v28  ;;  %v3121_v30 = vadd.f32 %v5889_v26, %v1801_v58 }
 0x186   : > { %v1724_v57 = vadd.f32 %v1723_v35, %v5558_v63  ;;  %v1813_v53 = vadd.f32 %v1812_v46, %v5563_v1  ;;  %v3152_v59 = vadd.f32 %v5878_v44, %v1720_v42  ;;  %v3154_v54 = vadd.f32 %v5878_v44, %v1809_v40 }
 0x187   : > { %v1725_v41 = vpop.f32.mrf.mxu0  ;;  %v1814_v45 = vpop.f32.mrf.mxu1  ;;  %v3088_v1 = vadd.f32 %v5876_v34, %v1708_v29  ;;  %v3153_v42 = vadd.f32 %v5878_v44, %v1807_v56  ;;  %v3119_v40 = vadd.f32 %v5889_v26, %v1712_v52  ;;  %v3248_v25 = vmax.f32 %v3120_v62, 0.0 }
 0x188   : > { %v3183_v63 = vadd.f32 %v5896_v51, %v1724_v57  ;;  %v1726_v35 = vadd.f32 %v1725_v41, %v5569_v3  ;;  %v3185_v55 = vadd.f32 %v5896_v51, %v1813_v53  ;;  %v1815_v48 = vadd.f32 %v1814_v45, %v5572_v4 }
 0x189   : > { %v1883_v50 = vpop.f32.mrf.mxu0  ;;  %v1972_v6 = vpop.f32.mrf.mxu1  ;;  %v3280_v4 = vmax.f32 %v3152_v59, 0.0  ;;  %v3250_v46 = vmax.f32 %v3122_v43, 0.0  ;;  %v3279_v49 = vmax.f32 %v3151_v47, 0.0  ;;  %v3282_v53 = vmax.f32 %v3154_v54, 0.0 }
 0x18a   : > { %v3184_v2 = vadd.f32 %v5896_v51, %v1726_v35  ;;  %v3311_v3 = vmax.f32 %v3183_v63, 0.0  ;;  %v3186_v8 = vadd.f32 %v5896_v51, %v1815_v48  ;;  %v3313_v31 = vmax.f32 %v3185_v55, 0.0 }
 0x18b   : > { %v1885_v28 = vpop.f32.mrf.mxu0  ;;  %v1974_v29 = vpop.f32.mrf.mxu1  ;;  %v3216_v35 = vmax.f32 %v3088_v1, 0.0  ;;  %v3281_v45 = vmax.f32 %v3153_v42, 0.0  ;;  %v3089_v48 = vadd.f32 %v5876_v34, %v1795_v36  ;;  %v3247_v62 = vmax.f32 %v3119_v40, 0.0 }
 0x18c   : > { %v3312_v57 = vmax.f32 %v3184_v2, 0.0  ;;  %v3314_v56 = vmax.f32 %v3186_v8, 0.0  ;;  %v3375_v52 = vpack.c.bf16 %v3311_v3, %v3279_v49  ;;  %v3249_v43 = vmax.f32 %v3121_v30, 0.0 }
 0x18d   : > { %v1889_v41 = vpop.f32.mrf.mxu0  ;;  %v1978_v63 = vpop.f32.mrf.mxu1  ;;  %v3377_v59 = vpack.c.bf16 %v3313_v31, %v3281_v45  ;;  %v3344_v2 = vpack.c.bf16 %v3248_v25, %v3216_v35  ;;  %v1884_v47 = vadd.f32 %v1883_v50, %v5574_v7  ;;  %v3346_v1 = vpack.c.bf16 %v3250_v46, %v3218_v39  ;;  %v5927_v39 = vld [vmem:[%s6668_s5] sm:$0xff]  }
 0x18e   : > { %v3376_v33 = vpack.c.bf16 %v3312_v57, %v3280_v4  ;;  %v3378_v58 = vpack.c.bf16 %v3314_v56, %v3282_v53  ;;  %v3215_v42 = vmax.f32 %v5894_v61, 0.0  ;;  %v1886_v36 = vadd.f32 %v1885_v28, %v5583_v37 }
 0x18f   : > { %v1891_v27 = vpop.f32.mrf.mxu0  ;;  %v1980_v55 = vpop.f32.mrf.mxu1  ;;  %v3217_v3 = vmax.f32 %v3089_v48, 0.0  ;;  %v5930_v37 = vadd.f32 %v5876_v34, %v1884_v47  ;;  %v1890_v46 = vadd.f32 %v1889_v41, %v5591_v11  ;;  %v5966_v47 = vld [vmem:[%s6668_s5 + $0x8] sm:$0xff]  }
 0x190   : > { %3464 = vmatprep.subr.bf16.mxu0 %v3376_v33  ;;  %3517 = vmatprep.subr.bf16.mxu1 %v3378_v58  ;;  %v1892_v8 = vadd.f32 %v1891_v27, %v5601_v13  ;;  %v3343_v40 = vpack.c.bf16 %v3247_v62, %v3215_v42  ;;  %v1981_v30 = vadd.f32 %v1980_v55, %v5604_v14 }
 0x191   : > { %v1895_v54 = vpop.f32.mrf.mxu0  ;;  %3465 = vmatpush1.bf16.msra.mxu0 %v3375_v52  ;;  %v1984_v0 = vpop.f32.mrf.mxu1  ;;  %3518 = vmatpush1.bf16.msra.mxu1 %v3377_v59  ;;  %v3345_v25 = vpack.c.bf16 %v3249_v43, %v3217_v3  ;;  %v1973_v13 = vadd.f32 %v1972_v6, %v5578_v9  ;;  %v1975_v27 = vadd.f32 %v1974_v29, %v5587_v10 }
 0x192   : > { %3466 = vmatprep.subr.bf16.mxu0 %v3344_v2  ;;  %3519 = vmatprep.subr.bf16.mxu1 %v3346_v1  ;;  %v1896_v28 = vadd.f32 %v1895_v54, %v5606_v15  ;;  %v1985_v4 = vadd.f32 %v1984_v0, %v5610_v16  ;;  %v1979_v9 = vadd.f32 %v1978_v63, %v5596_v12 }
 0x193   : > { %v1897_v33 = vpop.f32.mrf.mxu0  ;;  %v1986_v50 = vpop.f32.mrf.mxu1  ;;  %v3124_v10 = vadd.f32 %v5889_v26, %v1892_v8  ;;  %v3126_v29 = vadd.f32 %v5889_v26, %v1981_v30  ;;  %v3094_v56 = vadd.f32 %v5876_v34, %v1975_v27  ;;  %v3123_v63 = vadd.f32 %v5889_v26, %v1890_v46 }
 0x194   : > { %v1898_v7 = vadd.f32 %v1897_v33, %v5615_v17  ;;  %v1987_v61 = vadd.f32 %v1986_v50, %v5618_v18  ;;  %v3092_v17 = vadd.f32 %v5876_v34, %v1886_v36  ;;  %v3157_v41 = vadd.f32 %v5878_v44, %v1985_v4 }
 0x195   : > { %v1901_v14 = vpop.f32.mrf.mxu0  ;;  %3467 = vmatpush1.bf16.msra.mxu0 %v3343_v40  ;;  %v1990_v57 = vpop.f32.mrf.mxu1  ;;  %3520 = vmatpush1.bf16.msra.mxu1 %v3345_v25  ;;  %v3252_v48 = vmax.f32 %v3124_v10, 0.0  ;;  %v3093_v54 = vadd.f32 %v5876_v34, %v1973_v13  ;;  %v3254_v1 = vmax.f32 %v3126_v29, 0.0  ;;  %v3251_v50 = vmax.f32 %v3123_v63, 0.0  ;;  %v6771_v63 = vld [vmem:[#allocation5_spill] sm:$0xff] }
 0x196   : > { %v1902_v31 = vadd.f32 %v1901_v14, %v5620_v19  ;;  %v1991_v18 = vadd.f32 %v1990_v57, %v5624_v20  ;;  %v3156_v49 = vadd.f32 %v5878_v44, %v1898_v7  ;;  %v3158_v11 = vadd.f32 %v5878_v44, %v1987_v61 }
 0x197   : > { %v1903_v6 = vpop.f32.mrf.mxu0  ;;  %v1992_v19 = vpop.f32.mrf.mxu1  ;;  %v3220_v3 = vmax.f32 %v3092_v17, 0.0  ;;  %v3285_v33 = vmax.f32 %v3157_v41, 0.0  ;;  %v3222_v7 = vmax.f32 %v3094_v56, 0.0  ;;  %v3219_v14 = vmax.f32 %v5930_v37, 0.0  ;;  %v6768_v56 = vld [vmem:[#allocation7_spill] sm:$0xff] }
 0x198   : > { %v3187_v15 = vadd.f32 %v5896_v51, %v1902_v31  ;;  %v1904_v16 = vadd.f32 %v1903_v6, %v5629_v21  ;;  %4841 = vmatmul.mubr.msk.bf16.vlgmr.msra.gmra.mxu0 %vm3445_vm5, %v5927_v39  ;;  %v3189_v12 = vadd.f32 %v5896_v51, %v1991_v18  ;;  %v1993_v53 = vadd.f32 %v1992_v19, %v5632_v22  ;;  %v6770_v41 = vld [vmem:[#allocation11_spill] sm:$0xff] }
 0x199   : > { %4843 = vmatmul.mubr.msk.bf16.vlgmr.msra.gmra.mxu1 %vm3445_vm5, %v5927_v39  ;;  %v2061_v20 = vpop.f32.mrf.mxu0  ;;  %3494 = vmatprep.mubr.bf16.mxu0 %v6699_v5  ;;  %v3155_v21 = vadd.f32 %v5878_v44, %v1896_v28  ;;  %v2150_v45 = vpop.f32.mrf.mxu1  ;;  %v3125_v22 = vadd.f32 %v5889_v26, %v1979_v9  ;;  %v3284_v62 = vmax.f32 %v3156_v49, 0.0  ;;  %v3286_v42 = vmax.f32 %v3158_v11, 0.0  ;;  %v6766_v11 = vld [vmem:[#allocation4_spill] sm:$0xff] }
 0x19a   : > { %v3188_v35 = vadd.f32 %v5896_v51, %v1904_v16  ;;  %3547 = vmatprep.mubr.bf16.mxu1 %v6699_v5  ;;  %v3190_v52 = vadd.f32 %v5896_v51, %v1993_v53  ;;  %v3315_v59 = vmax.f32 %v3187_v15, 0.0  ;;  %v3317_v55 = vmax.f32 %v3189_v12, 0.0  ;;  %v6767_v53 = vld [vmem:[#allocation10_spill] sm:$0xff] }
 0x19b   : > { %v2063_v58 = vpop.f32.mrf.mxu0  ;;  %v2152_v43 = vpop.f32.mrf.mxu1  ;;  %v3283_v8 = vmax.f32 %v3155_v21, 0.0  ;;  %v3253_v25 = vmax.f32 %v3125_v22, 0.0  ;;  %v3348_v13 = vpack.c.bf16 %v3252_v48, %v3220_v3  ;;  %v3221_v17 = vmax.f32 %v3093_v54, 0.0  ;;  %v6769_v21 = vld [vmem:[#allocation8_spill] sm:$0xff]  ;;  %v6772_v48 = vld [vmem:[#allocation6_spill] sm:$0xff] }
 0x19c   : > { %v3316_v2 = vmax.f32 %v3188_v35, 0.0  ;;  %v3318_v36 = vmax.f32 %v3190_v52, 0.0  ;;  %v3381_v4 = vpack.c.bf16 %v3317_v55, %v3285_v33  ;;  %v2062_v57 = vadd.f32 %v2061_v20, %v5634_v23  ;;  %v6776_v33 = vld [vmem:[#allocation14_spill] sm:$0xff] }
 0x19d   : > { %v2067_v0 = vpop.f32.mrf.mxu0  ;;  %v2156_v40 = vpop.f32.mrf.mxu1  ;;  %v3379_v28 = vpack.c.bf16 %v3315_v59, %v3283_v8  ;;  %v2064_v46 = vadd.f32 %v2063_v58, %v5643_v60  ;;  %v3350_v10 = vpack.c.bf16 %v3254_v1, %v3222_v7  ;;  %v3347_v18 = vpack.c.bf16 %v3251_v50, %v3219_v14  ;;  %v6773_v58 = vld [vmem:[#allocation9_spill] sm:$0xff]  ;;  %v6774_v59 = vld [vmem:[#allocation12_spill] sm:$0xff] }
 0x19e   : > { %v3380_v30 = vpack.c.bf16 %v3316_v2, %v3284_v62  ;;  %v3382_v61 = vpack.c.bf16 %v3318_v36, %v3286_v42  ;;  %v3349_v6 = vpack.c.bf16 %v3253_v25, %v3221_v17  ;;  %v2151_v49 = vadd.f32 %v2150_v45, %v5638_v24  ;;  %v6775_v42 = vld [vmem:[#allocation13_spill] sm:$0xff] }
 0x19f   : > { %v2069_v27 = vpop.f32.mrf.mxu0  ;;  %v2158_v31 = vpop.f32.mrf.mxu1  ;;  %v5982_v16 = vadd.f32 %v5876_v34, %v2062_v57  ;;  %v5985_v19 = vadd.f32 %v5876_v34, %v2064_v46  ;;  %v2153_v12 = vadd.f32 %v2152_v43, %v6766_v11  ;;  %v2068_v22 = vadd.f32 %v2067_v0, %v6771_v63  ;;  %v6777_v63 = vld [vmem:[#allocation15_spill] sm:$0xff] }
 0x1a0   : > { %4842 = vmatmul.mubr.msk.bf16.gmra.mxu0 %vm3445_vm5, %v5966_v47  ;;  %3570 = vmatprep.subr.bf16.mxu0 %v3380_v30  ;;  %v2070_v23 = vadd.f32 %v2069_v27, %v5659_v32  ;;  %v2159_v32 = vadd.f32 %v2158_v31, %v6768_v56  ;;  %v2157_v52 = vadd.f32 %v2156_v40, %v6772_v48 }
 0x1a1   : > { %4844 = vmatmul.mubr.msk.bf16.gmra.mxu1 %vm3445_vm5, %v5966_v47  ;;  %3623 = vmatprep.subr.bf16.mxu1 %v3382_v61  ;;  %v2073_v9 = vpop.f32.mrf.mxu0  ;;  %v2162_v37 = vpop.f32.mrf.mxu1  ;;  %v3098_v61 = vadd.f32 %v5876_v34, %v2153_v12  ;;  %v3127_v14 = vadd.f32 %v5889_v26, %v2068_v22  ;;  %v3223_v48 = vmax.f32 %v5982_v16, 0.0 }
 0x1a2   : > { %3571 = vmatpush1.bf16.msra.mxu0 %v3379_v28  ;;  %3624 = vmatpush1.bf16.msra.mxu1 %v3381_v4  ;;  %v2163_v62 = vadd.f32 %v2162_v37, %v6773_v58  ;;  %v3128_v43 = vadd.f32 %v5889_v26, %v2070_v23  ;;  %v3130_v7 = vadd.f32 %v5889_v26, %v2159_v32 }
 0x1a3   : > { %3572 = vmatprep.subr.bf16.mxu0 %v3348_v13  ;;  %3625 = vmatprep.subr.bf16.mxu1 %v3350_v10  ;;  %v2075_v29 = vpop.f32.mrf.mxu0  ;;  %v2164_v15 = vpop.f32.mrf.mxu1  ;;  %v3129_v13 = vadd.f32 %v5889_v26, %v2157_v52  ;;  %v3097_v23 = vadd.f32 %v5876_v34, %v2151_v49  ;;  %v3226_v32 = vmax.f32 %v3098_v61, 0.0  ;;  %v6784_v61 = vld [vmem:[#allocation22_spill] sm:$0xff] }
 0x1a4   : > { %v2076_v60 = vadd.f32 %v2075_v29, %v5673_v38  ;;  %3590 = vmatprep.mubr.bf16.mxu0 %v6699_v5  ;;  %3643 = vmatprep.mubr.bf16.mxu1 %v6699_v5  ;;  %v2165_v20 = vadd.f32 %v2164_v15, %v6767_v53  ;;  %v2074_v38 = vadd.f32 %v2073_v9, %v6769_v21  ;;  %v3256_v10 = vmax.f32 %v3128_v43, 0.0 }
 0x1a5   : > { %v2079_v24 = vpop.f32.mrf.mxu0  ;;  %v2168_v45 = vpop.f32.mrf.mxu1  ;;  %v3161_v28 = vadd.f32 %v5878_v44, %v2163_v62  ;;  %v3224_v53 = vmax.f32 %v5985_v19, 0.0  ;;  %v3255_v21 = vmax.f32 %v3127_v14, 0.0  ;;  %v3225_v52 = vmax.f32 %v3097_v23, 0.0 }
 0x1a6   : > { %v2080_v35 = vadd.f32 %v2079_v24, %v6770_v41  ;;  %3573 = vmatpush1.bf16.msra.mxu0 %v3347_v18  ;;  %3626 = vmatpush1.bf16.msra.mxu1 %v3349_v6  ;;  %v2169_v55 = vadd.f32 %v2168_v45, %v6774_v59  ;;  %v3160_v54 = vadd.f32 %v5878_v44, %v2076_v60  ;;  %v3258_v60 = vmax.f32 %v3130_v7, 0.0  ;;  %v6778_v59 = vld [vmem:[#allocation17_spill] sm:$0xff] }
 0x1a7   : > { %v2081_v2 = vpop.f32.mrf.mxu0  ;;  %v2170_v3 = vpop.f32.mrf.mxu1  ;;  %v3162_v8 = vadd.f32 %v5878_v44, %v2165_v20  ;;  %v3159_v50 = vadd.f32 %v5878_v44, %v2074_v38  ;;  %v3289_v20 = vmax.f32 %v3161_v28, 0.0  ;;  %v3257_v38 = vmax.f32 %v3129_v13, 0.0  ;;  %v6785_v28 = vld [vmem:[#allocation23_spill] sm:$0xff] }
 0x1a8   : > { %v3191_v1 = vadd.f32 %v5896_v51, %v2080_v35  ;;  %v2082_v36 = vadd.f32 %v2081_v2, %v6775_v42  ;;  %v3193_v0 = vadd.f32 %v5896_v51, %v2169_v55  ;;  %v2171_v40 = vadd.f32 %v2170_v3, %v6776_v33  ;;  %v6780_v3 = vld [vmem:[#allocation16_spill] sm:$0xff] }
 0x1a9   : > { %4845 = vmatmul.mubr.msk.bf16.vlgmr.msra.gmra.mxu0 %vm3445_vm5, %v5927_v39  ;;  %4847 = vmatmul.mubr.msk.bf16.vlgmr.msra.gmra.mxu1 %vm3445_vm5, %v5927_v39  ;;  %v2239_v30 = vpop.f32.mrf.mxu0  ;;  %v2328_v27 = vpop.f32.mrf.mxu1  ;;  %v3288_v17 = vmax.f32 %v3160_v54, 0.0  ;;  %v3290_v37 = vmax.f32 %v3162_v8, 0.0  ;;  %v3287_v15 = vmax.f32 %v3159_v50, 0.0  ;;  %v3352_v19 = vpack.c.bf16 %v3256_v10, %v3224_v53  ;;  %v6783_v50 = vld [vmem:[#allocation18_spill] sm:$0xff]  ;;  %v6788_v10 = vld [vmem:[#allocation24_spill] sm:$0xff]  ;;  %v6791_v53 = vld [vmem:[#allocation29_spill] sm:$0xff] }
 0x1aa   : > { %v3192_v25 = vadd.f32 %v5896_v51, %v2082_v36  ;;  %3600 = vmatprep.mubr.bf16.mxu0 %v6699_v5  ;;  %3653 = vmatprep.mubr.bf16.mxu1 %v6699_v5  ;;  %v3194_v4 = vadd.f32 %v5896_v51, %v2171_v40  ;;  %v3319_v57 = vmax.f32 %v3191_v1, 0.0  ;;  %v3321_v18 = vmax.f32 %v3193_v0, 0.0  ;;  %v6779_v1 = vld [vmem:[#allocation25_spill] sm:$0xff]  ;;  %v6782_v40 = vld [vmem:[#allocation26_spill] sm:$0xff] }
 0x1ab   : > { %v2241_v31 = vpop.f32.mrf.mxu0  ;;  %v2330_v9 = vpop.f32.mrf.mxu1  ;;  %v2240_v22 = vadd.f32 %v2239_v30, %v6777_v63  ;;  %v3354_v62 = vpack.c.bf16 %v3258_v60, %v3226_v32  ;;  %v3351_v43 = vpack.c.bf16 %v3255_v21, %v3223_v48  ;;  %v3353_v54 = vpack.c.bf16 %v3257_v38, %v3225_v52  ;;  %v6781_v0 = vld [vmem:[#allocation21_spill] sm:$0xff]  ;;  %v6790_v60 = vld [vmem:[#allocation20_spill] sm:$0xff]  ;;  %v6792_v21 = vld [vmem:[#allocation30_spill] sm:$0xff] }
 0x1ac   : > { %v3320_v46 = vmax.f32 %v3192_v25, 0.0  ;;  %v3322_v6 = vmax.f32 %v3194_v4, 0.0  ;;  %v3383_v41 = vpack.c.bf16 %v3319_v57, %v3287_v15  ;;  %v3385_v45 = vpack.c.bf16 %v3321_v18, %v3289_v20  ;;  %v6789_v18 = vld [vmem:[#allocation28_spill] sm:$0xff] }
 0x1ad   : > { %v2245_v29 = vpop.f32.mrf.mxu0  ;;  %v2334_v11 = vpop.f32.mrf.mxu1  ;;  %v2242_v55 = vadd.f32 %v2241_v31, %v6778_v59  ;;  %v6029_v16 = vadd.f32 %v5876_v34, %v2240_v22  ;;  %v2329_v8 = vadd.f32 %v2328_v27, %v6780_v3  ;;  %v2331_v25 = vadd.f32 %v2330_v9, %v6783_v50  ;;  %v6786_v31 = vld [vmem:[#allocation27_spill] sm:$0xff] }
 0x1ae   : > { %v3384_v12 = vpack.c.bf16 %v3320_v46, %v3288_v17  ;;  %v3386_v56 = vpack.c.bf16 %v3322_v6, %v3290_v37  ;;  %v6787_v27 = vld [vmem:[#allocation19_spill] sm:$0xff]  ;;  %v2335_v9 = vadd.f32 %v2334_v11, %v6790_v60 }
 0x1af   : > { %v2247_v24 = vpop.f32.mrf.mxu0  ;;  %v2336_v35 = vpop.f32.mrf.mxu1  ;;  %v3100_v57 = vadd.f32 %v5876_v34, %v2242_v55  ;;  %v2246_v46 = vadd.f32 %v2245_v29, %v6787_v27  ;;  %v3102_v22 = vadd.f32 %v5876_v34, %v2331_v25  ;;  %v3101_v3 = vadd.f32 %v5876_v34, %v2329_v8  ;;  %v6793_v27 = vld [vmem:[#allocation31_spill] sm:$0xff] }
 0x1b0   : > { %3676 = vmatprep.subr.bf16.mxu0 %v3384_v12  ;;  %3729 = vmatprep.subr.bf16.mxu1 %v3386_v56  ;;  %v2248_v33 = vadd.f32 %v2247_v24, %v6781_v0  ;;  %v2337_v14 = vadd.f32 %v2336_v35, %v6784_v61 }
 0x1b1   : > { %4846 = vmatmul.mubr.msk.bf16.gmra.mxu0 %vm3445_vm5, %v5966_v47  ;;  %4848 = vmatmul.mubr.msk.bf16.gmra.mxu1 %vm3445_vm5, %v5966_v47  ;;  %v2251_v49 = vpop.f32.mrf.mxu0  ;;  %v2340_v58 = vpop.f32.mrf.mxu1 }
 0x1b2   : > { %3677 = vmatpush1.bf16.msra.mxu0 %v3383_v41  ;;  %3730 = vmatpush1.bf16.msra.mxu1 %v3385_v45  ;;  %v2252_v4 = vadd.f32 %v2251_v49, %v6785_v28  ;;  %v2341_v37 = vadd.f32 %v2340_v58, %v6788_v10  ;;  %v3132_v56 = vadd.f32 %v5889_v26, %v2248_v33 }
 0x1b3   : > { %3678 = vmatprep.subr.bf16.mxu0 %v3352_v19  ;;  %v2253_v2 = vpop.f32.mrf.mxu0  ;;  %3731 = vmatprep.subr.bf16.mxu1 %v3354_v62  ;;  %v2342_v36 = vpop.f32.mrf.mxu1  ;;  %v3134_v11 = vadd.f32 %v5889_v26, %v2337_v14  ;;  %v3131_v49 = vadd.f32 %v5889_v26, %v2246_v46  ;;  %v3133_v58 = vadd.f32 %v5889_v26, %v2335_v9  ;;  %v3230_v14 = vmax.f32 %v3102_v22, 0.0  ;;  %v6800_v22 = vld [vmem:[#allocation38_spill] sm:$0xff] }
 0x1b4   : > { %v2254_v42 = vadd.f32 %v2253_v2, %v6779_v1  ;;  %3696 = vmatprep.mubr.bf16.mxu0 %v6699_v5  ;;  %v2343_v30 = vadd.f32 %v2342_v36, %v6782_v40  ;;  %3749 = vmatprep.mubr.bf16.mxu1 %v6699_v5  ;;  %v3163_v35 = vadd.f32 %v5878_v44, %v2252_v4 }
 0x1b5   : > { %v2257_v7 = vpop.f32.mrf.mxu0  ;;  %v2346_v17 = vpop.f32.mrf.mxu1  ;;  %v3165_v19 = vadd.f32 %v5878_v44, %v2341_v37  ;;  %v3262_v0 = vmax.f32 %v3134_v11, 0.0  ;;  %v3259_v28 = vmax.f32 %v3131_v49, 0.0  ;;  %v3261_v4 = vmax.f32 %v3133_v58, 0.0 }
 0x1b6   : > { %v2258_v13 = vadd.f32 %v2257_v7, %v6786_v31  ;;  %3679 = vmatpush1.bf16.msra.mxu0 %v3351_v43  ;;  %v2347_v6 = vadd.f32 %v2346_v17, %v6789_v18  ;;  %3732 = vmatpush1.bf16.msra.mxu1 %v3353_v54  ;;  %v3164_v15 = vadd.f32 %v5878_v44, %v2254_v42  ;;  %v3260_v43 = vmax.f32 %v3132_v56, 0.0  ;;  %v6796_v56 = vld [vmem:[#allocation32_spill] sm:$0xff] }
 0x1b7   : > { %v2259_v23 = vpop.f32.mrf.mxu0  ;;  %v2348_v24 = vpop.f32.mrf.mxu1  ;;  %v3166_v32 = vadd.f32 %v5878_v44, %v2343_v30  ;;  %v3291_v33 = vmax.f32 %v3163_v35, 0.0  ;;  %v3228_v7 = vmax.f32 %v3100_v57, 0.0  ;;  %v3293_v50 = vmax.f32 %v3165_v19, 0.0  ;;  %v6799_v35 = vld [vmem:[#allocation34_spill] sm:$0xff]  ;;  %v6801_v19 = vld [vmem:[#allocation39_spill] sm:$0xff] }
 0x1b8   : > { %v3195_v12 = vadd.f32 %v5896_v51, %v2258_v13  ;;  %v2260_v20 = vadd.f32 %v2259_v23, %v6791_v53  ;;  %v3197_v29 = vadd.f32 %v5896_v51, %v2347_v6  ;;  %v2349_v38 = vadd.f32 %v2348_v24, %v6792_v21  ;;  %v6794_v23 = vld [vmem:[#allocation33_spill] sm:$0xff] }
 0x1b9   : > { %4849 = vmatmul.mubr.msk.bf16.vlgmr.msra.gmra.mxu0 %vm3445_vm5, %v5927_v39  ;;  %v2417_v41 = vpop.f32.mrf.mxu0  ;;  %4851 = vmatmul.mubr.msk.bf16.vlgmr.msra.gmra.mxu1 %vm3445_vm5, %v5927_v39  ;;  %v2506_v63 = vpop.f32.mrf.mxu1  ;;  %v3292_v62 = vmax.f32 %v3164_v15, 0.0  ;;  %v3294_v54 = vmax.f32 %v3166_v32, 0.0  ;;  %v3356_v10 = vpack.c.bf16 %v3260_v43, %v3228_v7  ;;  %v3227_v57 = vmax.f32 %v6029_v16, 0.0  ;;  %v6795_v53 = vld [vmem:[#allocation41_spill] sm:$0xff]  ;;  %v6804_v43 = vld [vmem:[#allocation40_spill] sm:$0xff] }
 0x1ba   : > { %v3196_v45 = vadd.f32 %v5896_v51, %v2260_v20  ;;  %3706 = vmatprep.mubr.bf16.mxu0 %v6699_v5  ;;  %v3198_v48 = vadd.f32 %v5896_v51, %v2349_v38  ;;  %3759 = vmatprep.mubr.bf16.mxu1 %v6699_v5  ;;  %v3323_v59 = vmax.f32 %v3195_v12, 0.0  ;;  %v3325_v1 = vmax.f32 %v3197_v29, 0.0  ;;  %v6797_v29 = vld [vmem:[#allocation37_spill] sm:$0xff]  ;;  %v6798_v38 = vld [vmem:[#allocation42_spill] sm:$0xff] }
 0x1bb   : > { %v2419_v52 = vpop.f32.mrf.mxu0  ;;  %v2508_v2 = vpop.f32.mrf.mxu1  ;;  %v2418_v46 = vadd.f32 %v2417_v41, %v6793_v27  ;;  %v3229_v37 = vmax.f32 %v3101_v3, 0.0  ;;  %v3358_v6 = vpack.c.bf16 %v3262_v0, %v3230_v14  ;;  %v3355_v15 = vpack.c.bf16 %v3259_v28, %v3227_v57  ;;  %v6806_v0 = vld [vmem:[#allocation36_spill] sm:$0xff]  ;;  %v6807_v7 = vld [vmem:[#allocation45_spill] sm:$0xff]  ;;  %v6808_v28 = vld [vmem:[#allocation46_spill] sm:$0xff] }
 0x1bc   : > { %v3324_v55 = vmax.f32 %v3196_v45, 0.0  ;;  %v3326_v42 = vmax.f32 %v3198_v48, 0.0  ;;  %v3387_v31 = vpack.c.bf16 %v3323_v59, %v3291_v33  ;;  %v3389_v17 = vpack.c.bf16 %v3325_v1, %v3293_v50  ;;  %v6805_v1 = vld [vmem:[#allocation44_spill] sm:$0xff] }
 0x1bd   : > { %v2423_v36 = vpop.f32.mrf.mxu0  ;;  %v2512_v40 = vpop.f32.mrf.mxu1  ;;  %v2420_v60 = vadd.f32 %v2419_v52, %v6794_v23  ;;  %v3357_v12 = vpack.c.bf16 %v3261_v4, %v3229_v37  ;;  %v6076_v16 = vadd.f32 %v5876_v34, %v2418_v46  ;;  %v2507_v32 = vadd.f32 %v2506_v63, %v6796_v56  ;;  %v6802_v52 = vld [vmem:[#allocation43_spill] sm:$0xff] }
 0x1be   : > { %v3388_v30 = vpack.c.bf16 %v3324_v55, %v3292_v62  ;;  %v3390_v61 = vpack.c.bf16 %v3326_v42, %v3294_v54  ;;  %v2509_v45 = vadd.f32 %v2508_v2, %v6799_v35  ;;  %v6803_v63 = vld [vmem:[#allocation35_spill] sm:$0xff]  ;;  %v2513_v2 = vadd.f32 %v2512_v40, %v6806_v0 }
 0x1bf   : > { %v2425_v25 = vpop.f32.mrf.mxu0  ;;  %v2514_v13 = vpop.f32.mrf.mxu1  ;;  %v3104_v59 = vadd.f32 %v5876_v34, %v2420_v60  ;;  %v2424_v55 = vadd.f32 %v2423_v36, %v6803_v63  ;;  %v3105_v56 = vadd.f32 %v5876_v34, %v2507_v32  ;;  %v6809_v63 = vld [vmem:[#allocation47_spill] sm:$0xff] }
 0x1c0   : > { %3782 = vmatprep.subr.bf16.mxu0 %v3388_v30  ;;  %3835 = vmatprep.subr.bf16.mxu1 %v3390_v61  ;;  %v2426_v21 = vadd.f32 %v2425_v25, %v6797_v29  ;;  %v2515_v49 = vadd.f32 %v2514_v13, %v6800_v22  ;;  %v3106_v46 = vadd.f32 %v5876_v34, %v2509_v45 }
 0x1c1   : > { %4850 = vmatmul.mubr.msk.bf16.gmra.mxu0 %vm3445_vm5, %v5966_v47  ;;  %v2429_v8 = vpop.f32.mrf.mxu0  ;;  %4852 = vmatmul.mubr.msk.bf16.gmra.mxu1 %vm3445_vm5, %v5966_v47  ;;  %v2518_v18 = vpop.f32.mrf.mxu1 }
 0x1c2   : > { %3783 = vmatpush1.bf16.msra.mxu0 %v3387_v31  ;;  %3836 = vmatpush1.bf16.msra.mxu1 %v3389_v17  ;;  %v2430_v48 = vadd.f32 %v2429_v8, %v6801_v19  ;;  %v2519_v54 = vadd.f32 %v2518_v18, %v6804_v43  ;;  %v3136_v61 = vadd.f32 %v5889_v26, %v2426_v21 }
 0x1c3   : > { %3784 = vmatprep.subr.bf16.mxu0 %v3356_v10  ;;  %v2431_v9 = vpop.f32.mrf.mxu0  ;;  %3837 = vmatprep.subr.bf16.mxu1 %v3358_v6  ;;  %v2520_v24 = vpop.f32.mrf.mxu1  ;;  %v3138_v40 = vadd.f32 %v5889_v26, %v2515_v49  ;;  %v3135_v8 = vadd.f32 %v5889_v26, %v2424_v55  ;;  %v3137_v18 = vadd.f32 %v5889_v26, %v2513_v2  ;;  %v3234_v49 = vmax.f32 %v3106_v46, 0.0  ;;  %v6816_v46 = vld [vmem:[#allocation54_spill] sm:$0xff] }
 0x1c4   : > { %v2432_v20 = vadd.f32 %v2431_v9, %v6795_v53  ;;  %3802 = vmatprep.mubr.bf16.mxu0 %v6699_v5  ;;  %v2521_v41 = vadd.f32 %v2520_v24, %v6798_v38  ;;  %3855 = vmatprep.mubr.bf16.mxu1 %v6699_v5  ;;  %v3167_v13 = vadd.f32 %v5878_v44, %v2430_v48 }
 0x1c5   : > { %v2435_v11 = vpop.f32.mrf.mxu0  ;;  %v2524_v62 = vpop.f32.mrf.mxu1  ;;  %v3169_v10 = vadd.f32 %v5878_v44, %v2519_v54  ;;  %v3266_v29 = vmax.f32 %v3138_v40, 0.0  ;;  %v3263_v19 = vmax.f32 %v3135_v8, 0.0  ;;  %v3265_v48 = vmax.f32 %v3137_v18, 0.0 }
 0x1c6   : > { %v2436_v58 = vadd.f32 %v2435_v11, %v6802_v52  ;;  %3785 = vmatpush1.bf16.msra.mxu0 %v3355_v15  ;;  %v2525_v42 = vadd.f32 %v2524_v62, %v6805_v1  ;;  %3838 = vmatpush1.bf16.msra.mxu1 %v3357_v12  ;;  %v3168_v33 = vadd.f32 %v5878_v44, %v2432_v20  ;;  %v3264_v15 = vmax.f32 %v3136_v61, 0.0  ;;  %v6812_v61 = vld [vmem:[#allocation48_spill] sm:$0xff] }
 0x1c7   : > { %v2437_v3 = vpop.f32.mrf.mxu0  ;;  %v2526_v25 = vpop.f32.mrf.mxu1  ;;  %v3170_v14 = vadd.f32 %v5878_v44, %v2521_v41  ;;  %v3295_v21 = vmax.f32 %v3167_v13, 0.0  ;;  %v3232_v11 = vmax.f32 %v3104_v59, 0.0  ;;  %v3297_v35 = vmax.f32 %v3169_v10, 0.0  ;;  %v6815_v13 = vld [vmem:[#allocation50_spill] sm:$0xff]  ;;  %v6817_v10 = vld [vmem:[#allocation55_spill] sm:$0xff] }
 0x1c8   : > { %v3199_v30 = vadd.f32 %v5896_v51, %v2436_v58  ;;  %v2438_v50 = vadd.f32 %v2437_v3, %v6807_v7  ;;  %v3201_v36 = vadd.f32 %v5896_v51, %v2525_v42  ;;  %v2527_v4 = vadd.f32 %v2526_v25, %v6808_v28  ;;  %v6810_v3 = vld [vmem:[#allocation49_spill] sm:$0xff] }
 0x1c9   : > { %4853 = vmatmul.mubr.msk.bf16.vlgmr.msra.gmra.mxu0 %vm3445_vm5, %v5927_v39  ;;  %v2595_v31 = vpop.f32.mrf.mxu0  ;;  %4855 = vmatmul.mubr.msk.bf16.vlgmr.msra.gmra.mxu1 %vm3445_vm5, %v5927_v39  ;;  %v2684_v27 = vpop.f32.mrf.mxu1  ;;  %v3296_v6 = vmax.f32 %v3168_v33, 0.0  ;;  %v3298_v12 = vmax.f32 %v3170_v14, 0.0  ;;  %v3360_v43 = vpack.c.bf16 %v3264_v15, %v3232_v11  ;;  %v3231_v59 = vmax.f32 %v6076_v16, 0.0  ;;  %v6811_v7 = vld [vmem:[#allocation57_spill] sm:$0xff]  ;;  %v6820_v15 = vld [vmem:[#allocation56_spill] sm:$0xff] }
 0x1ca   : > { %v3200_v17 = vadd.f32 %v5896_v51, %v2438_v50  ;;  %3812 = vmatprep.mubr.bf16.mxu0 %v6699_v5  ;;  %v3202_v57 = vadd.f32 %v5896_v51, %v2527_v4  ;;  %3865 = vmatprep.mubr.bf16.mxu1 %v6699_v5  ;;  %v3327_v23 = vmax.f32 %v3199_v30, 0.0  ;;  %v3329_v53 = vmax.f32 %v3201_v36, 0.0  ;;  %v6813_v36 = vld [vmem:[#allocation53_spill] sm:$0xff]  ;;  %v6814_v4 = vld [vmem:[#allocation58_spill] sm:$0xff] }
 0x1cb   : > { %v2597_v37 = vpop.f32.mrf.mxu0  ;;  %v2686_v9 = vpop.f32.mrf.mxu1  ;;  %v2596_v55 = vadd.f32 %v2595_v31, %v6809_v63  ;;  %v3233_v54 = vmax.f32 %v3105_v56, 0.0  ;;  %v3362_v42 = vpack.c.bf16 %v3266_v29, %v3234_v49  ;;  %v3359_v33 = vpack.c.bf16 %v3263_v19, %v3231_v59  ;;  %v6822_v29 = vld [vmem:[#allocation52_spill] sm:$0xff]  ;;  %v6823_v11 = vld [vmem:[#allocation61_spill] sm:$0xff]  ;;  %v6824_v19 = vld [vmem:[#allocation62_spill] sm:$0xff] }
 0x1cc   : > { %v3328_v60 = vmax.f32 %v3200_v17, 0.0  ;;  %v3330_v20 = vmax.f32 %v3202_v57, 0.0  ;;  %v3391_v52 = vpack.c.bf16 %v3327_v23, %v3295_v21  ;;  %v3393_v62 = vpack.c.bf16 %v3329_v53, %v3297_v35  ;;  %v6821_v53 = vld [vmem:[#allocation60_spill] sm:$0xff] }
 0x1cd   : > { %v2601_v24 = vpop.f32.mrf.mxu0  ;;  %v2690_v38 = vpop.f32.mrf.mxu1  ;;  %v2598_v0 = vadd.f32 %v2597_v37, %v6810_v3  ;;  %v3361_v30 = vpack.c.bf16 %v3265_v48, %v3233_v54  ;;  %v6123_v16 = vadd.f32 %v5876_v34, %v2596_v55  ;;  %v2685_v14 = vadd.f32 %v2684_v27, %v6812_v61  ;;  %v6818_v37 = vld [vmem:[#allocation59_spill] sm:$0xff] }
 0x1ce   : > { %v3392_v41 = vpack.c.bf16 %v3328_v60, %v3296_v6  ;;  %v3394_v22 = vpack.c.bf16 %v3330_v20, %v3298_v12  ;;  %v2687_v17 = vadd.f32 %v2686_v9, %v6815_v13  ;;  %v6819_v27 = vld [vmem:[#allocation51_spill] sm:$0xff]  ;;  %v2691_v9 = vadd.f32 %v2690_v38, %v6822_v29 }
 0x1cf   : > { %v2603_v45 = vpop.f32.mrf.mxu0  ;;  %v2692_v58 = vpop.f32.mrf.mxu1  ;;  %v3108_v23 = vadd.f32 %v5876_v34, %v2598_v0  ;;  %v2602_v60 = vadd.f32 %v2601_v24, %v6819_v27  ;;  %v3109_v61 = vadd.f32 %v5876_v34, %v2685_v14  ;;  %v6825_v27 = vld [vmem:[#allocation63_spill] sm:$0xff] }
 0x1d0   : > { %3888 = vmatprep.subr.bf16.mxu0 %v3392_v41  ;;  %3941 = vmatprep.subr.bf16.mxu1 %v3394_v22  ;;  %v2604_v28 = vadd.f32 %v2603_v45, %v6813_v36  ;;  %v2693_v8 = vadd.f32 %v2692_v58, %v6816_v46  ;;  %v3110_v55 = vadd.f32 %v5876_v34, %v2687_v17 }
 0x1d1   : > { %4854 = vmatmul.mubr.msk.bf16.gmra.mxu0 %vm3445_vm5, %v5966_v47  ;;  %v2607_v32 = vpop.f32.mrf.mxu0  ;;  %4856 = vmatmul.mubr.msk.bf16.gmra.mxu1 %vm3445_vm5, %v5966_v47  ;;  %v2696_v1 = vpop.f32.mrf.mxu1 }
 0x1d2   : > { %3889 = vmatpush1.bf16.msra.mxu0 %v3391_v52  ;;  %3942 = vmatpush1.bf16.msra.mxu1 %v3393_v62  ;;  %v2608_v57 = vadd.f32 %v2607_v32, %v6817_v10  ;;  %v2697_v12 = vadd.f32 %v2696_v1, %v6820_v15  ;;  %v3140_v22 = vadd.f32 %v5889_v26, %v2604_v28 }
 0x1d3   : > { %3890 = vmatprep.subr.bf16.mxu0 %v3360_v43  ;;  %v2609_v2 = vpop.f32.mrf.mxu0  ;;  %3943 = vmatprep.subr.bf16.mxu1 %v3362_v42  ;;  %v2698_v25 = vpop.f32.mrf.mxu1  ;;  %v3142_v38 = vadd.f32 %v5889_v26, %v2693_v8  ;;  %v3139_v32 = vadd.f32 %v5889_v26, %v2602_v60  ;;  %v3141_v1 = vadd.f32 %v5889_v26, %v2691_v9  ;;  %v3238_v8 = vmax.f32 %v3110_v55, 0.0  ;;  %v6832_v55 = vld [vmem:[#allocation70_spill] sm:$0xff] }
 0x1d4   : > { %v2610_v50 = vadd.f32 %v2609_v2, %v6811_v7  ;;  %3908 = vmatprep.mubr.bf16.mxu0 %v6699_v5  ;;  %v2699_v31 = vadd.f32 %v2698_v25, %v6814_v4  ;;  %3961 = vmatprep.mubr.bf16.mxu1 %v6699_v5  ;;  %v3171_v58 = vadd.f32 %v5878_v44, %v2608_v57 }
 0x1d5   : > { %v2613_v40 = vpop.f32.mrf.mxu0  ;;  %v2702_v6 = vpop.f32.mrf.mxu1  ;;  %v3173_v43 = vadd.f32 %v5878_v44, %v2697_v12  ;;  %v3270_v36 = vmax.f32 %v3142_v38, 0.0  ;;  %v3267_v10 = vmax.f32 %v3139_v32, 0.0  ;;  %v3269_v57 = vmax.f32 %v3141_v1, 0.0 }
 0x1d6   : > { %v2614_v18 = vadd.f32 %v2613_v40, %v6818_v37  ;;  %3891 = vmatpush1.bf16.msra.mxu0 %v3359_v33  ;;  %v2703_v20 = vadd.f32 %v2702_v6, %v6821_v53  ;;  %3944 = vmatpush1.bf16.msra.mxu1 %v3361_v30  ;;  %v3172_v21 = vadd.f32 %v5878_v44, %v2610_v50  ;;  %v3268_v33 = vmax.f32 %v3140_v22, 0.0  ;;  %v6828_v22 = vld [vmem:[#allocation64_spill] sm:$0xff] }
 0x1d7   : > { %v2615_v56 = vpop.f32.mrf.mxu0  ;;  %v2704_v45 = vpop.f32.mrf.mxu1  ;;  %v3174_v49 = vadd.f32 %v5878_v44, %v2699_v31  ;;  %v3299_v28 = vmax.f32 %v3171_v58, 0.0  ;;  %v3236_v40 = vmax.f32 %v3108_v23, 0.0  ;;  %v3301_v13 = vmax.f32 %v3173_v43, 0.0  ;;  %v6831_v58 = vld [vmem:[#allocation66_spill] sm:$0xff]  ;;  %v6833_v43 = vld [vmem:[#allocation71_spill] sm:$0xff] }
 0x1d8   : > { %v3203_v41 = vadd.f32 %v5896_v51, %v2614_v18  ;;  %v2616_v35 = vadd.f32 %v2615_v56, %v6823_v11  ;;  %v3205_v24 = vadd.f32 %v5896_v51, %v2703_v20  ;;  %v2705_v48 = vadd.f32 %v2704_v45, %v6824_v19  ;;  %v6826_v56 = vld [vmem:[#allocation65_spill] sm:$0xff] }
 0x1d9   : > { %4857 = vmatmul.mubr.msk.bf16.vlgmr.msra.gmra.mxu0 %vm3445_vm5, %v5927_v39  ;;  %v2773_v52 = vpop.f32.mrf.mxu0  ;;  %4859 = vmatmul.mubr.msk.bf16.vlgmr.msra.gmra.mxu1 %vm3445_vm5, %v5927_v39  ;;  %v2862_v63 = vpop.f32.mrf.mxu1  ;;  %v3300_v42 = vmax.f32 %v3172_v21, 0.0  ;;  %v3302_v30 = vmax.f32 %v3174_v49, 0.0  ;;  %v3364_v15 = vpack.c.bf16 %v3268_v33, %v3236_v40  ;;  %v3235_v23 = vmax.f32 %v6123_v16, 0.0  ;;  %v6827_v11 = vld [vmem:[#allocation73_spill] sm:$0xff]  ;;  %v6836_v33 = vld [vmem:[#allocation72_spill] sm:$0xff] }
 0x1da   : > { %v3204_v62 = vadd.f32 %v5896_v51, %v2616_v35  ;;  %3918 = vmatprep.mubr.bf16.mxu0 %v6699_v5  ;;  %v3206_v59 = vadd.f32 %v5896_v51, %v2705_v48  ;;  %3971 = vmatprep.mubr.bf16.mxu1 %v6699_v5  ;;  %v3331_v3 = vmax.f32 %v3203_v41, 0.0  ;;  %v3333_v7 = vmax.f32 %v3205_v24, 0.0  ;;  %v6829_v24 = vld [vmem:[#allocation69_spill] sm:$0xff]  ;;  %v6830_v48 = vld [vmem:[#allocation74_spill] sm:$0xff] }
 0x1db   : > { %v2775_v54 = vpop.f32.mrf.mxu0  ;;  %v2864_v2 = vpop.f32.mrf.mxu1  ;;  %v2774_v60 = vadd.f32 %v2773_v52, %v6825_v27  ;;  %v3237_v12 = vmax.f32 %v3109_v61, 0.0  ;;  %v3366_v20 = vpack.c.bf16 %v3270_v36, %v3238_v8  ;;  %v3363_v21 = vpack.c.bf16 %v3267_v10, %v3235_v23  ;;  %v6838_v36 = vld [vmem:[#allocation68_spill] sm:$0xff]  ;;  %v6839_v40 = vld [vmem:[#allocation77_spill] sm:$0xff]  ;;  %v6840_v10 = vld [vmem:[#allocation78_spill] sm:$0xff] }
 0x1dc   : > { %v3332_v0 = vmax.f32 %v3204_v62, 0.0  ;;  %v3334_v50 = vmax.f32 %v3206_v59, 0.0  ;;  %v3395_v37 = vpack.c.bf16 %v3331_v3, %v3299_v28  ;;  %v3397_v6 = vpack.c.bf16 %v3333_v7, %v3301_v13  ;;  %v6837_v7 = vld [vmem:[#allocation76_spill] sm:$0xff] }
 0x1dd   : > { %v2779_v25 = vpop.f32.mrf.mxu0  ;;  %v2868_v4 = vpop.f32.mrf.mxu1  ;;  %v2776_v29 = vadd.f32 %v2775_v54, %v6826_v56  ;;  %v3365_v41 = vpack.c.bf16 %v3269_v57, %v3237_v12  ;;  %v6170_v16 = vadd.f32 %v5876_v34, %v2774_v60  ;;  %v2863_v49 = vadd.f32 %v2862_v63, %v6828_v22  ;;  %v6834_v54 = vld [vmem:[#allocation75_spill] sm:$0xff] }
 0x1de   : > { %v3396_v31 = vpack.c.bf16 %v3332_v0, %v3300_v42  ;;  %v3398_v46 = vpack.c.bf16 %v3334_v50, %v3302_v30  ;;  %v2865_v62 = vadd.f32 %v2864_v2, %v6831_v58  ;;  %v6835_v63 = vld [vmem:[#allocation67_spill] sm:$0xff]  ;;  %v2869_v2 = vadd.f32 %v2868_v4, %v6838_v36 }
 0x1df   : > { %v2781_v17 = vpop.f32.mrf.mxu0  ;;  %v2870_v18 = vpop.f32.mrf.mxu1  ;;  %v3112_v3 = vadd.f32 %v5876_v34, %v2776_v29  ;;  %v2780_v0 = vadd.f32 %v2779_v25, %v6835_v63  ;;  %v3239_v63 = vmax.f32 %v6170_v16, 0.0  ;;  %v6843_v16 = vld [vmem:[#allocation79_spill] sm:$0xff] }
 0x1e0   : > { %3994 = vmatprep.subr.bf16.mxu0 %v3396_v31  ;;  %4047 = vmatprep.subr.bf16.mxu1 %v3398_v46  ;;  %v2782_v19 = vadd.f32 %v2781_v17, %v6829_v24  ;;  %v2871_v32 = vadd.f32 %v2870_v18, %v6832_v55  ;;  %v3114_v60 = vadd.f32 %v5876_v34, %v2865_v62 }
 0x1e1   : > { %4858 = vmatmul.mubr.msk.bf16.gmra.mxu0 %vm3445_vm5, %v5966_v47  ;;  %v2785_v14 = vpop.f32.mrf.mxu0  ;;  %4860 = vmatmul.mubr.msk.bf16.gmra.mxu1 %vm3445_vm5, %v5966_v47  ;;  %v2874_v53 = vpop.f32.mrf.mxu1 }
 0x1e2   : > { %3995 = vmatpush1.bf16.msra.mxu0 %v3395_v37  ;;  %4048 = vmatpush1.bf16.msra.mxu1 %v3397_v6  ;;  %v2786_v59 = vadd.f32 %v2785_v14, %v6833_v43  ;;  %v2875_v30 = vadd.f32 %v2874_v53, %v6836_v33  ;;  %v3144_v46 = vadd.f32 %v5889_v26, %v2782_v19  ;;  %v3242_v55 = vmax.f32 %v3114_v60, 0.0  ;;  %v6849_v60 = vld [vmem:[#allocation87_spill] sm:$0xff] }
 0x1e3   : > { %3996 = vmatprep.subr.bf16.mxu0 %v3364_v15  ;;  %v2787_v9 = vpop.f32.mrf.mxu0  ;;  %4049 = vmatprep.subr.bf16.mxu1 %v3366_v20  ;;  %v2876_v45 = vpop.f32.mrf.mxu1  ;;  %v3146_v4 = vadd.f32 %v5889_v26, %v2871_v32  ;;  %v3143_v14 = vadd.f32 %v5889_v26, %v2780_v0  ;;  %v3145_v53 = vadd.f32 %v5889_v26, %v2869_v2  ;;  %v6842_v2 = vld [vmem:[#allocation89_spill] sm:$0xff] }
 0x1e4   : > { %v2788_v35 = vadd.f32 %v2787_v9, %v6827_v11  ;;  %4014 = vmatprep.mubr.bf16.mxu0 %v6699_v5  ;;  %v2877_v52 = vadd.f32 %v2876_v45, %v6830_v48  ;;  %4067 = vmatprep.mubr.bf16.mxu1 %v6699_v5  ;;  %v3175_v18 = vadd.f32 %v5878_v44, %v2786_v59  ;;  %v3272_v9 = vmax.f32 %v3144_v46, 0.0 }
 0x1e5   : > { %v2791_v38 = vpop.f32.mrf.mxu0  ;;  %v2880_v42 = vpop.f32.mrf.mxu1  ;;  %v3177_v15 = vadd.f32 %v5878_v44, %v2875_v30  ;;  %v3113_v45 = vadd.f32 %v5876_v34, %v2863_v49  ;;  %v3274_v22 = vmax.f32 %v3146_v4, 0.0  ;;  %v3271_v32 = vmax.f32 %v3143_v14, 0.0  ;;  %v6841_v30 = vld [vmem:[#allocation81_spill] sm:$0xff] }
 0x1e6   : > { %v2792_v1 = vadd.f32 %v2791_v38, %v6834_v54  ;;  %3997 = vmatpush1.bf16.msra.mxu0 %v3363_v21  ;;  %v2881_v50 = vadd.f32 %v2880_v42, %v6837_v7  ;;  %4050 = vmatpush1.bf16.msra.mxu1 %v3365_v41  ;;  %v3176_v28 = vadd.f32 %v5878_v44, %v2788_v35  ;;  %v3303_v24 = vmax.f32 %v3175_v18, 0.0  ;;  %v6848_v18 = vld [vmem:[#allocation86_spill] sm:$0xff] }
 0x1e7   : > { %v2793_v61 = vpop.f32.mrf.mxu0  ;;  %v2882_v17 = vpop.f32.mrf.mxu1  ;;  %v3178_v8 = vadd.f32 %v5878_v44, %v2877_v52  ;;  %v3240_v52 = vmax.f32 %v3112_v3, 0.0  ;;  %v3305_v38 = vmax.f32 %v3177_v15, 0.0  ;;  %v3273_v43 = vmax.f32 %v3145_v53, 0.0  ;;  %v6850_v15 = vld [vmem:[#allocation91_spill] sm:$0xff] }
 0x1e8   : > { %v3207_v31 = vadd.f32 %v5896_v51, %v2792_v1  ;;  %v2794_v13 = vadd.f32 %v2793_v61, %v6839_v40  ;;  %v3209_v25 = vadd.f32 %v5896_v51, %v2881_v50  ;;  %v2883_v57 = vadd.f32 %v2882_v17, %v6840_v10  ;;  %v6845_v17 = vld [vmem:[#allocation85_spill] sm:$0xff] }
 0x1e9   : > { %4861 = vmatmul.mubr.msk.bf16.vlgmr.msra.gmra.mxu0 %vm3445_vm5, %v5927_v39  ;;  %v2951_v37 = vpop.f32.mrf.mxu0  ;;  %4863 = vmatmul.mubr.msk.bf16.vlgmr.msra.gmra.mxu1 %vm3445_vm5, %v5927_v39  ;;  %v3040_v27 = vpop.f32.mrf.mxu1  ;;  %v3304_v20 = vmax.f32 %v3176_v28, 0.0  ;;  %v3306_v21 = vmax.f32 %v3178_v8, 0.0  ;;  %v3368_v42 = vpack.c.bf16 %v3272_v9, %v3240_v52  ;;  %v3241_v0 = vmax.f32 %v3113_v45, 0.0  ;;  %v6846_v8 = vld [vmem:[#allocation90_spill] sm:$0xff] }
 0x1ea   : > { %v3208_v6 = vadd.f32 %v5896_v51, %v2794_v13  ;;  %4024 = vmatprep.mubr.bf16.mxu0 %v6699_v5  ;;  %v3210_v23 = vadd.f32 %v5896_v51, %v2883_v57  ;;  %4077 = vmatprep.mubr.bf16.mxu1 %v6699_v5  ;;  %v3335_v56 = vmax.f32 %v3207_v31, 0.0  ;;  %v3337_v41 = vmax.f32 %v3209_v25, 0.0  ;;  %v6844_v13 = vld [vmem:[#allocation80_spill] sm:$0xff]  ;;  %v6847_v57 = vld [vmem:[#allocation82_spill] sm:$0xff] }
 0x1eb   : > { %v2953_v12 = vpop.f32.mrf.mxu0  ;;  %v3042_v39 = vpop.f32.mrf.mxu1  ;;  %v3370_v33 = vpack.c.bf16 %v3274_v22, %v3242_v55  ;;  %v3367_v61 = vpack.c.bf16 %v3271_v32, %v3239_v63  ;;  %v3369_v36 = vpack.c.bf16 %v3273_v43, %v3241_v0  ;;  %v2952_v40 = vadd.f32 %v2951_v37, %v6843_v16  ;;  %v6855_v22 = vld [vmem:[#allocation93_spill] sm:$0xff]  ;;  %v4929_v55 = vld [vmem:[%s6668_s5] sm:$0xff]  }
 0x1ec   : > { %v3336_v29 = vmax.f32 %v3208_v6, 0.0  ;;  %v3338_v11 = vmax.f32 %v3210_v23, 0.0  ;;  %v3399_v59 = vpack.c.bf16 %v3335_v56, %v3303_v24  ;;  %v3401_v1 = vpack.c.bf16 %v3337_v41, %v3305_v38  ;;  %v6854_v41 = vld [vmem:[#allocation84_spill] sm:$0xff] }
 0x1ed   : > { %v2957_v35 = vpop.f32.mrf.mxu0  ;;  %v3046_v19 = vpop.f32.mrf.mxu1  ;;  %v2954_v7 = vadd.f32 %v2953_v12, %v6841_v30  ;;  %v3043_v4 = vadd.f32 %v3042_v39, %v6847_v57 }
 0x1ee   : > { %v3400_v48 = vpack.c.bf16 %v3336_v29, %v3304_v20  ;;  %v3402_v62 = vpack.c.bf16 %v3338_v11, %v3306_v21  ;;  %v6852_v20 = vld [vmem:[#allocation88_spill] sm:$0xff]  ;;  %v3047_v39 = vadd.f32 %v3046_v19, %v6854_v41 }
 0x1ef   : > { %v2959_v58 = vpop.f32.mrf.mxu0  ;;  %v3048_v54 = vpop.f32.mrf.mxu1  ;;  %v3116_v37 = vadd.f32 %v5876_v34, %v2954_v7  ;;  %v6853_v29 = vld [vmem:[#allocation92_spill] sm:$0xff] }
 0x1f0   : > { %4100 = vmatprep.subr.bf16.mxu0 %v3400_v48  ;;  %4153 = vmatprep.subr.bf16.mxu1 %v3402_v62  ;;  %v2960_v46 = vadd.f32 %v2959_v58, %v6845_v17  ;;  %v3049_v6 = vadd.f32 %v3048_v54, %v6848_v18  ;;  %v6856_v58 = vld [vmem:[#allocation94_spill] sm:$0xff]  ;;  %v6266_v18 = vpop.permute.xlu0 %3417 }
 0x1f1   : > { %4862 = vmatmul.mubr.msk.bf16.gmra.mxu0 %vm3445_vm5, %v5966_v47  ;;  %v2963_v49 = vpop.f32.mrf.mxu0  ;;  %4864 = vmatmul.mubr.msk.bf16.gmra.mxu1 %vm3445_vm5, %v5966_v47  ;;  %v3052_v3 = vpop.f32.mrf.mxu1  ;;  %v3041_v47 = vadd.f32 %v3040_v27, %v6844_v13  ;;  %v6851_v27 = vld [vmem:[#allocation83_spill] sm:$0xff] }
 0x1f2   : > { %4101 = vmatpush1.bf16.msra.mxu0 %v3399_v59  ;;  %4154 = vmatpush1.bf16.msra.mxu1 %v3401_v1  ;;  %v2964_v14 = vadd.f32 %v2963_v49, %v6849_v60  ;;  %v2958_v53 = vadd.f32 %v2957_v35, %v6851_v27  ;;  %v3053_v56 = vadd.f32 %v3052_v3, %v6852_v20 }
 0x1f3   : > { %4102 = vmatprep.subr.bf16.mxu0 %v3368_v42  ;;  %v2965_v50 = vpop.f32.mrf.mxu0  ;;  %4155 = vmatprep.subr.bf16.mxu1 %v3370_v33  ;;  %v3054_v31 = vpop.f32.mrf.mxu1  ;;  %v3148_v52 = vadd.f32 %v5889_v26, %v2960_v46  ;;  %v3150_v19 = vadd.f32 %v5889_v26, %v3049_v6  ;;  %v3118_v59 = vadd.f32 %v5876_v34, %v3043_v4 }
 0x1f4   : > { %v2966_v28 = vadd.f32 %v2965_v50, %v6842_v2  ;;  %4120 = vmatprep.mubr.bf16.mxu0 %v6699_v5  ;;  %v3055_v25 = vadd.f32 %v3054_v31, %v6846_v8  ;;  %4173 = vmatprep.mubr.bf16.mxu1 %v6699_v5  ;;  %v3179_v32 = vadd.f32 %v5878_v44, %v2964_v14  ;;  %v3244_v31 = vmax.f32 %v3116_v37, 0.0 }
 0x1f5   : > { %v2969_v10 = vpop.f32.mrf.mxu0  ;;  %v3058_v12 = vpop.f32.mrf.mxu1  ;;  %v3147_v54 = vadd.f32 %v5889_v26, %v2958_v53  ;;  %v3181_v1 = vadd.f32 %v5878_v44, %v3053_v56  ;;  %v3149_v42 = vadd.f32 %v5889_v26, %v3047_v39  ;;  %v3276_v33 = vmax.f32 %v3148_v52, 0.0 }
 0x1f6   : > { %v2970_v23 = vadd.f32 %v2969_v10, %v6850_v15  ;;  %4103 = vmatpush1.bf16.msra.mxu0 %v3367_v61  ;;  %v3059_v9 = vadd.f32 %v3058_v12, %v6853_v29  ;;  %4156 = vmatpush1.bf16.msra.mxu1 %v3369_v36  ;;  %v3180_v11 = vadd.f32 %v5878_v44, %v2966_v28  ;;  %v3278_v36 = vmax.f32 %v3150_v19, 0.0  ;;  %v6271_v53 = vpop.permute.xlu1 %3422  ;;  %v6279_v52 = vpop.permute.xlu0 %3427 }
 0x1f7   : > { %v2971_v21 = vpop.f32.mrf.mxu0  ;;  %v3060_v48 = vpop.f32.mrf.mxu1  ;;  %v3182_v38 = vadd.f32 %v5878_v44, %v3055_v25  ;;  %v3115_v61 = vadd.f32 %v5876_v34, %v2952_v40  ;;  %v3307_v2 = vmax.f32 %v3179_v32, 0.0  ;;  %v3117_v44 = vadd.f32 %v5876_v34, %v3041_v47  ;;  %v4930_v25 = vld [vmem:[%s6668_s5 + $0x8] sm:$0xff]  }
 0x1f8   : > { %v3211_v45 = vadd.f32 %v5896_v51, %v2970_v23  ;;  %v2972_v24 = vadd.f32 %v2971_v21, %v6855_v22  ;;  %v3213_v35 = vadd.f32 %v5896_v51, %v3059_v9  ;;  %v3061_v62 = vadd.f32 %v3060_v48, %v6856_v58 }
 0x1f9   : > { %4865 = vmatmul.mubr.msk.bf16.vlgmr.msra.gmra.mxu0 %vm3445_vm5, %v4929_v55  ;;  %4867 = vmatmul.mubr.msk.bf16.vlgmr.msra.gmra.mxu1 %vm3445_vm5, %v4929_v55  ;;  %v3308_v63 = vmax.f32 %v3180_v11, 0.0  ;;  %v3310_v30 = vmax.f32 %v3182_v38, 0.0  ;;  %v3246_v13 = vmax.f32 %v3118_v59, 0.0  ;;  %v3275_v17 = vmax.f32 %v3147_v54, 0.0 }
 0x1fa   : > { %v3212_v43 = vadd.f32 %v5896_v51, %v2972_v24  ;;  %4130 = vmatprep.mubr.bf16.mxu0 %v6699_v5  ;;  %v3214_v49 = vadd.f32 %v5896_v51, %v3061_v62  ;;  %4183 = vmatprep.mubr.bf16.mxu1 %v6699_v5  ;;  %v3339_v0 = vmax.f32 %v3211_v45, 0.0  ;;  %v3341_v7 = vmax.f32 %v3213_v35, 0.0 }
 0x1fb   : > { %v3309_v51 = vmax.f32 %v3181_v1, 0.0  ;;  %v3277_v46 = vmax.f32 %v3149_v42, 0.0  ;;  %v3372_v40 = vpack.c.bf16 %v3276_v33, %v3244_v31  ;;  %v3243_v10 = vmax.f32 %v3115_v61, 0.0 }
 0x1fc   : > { %v3340_v3 = vmax.f32 %v3212_v43, 0.0  ;;  %v3342_v50 = vmax.f32 %v3214_v49, 0.0  ;;  %v3403_v26 = vpack.c.bf16 %v3339_v0, %v3307_v2  ;;  %v3374_v34 = vpack.c.bf16 %v3278_v36, %v3246_v13  ;;  %v6289_v0 = vpop.permute.xlu1 %3432 }
 0x1fd   : > { %v3405_v8 = vpack.c.bf16 %v3341_v7, %v3309_v51  ;;  %v3245_v47 = vmax.f32 %v3117_v44, 0.0  ;;  %v3371_v57 = vpack.c.bf16 %v3275_v17, %v3243_v10 }
 0x1fe   : > { %v3404_v28 = vpack.c.bf16 %v3340_v3, %v3308_v63  ;;  %v3406_v16 = vpack.c.bf16 %v3342_v50, %v3310_v30 }
 0x1ff   : > { %v3373_v4 = vpack.c.bf16 %v3277_v46, %v3245_v47 }
 0x200   : > { %4206 = vmatprep.subr.bf16.mxu0 %v3404_v28  ;;  %4259 = vmatprep.subr.bf16.mxu1 %v3406_v16 }
 0x201   : > { %4866 = vmatmul.mubr.msk.bf16.gmra.mxu0 %vm3445_vm5, %v4930_v25  ;;  %4868 = vmatmul.mubr.msk.bf16.gmra.mxu1 %vm3445_vm5, %v4930_v25 }
 0x202   : > { %4207 = vmatpush1.bf16.msra.mxu0 %v3403_v26  ;;  %4260 = vmatpush1.bf16.msra.mxu1 %v3405_v8 }
 0x203   : > { %4208 = vmatprep.subr.bf16.mxu0 %v3372_v40  ;;  %4261 = vmatprep.subr.bf16.mxu1 %v3374_v34 }
 0x204   : > { %4226 = vmatprep.mubr.bf16.mxu0 %v6699_v5  ;;  %4279 = vmatprep.mubr.bf16.mxu1 %v6699_v5 }
 0x206   : > { %4209 = vmatpush1.bf16.msra.mxu0 %v3371_v57  ;;  %4262 = vmatpush1.bf16.msra.mxu1 %v3373_v4 }
 0x209   : > { %4869 = vmatmul.mubr.msk.bf16.vlgmr.msra.gmra.mxu0 %vm3445_vm5, %v4929_v55  ;;  %4871 = vmatmul.mubr.msk.bf16.vlgmr.msra.gmra.mxu1 %vm3445_vm5, %v4929_v55 }
 0x20a   : > { %4236 = vmatprep.mubr.bf16.mxu0 %v6699_v5  ;;  %4289 = vmatprep.mubr.bf16.mxu1 %v6699_v5 }
 0x211   : > { %4870 = vmatmul.mubr.msk.bf16.gmra.mxu0 %vm3445_vm5, %v4930_v25  ;;  %4872 = vmatmul.mubr.msk.bf16.gmra.mxu1 %vm3445_vm5, %v4930_v25 }
 0x258   : > { %v3486_v6 = vpop.f32.mrf.mxu0 }
 0x259   : > { %v3487_v60 = vadd.f32 %v3486_v6, %v6266_v18  ;;  %v3539_v14 = vpop.f32.mrf.mxu1 }
 0x25a   : > { %v3540_v15 = vadd.f32 %v3539_v14, %v6266_v18  ;;  %v3488_v23 = vpop.f32.mrf.mxu0 }
 0x25b   : > { %v4300_v12 = vmax.f32 %v3487_v60, 0.0  ;;  %v3489_v37 = vadd.f32 %v3488_v23, %v6266_v18  ;;  %v3541_v27 = vpop.f32.mrf.mxu1 }
 0x25c   : > { %v4302_v5 = vmax.f32 %v3540_v15, 0.0  ;;  %v3542_v20 = vadd.f32 %v3541_v27, %v6266_v18  ;;  %v3490_v56 = vpop.f32.mrf.mxu0 }
 0x25d   : > { %v4301_v29 = vmax.f32 %v3489_v37, 0.0  ;;  %v3491_v9 = vadd.f32 %v3490_v56, %v6271_v53  ;;  %v3543_v21 = vpop.f32.mrf.mxu1 }
 0x25e   : > { %v6275_v41 = vmax.f32 %v4300_v12, %v4302_v5  ;;  %v4303_v39 = vmax.f32 %v3542_v20, 0.0  ;;  %v3544_v11 = vadd.f32 %v3543_v21, %v6271_v53  ;;  %v3492_v45 = vpop.f32.mrf.mxu0 }
 0x25f   : > { %v4332_v22 = vmax.f32 %v3491_v9, 0.0  ;;  %v3493_v24 = vadd.f32 %v3492_v45, %v6271_v53  ;;  %v3545_v48 = vpop.f32.mrf.mxu1 }
 0x260   : > { %v6281_v38 = vmax.f32 %v4301_v29, %v4303_v39  ;;  %v4334_v35 = vmax.f32 %v3544_v11, 0.0  ;;  %v3546_v58 = vadd.f32 %v3545_v48, %v6271_v53  ;;  %v3496_v62 = vpop.f32.mrf.mxu0 }
 0x261   : > { %v4333_v55 = vmax.f32 %v3493_v24, 0.0  ;;  %v3497_v19 = vadd.f32 %v3496_v62, %v6279_v52  ;;  %v3549_v32 = vpop.f32.mrf.mxu1 }
 0x262   : > { %v6285_v43 = vmax.f32 %v4332_v22, %v4334_v35  ;;  %v4335_v59 = vmax.f32 %v3546_v58, 0.0  ;;  %v3550_v54 = vadd.f32 %v3549_v32, %v6279_v52  ;;  %v3498_v1 = vpop.f32.mrf.mxu0 }
 0x263   : > { %v4364_v49 = vmax.f32 %v3497_v19, 0.0  ;;  %v3499_v42 = vadd.f32 %v3498_v1, %v6279_v52  ;;  %v3551_v63 = vpop.f32.mrf.mxu1 }
 0x264   : > { %v6291_v3 = vmax.f32 %v4333_v55, %v4335_v59  ;;  %v4366_v33 = vmax.f32 %v3550_v54, 0.0  ;;  %v3552_v30 = vadd.f32 %v3551_v63, %v6279_v52  ;;  %v3500_v7 = vpop.f32.mrf.mxu0 }
 0x265   : > { %v4365_v50 = vmax.f32 %v3499_v42, 0.0  ;;  %v3501_v61 = vadd.f32 %v3500_v7, %v6289_v0  ;;  %v3553_v36 = vpop.f32.mrf.mxu1 }
 0x266   : > { %v6295_v2 = vmax.f32 %v4364_v49, %v4366_v33  ;;  %v4367_v28 = vmax.f32 %v3552_v30, 0.0  ;;  %v3554_v44 = vadd.f32 %v3553_v36, %v6289_v0  ;;  %v3502_v31 = vpop.f32.mrf.mxu0 }
 0x267   : > { %v4396_v51 = vmax.f32 %v3501_v61, 0.0  ;;  %v3503_v16 = vadd.f32 %v3502_v31, %v6289_v0  ;;  %v3555_v13 = vpop.f32.mrf.mxu1 }
 0x268   : > { %v6299_v17 = vmax.f32 %v4365_v50, %v4367_v28  ;;  %v4398_v26 = vmax.f32 %v3554_v44, 0.0  ;;  %v3556_v46 = vadd.f32 %v3555_v13, %v6289_v0 }
 0x269   : > { %v4397_v8 = vmax.f32 %v3503_v16, 0.0  ;;  %v3592_v25 = vpop.f32.mrf.mxu0  ;;  %v3645_v40 = vpop.f32.mrf.mxu1 }
 0x26a   : > { %v6302_v10 = vmax.f32 %v4396_v51, %v4398_v26  ;;  %v4399_v34 = vmax.f32 %v3556_v46, 0.0  ;;  %v3593_v47 = vadd.f32 %v3592_v25, %v6266_v18  ;;  %v3646_v57 = vadd.f32 %v3645_v40, %v6266_v18 }
 0x26b   : > { %v3594_v4 = vpop.f32.mrf.mxu0  ;;  %v3647_v6 = vpop.f32.mrf.mxu1 }
 0x26c   : > { %v6306_v60 = vmax.f32 %v4397_v8, %v4399_v34  ;;  %v4304_v14 = vmax.f32 %v3593_v47, 0.0  ;;  %v4306_v15 = vmax.f32 %v3646_v57, 0.0  ;;  %v3595_v23 = vadd.f32 %v3594_v4, %v6266_v18 }
 0x26d   : > { %v3648_v12 = vadd.f32 %v3647_v6, %v6266_v18  ;;  %v3596_v37 = vpop.f32.mrf.mxu0  ;;  %v3649_v27 = vpop.f32.mrf.mxu1 }
 0x26e   : > { %v6310_v5 = vmax.f32 %v4304_v14, %v4306_v15  ;;  %v4305_v20 = vmax.f32 %v3595_v23, 0.0  ;;  %v3597_v56 = vadd.f32 %v3596_v37, %v6271_v53  ;;  %v3650_v29 = vadd.f32 %v3649_v27, %v6271_v53 }
 0x26f   : > { %v4307_v9 = vmax.f32 %v3648_v12, 0.0  ;;  %v3598_v21 = vpop.f32.mrf.mxu0  ;;  %v3651_v39 = vpop.f32.mrf.mxu1 }
 0x270   : > { %v4492_v11 = vmax.f32 %v6275_v41, %v6310_v5  ;;  %v4336_v45 = vmax.f32 %v3597_v56, 0.0  ;;  %v4338_v22 = vmax.f32 %v3650_v29, 0.0  ;;  %v3599_v24 = vadd.f32 %v3598_v21, %v6271_v53 }
 0x271   : > { %v6317_v48 = vmax.f32 %v4305_v20, %v4307_v9  ;;  %v3652_v35 = vadd.f32 %v3651_v39, %v6271_v53  ;;  %v3602_v58 = vpop.f32.mrf.mxu0  ;;  %v3655_v62 = vpop.f32.mrf.mxu1 }
 0x272   : > { %v6320_v55 = vmax.f32 %v4336_v45, %v4338_v22  ;;  %v4337_v19 = vmax.f32 %v3599_v24, 0.0  ;;  %v3603_v32 = vadd.f32 %v3602_v58, %v6279_v52  ;;  %v3656_v59 = vadd.f32 %v3655_v62, %v6279_v52 }
 0x273   : > { %v4493_v54 = vmax.f32 %v6281_v38, %v6317_v48  ;;  %v4339_v1 = vmax.f32 %v3652_v35, 0.0  ;;  %v3604_v49 = vpop.f32.mrf.mxu0  ;;  %v3657_v42 = vpop.f32.mrf.mxu1 }
 0x274   : > { %v4494_v63 = vmax.f32 %v6285_v43, %v6320_v55  ;;  %v4368_v33 = vmax.f32 %v3603_v32, 0.0  ;;  %v4370_v30 = vmax.f32 %v3656_v59, 0.0  ;;  %v3605_v7 = vadd.f32 %v3604_v49, %v6279_v52 }
 0x275   : > { %v6329_v50 = vmax.f32 %v4337_v19, %v4339_v1  ;;  %v3658_v61 = vadd.f32 %v3657_v42, %v6279_v52  ;;  %v3606_v36 = vpop.f32.mrf.mxu0  ;;  %v3659_v28 = vpop.f32.mrf.mxu1 }
 0x276   : > { %v6332_v44 = vmax.f32 %v4368_v33, %v4370_v30  ;;  %v4369_v31 = vmax.f32 %v3605_v7, 0.0  ;;  %v3607_v51 = vadd.f32 %v3606_v36, %v6289_v0  ;;  %v3660_v16 = vadd.f32 %v3659_v28, %v6289_v0 }
 0x277   : > { %v4495_v13 = vmax.f32 %v6291_v3, %v6329_v50  ;;  %v4371_v26 = vmax.f32 %v3658_v61, 0.0  ;;  %v3608_v46 = vpop.f32.mrf.mxu0  ;;  %v3661_v8 = vpop.f32.mrf.mxu1 }
 0x278   : > { %v4496_v25 = vmax.f32 %v6295_v2, %v6332_v44  ;;  %v4400_v40 = vmax.f32 %v3607_v51, 0.0  ;;  %v4402_v34 = vmax.f32 %v3660_v16, 0.0  ;;  %v3609_v47 = vadd.f32 %v3608_v46, %v6289_v0 }
 0x279   : > { %v6341_v57 = vmax.f32 %v4369_v31, %v4371_v26  ;;  %v3662_v4 = vadd.f32 %v3661_v8, %v6289_v0  ;;  %v3698_v6 = vpop.f32.mrf.mxu0  ;;  %v3751_v12 = vpop.f32.mrf.mxu1 }
 0x27a   : > { %v6344_v14 = vmax.f32 %v4400_v40, %v4402_v34  ;;  %v4401_v15 = vmax.f32 %v3609_v47, 0.0  ;;  %v3699_v23 = vadd.f32 %v3698_v6, %v6266_v18  ;;  %v3752_v20 = vadd.f32 %v3751_v12, %v6266_v18 }
 0x27b   : > { %v4497_v37 = vmax.f32 %v6299_v17, %v6341_v57  ;;  %v4403_v27 = vmax.f32 %v3662_v4, 0.0  ;;  %v3700_v56 = vpop.f32.mrf.mxu0  ;;  %v3753_v39 = vpop.f32.mrf.mxu1 }
 0x27c   : > { %v4498_v29 = vmax.f32 %v6302_v10, %v6344_v14  ;;  %v4308_v9 = vmax.f32 %v3699_v23, 0.0  ;;  %v3701_v21 = vadd.f32 %v3700_v56, %v6266_v18  ;;  %v4310_v22 = vmax.f32 %v3752_v20, 0.0 }
 0x27d   : > { %v6353_v45 = vmax.f32 %v4401_v15, %v4403_v27  ;;  %v3754_v24 = vadd.f32 %v3753_v39, %v6266_v18  ;;  %v3702_v35 = vpop.f32.mrf.mxu0  ;;  %v3755_v19 = vpop.f32.mrf.mxu1 }
 0x27e   : > { %v4309_v58 = vmax.f32 %v3701_v21, 0.0  ;;  %v3703_v62 = vadd.f32 %v3702_v35, %v6271_v53  ;;  %v6359_v59 = vmax.f32 %v4308_v9, %v4310_v22  ;;  %v3756_v49 = vadd.f32 %v3755_v19, %v6271_v53 }
 0x27f   : > { %v4499_v32 = vmax.f32 %v6306_v60, %v6353_v45  ;;  %v4311_v1 = vmax.f32 %v3754_v24, 0.0  ;;  %v3704_v42 = vpop.f32.mrf.mxu0  ;;  %v3757_v7 = vpop.f32.mrf.mxu1 }
 0x280   : > { %v4340_v33 = vmax.f32 %v3703_v62, 0.0  ;;  %v3705_v30 = vadd.f32 %v3704_v42, %v6271_v53  ;;  %v4342_v36 = vmax.f32 %v3756_v49, 0.0  ;;  %v3758_v28 = vadd.f32 %v3757_v7, %v6271_v53 }
 0x281   : > { %v6363_v61 = vmax.f32 %v4309_v58, %v4311_v1  ;;  %v3708_v31 = vpop.f32.mrf.mxu0  ;;  %v3761_v26 = vpop.f32.mrf.mxu1 }
 0x282   : > { %v4341_v51 = vmax.f32 %v3705_v30, 0.0  ;;  %v3709_v16 = vadd.f32 %v3708_v31, %v6279_v52  ;;  %v6367_v46 = vmax.f32 %v4340_v33, %v4342_v36  ;;  %v4343_v8 = vmax.f32 %v3758_v28, 0.0 }
 0x283   : > { %v3762_v40 = vadd.f32 %v3761_v26, %v6279_v52  ;;  %v3710_v34 = vpop.f32.mrf.mxu0  ;;  %v3763_v6 = vpop.f32.mrf.mxu1 }
 0x284   : > { %v4372_v47 = vmax.f32 %v3709_v16, 0.0  ;;  %v3711_v4 = vadd.f32 %v3710_v34, %v6279_v52  ;;  %v6371_v15 = vmax.f32 %v4341_v51, %v4343_v8  ;;  %v3764_v12 = vadd.f32 %v3763_v6, %v6279_v52 }
 0x285   : > { %v4374_v23 = vmax.f32 %v3762_v40, 0.0  ;;  %v3712_v27 = vpop.f32.mrf.mxu0  ;;  %v3765_v9 = vpop.f32.mrf.mxu1 }
 0x286   : > { %v4373_v20 = vmax.f32 %v3711_v4, 0.0  ;;  %v3713_v56 = vadd.f32 %v3712_v27, %v6289_v0  ;;  %v4375_v39 = vmax.f32 %v3764_v12, 0.0  ;;  %v3766_v22 = vadd.f32 %v3765_v9, %v6289_v0 }
 0x287   : > { %v6375_v21 = vmax.f32 %v4372_v47, %v4374_v23  ;;  %v3714_v24 = vpop.f32.mrf.mxu0  ;;  %v3767_v62 = vpop.f32.mrf.mxu1 }
 0x288   : > { %v4404_v35 = vmax.f32 %v3713_v56, 0.0  ;;  %v3715_v58 = vadd.f32 %v3714_v24, %v6289_v0  ;;  %v6379_v19 = vmax.f32 %v4373_v20, %v4375_v39  ;;  %v4406_v1 = vmax.f32 %v3766_v22, 0.0 }
 0x289   : > { %v3768_v49 = vadd.f32 %v3767_v62, %v6289_v0  ;;  %v3804_v42 = vpop.f32.mrf.mxu0  ;;  %v3857_v7 = vpop.f32.mrf.mxu1 }
 0x28a   : > { %v4405_v33 = vmax.f32 %v3715_v58, 0.0  ;;  %v3805_v30 = vadd.f32 %v3804_v42, %v6266_v18  ;;  %v6383_v36 = vmax.f32 %v4404_v35, %v4406_v1  ;;  %v3858_v31 = vadd.f32 %v3857_v7, %v6266_v18 }
 0x28b   : > { %v4407_v28 = vmax.f32 %v3768_v49, 0.0  ;;  %v3806_v51 = vpop.f32.mrf.mxu0  ;;  %v3859_v8 = vpop.f32.mrf.mxu1 }
 0x28c   : > { %v4312_v16 = vmax.f32 %v3805_v30, 0.0  ;;  %v3807_v26 = vadd.f32 %v3806_v51, %v6266_v18  ;;  %v4314_v34 = vmax.f32 %v3858_v31, 0.0  ;;  %v3860_v47 = vadd.f32 %v3859_v8, %v6266_v18 }
 0x28d   : > { %v6387_v40 = vmax.f32 %v4405_v33, %v4407_v28  ;;  %v3808_v4 = vpop.f32.mrf.mxu0  ;;  %v3861_v12 = vpop.f32.mrf.mxu1 }
 0x28e   : > { %v4313_v6 = vmax.f32 %v3807_v26, 0.0  ;;  %v3809_v23 = vadd.f32 %v3808_v4, %v6271_v53  ;;  %v4452_v27 = vmax.f32 %v4312_v16, %v4314_v34  ;;  %v4315_v20 = vmax.f32 %v3860_v47, 0.0 }
 0x28f   : > { %v3862_v56 = vadd.f32 %v3861_v12, %v6271_v53  ;;  %v3810_v9 = vpop.f32.mrf.mxu0  ;;  %v3863_v24 = vpop.f32.mrf.mxu1 }
 0x290   : > { %v4344_v39 = vmax.f32 %v3809_v23, 0.0  ;;  %v3811_v22 = vadd.f32 %v3810_v9, %v6271_v53  ;;  %v4500_v35 = vmax.f32 %v6359_v59, %v4452_v27  ;;  %v4453_v58 = vmax.f32 %v4313_v6, %v4315_v20 }
 0x291   : > { %v4346_v62 = vmax.f32 %v3862_v56, 0.0  ;;  %v3864_v1 = vadd.f32 %v3863_v24, %v6271_v53  ;;  %v3814_v49 = vpop.f32.mrf.mxu0  ;;  %v3867_v30 = vpop.f32.mrf.mxu1 }
 0x292   : > { %v4345_v42 = vmax.f32 %v3811_v22, 0.0  ;;  %v3815_v33 = vadd.f32 %v3814_v49, %v6279_v52  ;;  %v6399_v7 = vmax.f32 %v4492_v11, %v4500_v35  ;;  %v4501_v28 = vmax.f32 %v6363_v61, %v4453_v58 }
 0x293   : > { %v4454_v31 = vmax.f32 %v4344_v39, %v4346_v62  ;;  %v4347_v51 = vmax.f32 %v3864_v1, 0.0  ;;  %v3816_v16 = vpop.f32.mrf.mxu0  ;;  %v3868_v26 = vadd.f32 %v3867_v30, %v6279_v52  ;;  %v3869_v34 = vpop.f32.mrf.mxu1 }
 0x294   : > { %v4376_v59 = vmax.f32 %v3815_v33, 0.0  ;;  %v3817_v8 = vadd.f32 %v3816_v16, %v6279_v52  ;;  %v6407_v47 = vmax.f32 %v4493_v54, %v4501_v28  ;;  %v3870_v11 = vadd.f32 %v3869_v34, %v6279_v52 }
 0x295   : > { %v4502_v41 = vmax.f32 %v6367_v46, %v4454_v31  ;;  %v4455_v5 = vmax.f32 %v4345_v42, %v4347_v51  ;;  %v3818_v61 = vpop.f32.mrf.mxu0  ;;  %v4378_v4 = vmax.f32 %v3868_v26, 0.0  ;;  %v3871_v12 = vpop.f32.mrf.mxu1 }
 0x296   : > { %v4377_v6 = vmax.f32 %v3817_v8, 0.0  ;;  %v3819_v23 = vadd.f32 %v3818_v61, %v6289_v0  ;;  %v4379_v48 = vmax.f32 %v3870_v11, 0.0  ;;  %v3872_v54 = vadd.f32 %v3871_v12, %v6289_v0 }
 0x297   : > { %v6415_v27 = vmax.f32 %v4494_v63, %v4502_v41  ;;  %v4503_v38 = vmax.f32 %v6371_v15, %v4455_v5  ;;  %v3820_v46 = vpop.f32.mrf.mxu0  ;;  %v4456_v20 = vmax.f32 %v4376_v59, %v4378_v4  ;;  %v3873_v39 = vpop.f32.mrf.mxu1 }
 0x298   : > { %v4408_v56 = vmax.f32 %v3819_v23, 0.0  ;;  %v3821_v9 = vadd.f32 %v3820_v46, %v6289_v0  ;;  %v4457_v24 = vmax.f32 %v4377_v6, %v4379_v48  ;;  %v4410_v43 = vmax.f32 %v3872_v54, 0.0 }
 0x299   : > { %v6423_v22 = vmax.f32 %v4495_v13, %v4503_v38  ;;  %v3874_v55 = vadd.f32 %v3873_v39, %v6289_v0  ;;  %v3910_v63 = vpop.f32.mrf.mxu0  ;;  %v4504_v15 = vmax.f32 %v6375_v21, %v4456_v20  ;;  %v3963_v58 = vpop.f32.mrf.mxu1 }
 0x29a   : > { %v4409_v35 = vmax.f32 %v3821_v9, 0.0  ;;  %v4505_v62 = vmax.f32 %v6379_v19, %v4457_v24  ;;  %v4458_v1 = vmax.f32 %v4408_v56, %v4410_v43  ;;  %v3911_v14 = vadd.f32 %v3910_v63, %v6266_v18 }
 0x29b   : > { %v4411_v49 = vmax.f32 %v3874_v55, 0.0  ;;  %v3912_v42 = vpop.f32.mrf.mxu0  ;;  %v6431_v3 = vmax.f32 %v4496_v25, %v4504_v15  ;;  %v3965_v50 = vpop.f32.mrf.mxu1 }
 0x29c   : > { %v6436_v13 = vmax.f32 %v4497_v37, %v4505_v62  ;;  %v4506_v21 = vmax.f32 %v6383_v36, %v4458_v1  ;;  %v4316_v45 = vmax.f32 %v3911_v14, 0.0  ;;  %v3913_v41 = vadd.f32 %v3912_v42, %v6266_v18 }
 0x29d   : > { %v4459_v33 = vmax.f32 %v4409_v35, %v4411_v49  ;;  %v3914_v30 = vpop.f32.mrf.mxu0  ;;  %v3967_v28 = vpop.f32.mrf.mxu1  ;;  %v3966_v5 = vadd.f32 %v3965_v50, %v6266_v18 }
 0x29e   : > { %v6442_v19 = vmax.f32 %v4498_v29, %v4506_v21  ;;  %v3964_v29 = vadd.f32 %v3963_v58, %v6266_v18  ;;  %v3915_v6 = vadd.f32 %v3914_v30, %v6271_v53  ;;  %v3968_v23 = vadd.f32 %v3967_v28, %v6271_v53 }
 0x29f   : > { %v4507_v2 = vmax.f32 %v6387_v40, %v4459_v33  ;;  %v3916_v44 = vpop.f32.mrf.mxu0  ;;  %v3969_v25 = vpop.f32.mrf.mxu1  ;;  %v4317_v48 = vmax.f32 %v3913_v41, 0.0  ;;  %v4319_v54 = vmax.f32 %v3966_v5, 0.0 }
 0x2a0   : > { %v3917_v43 = vadd.f32 %v3916_v44, %v6271_v53  ;;  %v3970_v55 = vadd.f32 %v3969_v25, %v6271_v53  ;;  %v4348_v58 = vmax.f32 %v3915_v6, 0.0  ;;  %v4350_v62 = vmax.f32 %v3968_v23, 0.0 }
 0x2a1   : > { %v6448_v17 = vmax.f32 %v4499_v32, %v4507_v2  ;;  %v3920_v57 = vpop.f32.mrf.mxu0  ;;  %v3973_v37 = vpop.f32.mrf.mxu1  ;;  %v4318_v32 = vmax.f32 %v3964_v29, 0.0 }
 0x2a2   : > { %v3921_v1 = vadd.f32 %v3920_v57, %v6279_v52  ;;  %v3974_v49 = vadd.f32 %v3973_v37, %v6279_v52  ;;  %v4349_v29 = vmax.f32 %v3917_v43, 0.0  ;;  %v6493_v43 = vmax.f32 %v4348_v58, %v4350_v62 }
 0x2a3   : > { %v3922_v36 = vpop.f32.mrf.mxu0  ;;  %v3975_v31 = vpop.f32.mrf.mxu1  ;;  %v6458_v38 = vmax.f32 %v4316_v45, %v4318_v32 }
 0x2a4   : > { %v3923_v50 = vadd.f32 %v3922_v36, %v6279_v52  ;;  %v3976_v21 = vadd.f32 %v3975_v31, %v6279_v52 }
 0x2a5   : > { %v3924_v51 = vpop.f32.mrf.mxu0  ;;  %v3977_v16 = vpop.f32.mrf.mxu1 }
 0x2a6   : > { %v3925_v33 = vadd.f32 %v3924_v51, %v6289_v0  ;;  %v3978_v30 = vadd.f32 %v3977_v16, %v6289_v0  ;;  %v4381_v45 = vmax.f32 %v3923_v50, 0.0  ;;  %v4383_v16 = vmax.f32 %v3976_v21, 0.0 }
 0x2a7   : > { %v3926_v59 = vpop.f32.mrf.mxu0  ;;  %v6450_v26 = vpop.f32.mrf.mxu1 }
 0x2a8   : > { %v4412_v32 = vmax.f32 %v3925_v33, 0.0  ;;  %v6477_v41 = vadd.f32 %v3926_v59, %v6289_v0  ;;  %v6481_v6 = vadd.f32 %v6450_v26, %v6289_v0 }
 0x2a9   : > { %v4016_v10 = vpop.f32.mrf.mxu0  ;;  %v4069_v40 = vpop.f32.mrf.mxu1 }
 0x2aa   : > { %v4017_v20 = vadd.f32 %v4016_v10, %v6266_v18  ;;  %v4070_v56 = vadd.f32 %v4069_v40, %v6266_v18  ;;  %v4351_v40 = vmax.f32 %v3970_v55, 0.0 }
 0x2ab   : > { %v4018_v8 = vpop.f32.mrf.mxu0  ;;  %v4071_v34 = vpop.f32.mrf.mxu1 }
 0x2ac   : > { %v4019_v9 = vadd.f32 %v4018_v8, %v6266_v18  ;;  %v4072_v39 = vadd.f32 %v4071_v34, %v6266_v18  ;;  %v4320_v2 = vmax.f32 %v4017_v20, 0.0  ;;  %v4322_v44 = vmax.f32 %v4070_v56, 0.0 }
 0x2ad   : > { %v4020_v60 = vpop.f32.mrf.mxu0  ;;  %v4073_v11 = vpop.f32.mrf.mxu1  ;;  %v4380_v34 = vmax.f32 %v3921_v1, 0.0  ;;  %v6487_v56 = vmax.f32 %v4317_v48, %v4319_v54  ;;  %v6496_v1 = vmax.f32 %v4349_v29, %v4351_v40  ;;  %v6500_v48 = vmax.f32 %v4381_v45, %v4383_v16 }
 0x2ae   : > { %v4021_v63 = vadd.f32 %v4020_v60, %v6271_v53  ;;  %v4074_v15 = vadd.f32 %v4073_v11, %v6271_v53  ;;  %v4321_v25 = vmax.f32 %v4019_v9, 0.0  ;;  %v4323_v10 = vmax.f32 %v4072_v39, 0.0 }
 0x2af   : > { %v4022_v61 = vpop.f32.mrf.mxu0  ;;  %v4075_v4 = vpop.f32.mrf.mxu1  ;;  %v4382_v60 = vmax.f32 %v3974_v49, 0.0  ;;  %v4414_v11 = vmax.f32 %v3978_v30, 0.0  ;;  %v6483_v23 = vmax.f32 %v4320_v2, %v4322_v44 }
 0x2b0   : > { %v4352_v57 = vmax.f32 %v4021_v63, 0.0  ;;  %v4354_v8 = vmax.f32 %v4074_v15, 0.0  ;;  %v4023_v36 = vadd.f32 %v4022_v61, %v6271_v53  ;;  %v4076_v31 = vadd.f32 %v4075_v4, %v6271_v53 }
 0x2b1   : > { %v4026_v12 = vpop.f32.mrf.mxu0  ;;  %v4079_v46 = vpop.f32.mrf.mxu1  ;;  %v6485_v20 = vmax.f32 %v4321_v25, %v4323_v10  ;;  %v6498_v49 = vmax.f32 %v4380_v34, %v4382_v60  ;;  %v4508_v58 = vmax.f32 %v6458_v38, %v6483_v23 }
 0x2b2   : > { %v6489_v4 = vmax.f32 %v4352_v57, %v4354_v8  ;;  %v4027_v9 = vadd.f32 %v4026_v12, %v6279_v52  ;;  %v4080_v59 = vadd.f32 %v4079_v46, %v6279_v52  ;;  %v4353_v55 = vmax.f32 %v4023_v36, 0.0 }
 0x2b3   : > { %v4028_v24 = vpop.f32.mrf.mxu0  ;;  %v4081_v35 = vpop.f32.mrf.mxu1  ;;  %v4355_v63 = vmax.f32 %v4076_v31, 0.0  ;;  %v6503_v12 = vmax.f32 %v4412_v32, %v4414_v11 }
 0x2b4   : > { %v4029_v26 = vadd.f32 %v4028_v24, %v6279_v52  ;;  %v4509_v24 = vmax.f32 %v6487_v56, %v6485_v20  ;;  %v4510_v21 = vmax.f32 %v6493_v43, %v6489_v4  ;;  %v4384_v33 = vmax.f32 %v4027_v9, 0.0 }
 0x2b5   : > { %v4030_v42 = vpop.f32.mrf.mxu0  ;;  %v4083_v28 = vpop.f32.mrf.mxu1  ;;  %v4386_v30 = vmax.f32 %v4080_v59, 0.0  ;;  %v4082_v2 = vadd.f32 %v4081_v35, %v6279_v52  ;;  %v6513_v25 = vmax.f32 %v4353_v55, %v4355_v63 }
 0x2b6   : > { %v4385_v10 = vmax.f32 %v4029_v26, 0.0  ;;  %v4031_v29 = vadd.f32 %v4030_v42, %v6289_v0  ;;  %v4084_v40 = vadd.f32 %v4083_v28, %v6289_v0 }
 0x2b7   : > { %v4032_v14 = vpop.f32.mrf.mxu0  ;;  %v4085_v37 = vpop.f32.mrf.mxu1  ;;  %v6525_v28 = vmax.f32 %v4384_v33, %v4386_v30  ;;  %v4387_v11 = vmax.f32 %v4082_v2, 0.0 }
 0x2b8   : > { %v4033_v8 = vadd.f32 %v4032_v14, %v6289_v0  ;;  %v4086_v34 = vadd.f32 %v4085_v37, %v6289_v0  ;;  %v4416_v9 = vmax.f32 %v4031_v29, 0.0 }
 0x2b9   : > { %v4122_v51 = vpop.f32.mrf.mxu0  ;;  %v4175_v5 = vpop.f32.mrf.mxu1  ;;  %v6535_v46 = vmax.f32 %v4385_v10, %v4387_v11 }
 0x2ba   : > { %v4123_v60 = vadd.f32 %v4122_v51, %v6266_v18  ;;  %v4176_v36 = vadd.f32 %v4175_v5, %v6266_v18  ;;  %v4418_v5 = vmax.f32 %v4084_v40, 0.0  ;;  %v4417_v55 = vmax.f32 %v4033_v8, 0.0 }
 0x2bb   : > { %v4124_v61 = vpop.f32.mrf.mxu0  ;;  %v4177_v39 = vpop.f32.mrf.mxu1  ;;  %v4419_v63 = vmax.f32 %v4086_v34, 0.0 }
 0x2bc   : > { %v4125_v35 = vadd.f32 %v4124_v61, %v6266_v18  ;;  %v4178_v45 = vadd.f32 %v4177_v39, %v6266_v18  ;;  %v4324_v26 = vmax.f32 %v4123_v60, 0.0 }
 0x2bd   : > { %v4126_v15 = vpop.f32.mrf.mxu0  ;;  %v4179_v50 = vpop.f32.mrf.mxu1 }
 0x2be   : > { %v4127_v16 = vadd.f32 %v4126_v15, %v6271_v53  ;;  %v4180_v42 = vadd.f32 %v4179_v50, %v6271_v53  ;;  %v4326_v15 = vmax.f32 %v4176_v36, 0.0  ;;  %v4325_v33 = vmax.f32 %v4125_v35, 0.0 }
 0x2bf   : > { %v4128_v62 = vpop.f32.mrf.mxu0  ;;  %v4181_v44 = vpop.f32.mrf.mxu1  ;;  %v4327_v30 = vmax.f32 %v4178_v45, 0.0  ;;  %v6540_v35 = vmax.f32 %v4416_v9, %v4418_v5  ;;  %v6542_v45 = vmax.f32 %v4417_v55, %v4419_v63 }
 0x2c0   : > { %v4129_v14 = vadd.f32 %v4128_v62, %v6271_v53  ;;  %v4182_v37 = vadd.f32 %v4181_v44, %v6271_v53  ;;  %v4356_v2 = vmax.f32 %v4127_v16, 0.0  ;;  %v4358_v54 = vmax.f32 %v4180_v42, 0.0 }
 0x2c1   : > { %v4132_v57 = vpop.f32.mrf.mxu0  ;;  %v4185_v31 = vpop.f32.mrf.mxu1  ;;  %v4476_v16 = vmax.f32 %v4324_v26, %v4326_v15  ;;  %v4477_v29 = vmax.f32 %v4325_v33, %v4327_v30 }
 0x2c2   : > { %v4133_v59 = vadd.f32 %v4132_v57, %v6279_v52  ;;  %v4186_v61 = vadd.f32 %v4185_v31, %v6279_v52  ;;  %v4357_v40 = vmax.f32 %v4129_v14, 0.0  ;;  %v4359_v57 = vmax.f32 %v4182_v37, 0.0 }
 0x2c3   : > { %v4134_v32 = vpop.f32.mrf.mxu0  ;;  %v4187_v51 = vpop.f32.mrf.mxu1  ;;  %v6545_v14 = vmax.f32 %v4356_v2, %v4358_v54 }
 0x2c4   : > { %v4388_v8 = vmax.f32 %v4133_v59, 0.0  ;;  %v4390_v34 = vmax.f32 %v4186_v61, 0.0  ;;  %v6538_v60 = vadd.f32 %v4134_v32, %v6279_v52  ;;  %v6548_v10 = vadd.f32 %v4187_v51, %v6279_v52 }
 0x2c5   : > { %v4136_v39 = vpop.f32.mrf.mxu0  ;;  %v4189_v50 = vpop.f32.mrf.mxu1  ;;  %v6551_v32 = vmax.f32 %v4357_v40, %v4359_v57 }
 0x2c6   : > { %v6554_v9 = vadd.f32 %v4136_v39, %v6289_v0  ;;  %v6557_v55 = vmax.f32 %v4388_v8, %v4390_v34  ;;  %v4389_v54 = vmax.f32 %v6538_v60, 0.0  ;;  %v6562_v15 = vadd.f32 %v4189_v50, %v6289_v0 }
 0x2c7   : > { %v4138_v62 = vpop.f32.mrf.mxu0  ;;  %v4191_v31 = vpop.f32.mrf.mxu1  ;;  %v4513_v60 = vmax.f32 %v6500_v48, %v6535_v46 }
 0x2c8   : > { %v6565_v33 = vadd.f32 %v4138_v62, %v6289_v0 }
 0x2c9   : > { %v4228_v36 = vpop.f32.mrf.mxu0  ;;  %v4281_v44 = vpop.f32.mrf.mxu1 }
 0x2ca   : > { %v4229_v42 = vadd.f32 %v4228_v36, %v6266_v18  ;;  %v4282_v11 = vadd.f32 %v4281_v44, %v6266_v18  ;;  %v4391_v44 = vmax.f32 %v6548_v10, 0.0  ;;  %v6572_v36 = vadd.f32 %v4191_v31, %v6289_v0 }
 0x2cb   : > { %v4230_v37 = vpop.f32.mrf.mxu0  ;;  %v4283_v61 = vpop.f32.mrf.mxu1 }
 0x2cc   : > { %v4328_v5 = vmax.f32 %v4229_v42, 0.0  ;;  %v4231_v59 = vadd.f32 %v4230_v37, %v6266_v18  ;;  %v4330_v63 = vmax.f32 %v4282_v11, 0.0  ;;  %v4284_v51 = vadd.f32 %v4283_v61, %v6266_v18 }
 0x2cd   : > { %v4232_v26 = vpop.f32.mrf.mxu0  ;;  %v4285_v2 = vpop.f32.mrf.mxu1  ;;  %v4420_v18 = vmax.f32 %v6554_v9, 0.0  ;;  %v4422_v61 = vmax.f32 %v6562_v15, 0.0  ;;  %v4421_v9 = vmax.f32 %v6565_v33, 0.0 }
 0x2ce   : > { %v4329_v39 = vmax.f32 %v4231_v59, 0.0  ;;  %v4233_v30 = vadd.f32 %v4232_v26, %v6271_v53  ;;  %v4484_v40 = vmax.f32 %v4328_v5, %v4330_v63  ;;  %v4331_v57 = vmax.f32 %v4284_v51, 0.0 }
 0x2cf   : > { %v4286_v8 = vadd.f32 %v4285_v2, %v6271_v53  ;;  %v4234_v34 = vpop.f32.mrf.mxu0  ;;  %v4287_v42 = vpop.f32.mrf.mxu1 }
 0x2d0   : > { %v4360_v50 = vmax.f32 %v4233_v30, 0.0  ;;  %v4235_v62 = vadd.f32 %v4234_v34, %v6271_v53  ;;  %v4516_v11 = vmax.f32 %v4476_v16, %v4484_v40  ;;  %v4485_v37 = vmax.f32 %v4329_v39, %v4331_v57 }
 0x2d1   : > { %v4362_v10 = vmax.f32 %v4286_v8, 0.0  ;;  %v4288_v5 = vadd.f32 %v4287_v42, %v6271_v53  ;;  %v4238_v59 = vpop.f32.mrf.mxu0  ;;  %v4291_v51 = vpop.f32.mrf.mxu1  ;;  %v4423_v53 = vmax.f32 %v6572_v36, 0.0 }
 0x2d2   : > { %v4361_v63 = vmax.f32 %v4235_v62, 0.0  ;;  %v4239_v31 = vadd.f32 %v4238_v59, %v6279_v52  ;;  %v4532_v26 = vmax.f32 %v4508_v58, %v4516_v11  ;;  %v4517_v30 = vmax.f32 %v4477_v29, %v4485_v37 }
 0x2d3   : > { %v4486_v2 = vmax.f32 %v4360_v50, %v4362_v10  ;;  %v4363_v16 = vmax.f32 %v4288_v5, 0.0  ;;  %v4240_v39 = vpop.f32.mrf.mxu0  ;;  %v4292_v15 = vadd.f32 %v4291_v51, %v6279_v52  ;;  %v4293_v57 = vpop.f32.mrf.mxu1 }
 0x2d4   : > { %v4392_v40 = vmax.f32 %v4239_v31, 0.0  ;;  %v4241_v33 = vadd.f32 %v4240_v39, %v6279_v52  ;;  %v4540_v8 = vmax.f32 %v6399_v7, %v4532_v26  ;;  %v4533_v38 = vmax.f32 %v4509_v24, %v4517_v30 }
 0x2d5   : > { %v4518_v23 = vmax.f32 %v6545_v14, %v4486_v2  ;;  %v4487_v58 = vmax.f32 %v4361_v63, %v4363_v16  ;;  %v4242_v29 = vpop.f32.mrf.mxu0  ;;  %v4394_v34 = vmax.f32 %v4292_v15, 0.0  ;;  %v4294_v36 = vadd.f32 %v4293_v57, %v6279_v52  ;;  %v4295_v42 = vpop.f32.mrf.mxu1 }
 0x2d6   : > { %v4393_v50 = vmax.f32 %v4241_v33, 0.0  ;;  %v4243_v62 = vadd.f32 %v4242_v29, %v6289_v0  ;;  %4548 = vst [vmem:[%s6597_s24] sm:$0xff] %v4540_v8  ;;  %v4541_v7 = vmax.f32 %v6407_v47, %v4533_v38  ;;  %v4296_v24 = vadd.f32 %v4295_v42, %v6289_v0 }
 0x2d7   : > { %v4534_v20 = vmax.f32 %v4510_v21, %v4518_v23  ;;  %v4519_v56 = vmax.f32 %v6551_v32, %v4487_v58  ;;  %v4244_v14 = vpop.f32.mrf.mxu0  ;;  %v4488_v52 = vmax.f32 %v4392_v40, %v4394_v34  ;;  %v4395_v11 = vmax.f32 %v4294_v36, 0.0  ;;  %v4297_v5 = vpop.f32.mrf.mxu1 }
 0x2d8   : > { %v4424_v37 = vmax.f32 %v4243_v62, 0.0  ;;  %v4245_v10 = vadd.f32 %v4244_v14, %v6289_v0  ;;  %4549 = vst [vmem:[%s6597_s24 + $0x8] sm:$0xff] %v4541_v7  ;;  %v6857_v47 = vmax.f32 %v6496_v1, %v6513_v25  ;;  %v4426_v43 = vmax.f32 %v4296_v24, 0.0 }
 0x2d9   : > { %v4542_v59 = vmax.f32 %v6415_v27, %v4534_v20  ;;  %v4298_v21 = vadd.f32 %v4297_v5, %v6289_v0  ;;  %v4481_v32 = vmax.f32 %v4389_v54, %v4391_v44  ;;  %v4520_v63 = vmax.f32 %v6557_v55, %v4488_v52 }
 0x2da   : > { %v4535_v4 = vmax.f32 %v6857_v47, %v4519_v56  ;;  %v4489_v31 = vmax.f32 %v4393_v50, %v4395_v11  ;;  %v4425_v51 = vmax.f32 %v4245_v10, 0.0  ;;  %v4482_v26 = vmax.f32 %v4420_v18, %v4422_v61 }
 0x2db   : > { %4550 = vst [vmem:[%s6597_s24 + $0x10] sm:$0xff] %v4542_v59  ;;  %v4490_v27 = vmax.f32 %v4424_v37, %v4426_v43  ;;  %v4427_v2 = vmax.f32 %v4298_v21, 0.0  ;;  %v6858_v1 = vmax.f32 %v6481_v6, 0.0  ;;  %v6859_v25 = vmax.f32 %v6477_v41, 0.0 }
 0x2dc   : > { %v4543_v30 = vmax.f32 %v6423_v22, %v4535_v4  ;;  %v6860_v55 = vmax.f32 %v6498_v49, %v6525_v28  ;;  %v4521_v44 = vmax.f32 %v4481_v32, %v4489_v31  ;;  %v4514_v22 = vmax.f32 %v6503_v12, %v6540_v35 }
 0x2dd   : > { %v4467_v0 = vmax.f32 %v6859_v25, %v6858_v1  ;;  %v4483_v18 = vmax.f32 %v4421_v9, %v4423_v53  ;;  %v4522_v6 = vmax.f32 %v4482_v26, %v4490_v27  ;;  %v4491_v61 = vmax.f32 %v4425_v51, %v4427_v2 }
 0x2de   : > { %v4536_v54 = vmax.f32 %v6860_v55, %v4520_v63  ;;  %4551 = vst [vmem:[%s6597_s24 + $0x18] sm:$0xff] %v4543_v30  ;;  %v4537_v16 = vmax.f32 %v4513_v60, %v4521_v44 }
 0x2df   : > { %v4515_v48 = vmax.f32 %v4467_v0, %v6542_v45  ;;  %v4538_v46 = vmax.f32 %v4514_v22, %v4522_v6  ;;  %v4523_v39 = vmax.f32 %v4483_v18, %v4491_v61 }
 0x2e0   : > { %v4544_v41 = vmax.f32 %v6431_v3, %v4536_v54  ;;  %v4545_v49 = vmax.f32 %v6436_v13, %v4537_v16  ;;  %v4578_v3 = vld [vmem:[%s6597_s24] sm:$0xff] (%p5029_p5)  ;;  %v4580_v13 = vld [vmem:[%s6597_s24 + $0x8] sm:$0xff] (%p5029_p5) }
 0x2e1   : > { %v4546_v28 = vmax.f32 %v6442_v19, %v4538_v46  ;;  %v4539_v40 = vmax.f32 %v4515_v48, %v4523_v39  ;;  %4562 = sbr.rel (!%p5029_p5) target bundleno = 750 (0x2ee), region = 75  ;;  %4579 = vst [vmem:[%s4565_s15] sm:$0xff] (%p5029_p5), %v4578_v3  ;;  %4581 = vst [vmem:[%s4565_s15 + $0x8] sm:$0xff] (%p5029_p5), %v4580_v13 }
 0x2e2   : > { %4552 = vst [vmem:[%s6597_s24 + $0x20] sm:$0xff] %v4544_v41  ;;  %4553 = vst [vmem:[%s6597_s24 + $0x28] sm:$0xff] %v4545_v49  ;;  %v4582_v19 = vld [vmem:[%s6597_s24 + $0x10] sm:$0xff] (%p5029_p5) }
 0x2e3   : > { %4554 = vst [vmem:[%s6597_s24 + $0x30] sm:$0xff] %v4546_v28  ;;  %v4547_v12 = vmax.f32 %v6448_v17, %v4539_v40  ;;  %4583 = vst [vmem:[%s4565_s15 + $0x20] sm:$0xff] (%p5029_p5), %v4582_v19 }
 0x2e5   : > { %4555 = vst [vmem:[%s6597_s24 + $0x38] sm:$0xff] %v4547_v12  ;;  %v4584_v17 = vld [vmem:[%s6597_s24 + $0x18] sm:$0xff] (%p5029_p5) }
 0x2e6   : > { %4585 = vst [vmem:[%s4565_s15 + $0x28] sm:$0xff] %v4584_v17 }
 0x2e9   : > { %v4586_v35 = vld [vmem:[%s6597_s24 + $0x20] sm:$0xff]  ;;  %v4588_v45 = vld [vmem:[%s6597_s24 + $0x28] sm:$0xff] }
 0x2ea   : > { %4587 = vst [vmem:[%s4565_s15 + $0x40] sm:$0xff] %v4586_v35  ;;  %4589 = vst [vmem:[%s4565_s15 + $0x48] sm:$0xff] %v4588_v45  ;;  %v4590_v9 = vld [vmem:[%s6597_s24 + $0x30] sm:$0xff] }
 0x2eb   : > { %4591 = vst [vmem:[%s4565_s15 + $0x60] sm:$0xff] %v4590_v9 }
 0x2ec   : > { %v4592_v53 = vld [vmem:[%s6597_s24 + $0x38] sm:$0xff] }
 0x2ed   : > { %4593 = vst [vmem:[%s4565_s15 + $0x68] sm:$0xff] %v4592_v53 }
 0x2ee PF: > { %p14_p11 = scmp.ge.s32.totalorder %s5017_s28, 4   ;;  %s6861_s24 = smov %s4949_s25 }
 0x2ef   : > { %s6862_s25 = smov %s5027_s8  ;;  %s6863_s26 = smov %s5017_s28 }
 0x2f0   :  { %16 = sbr.rel (!%p14_p11) target bundleno = 2 (0x2), region = 132 }

</bundles_post_ra>
